<compile_context>
chip_gen: v7x
topology: tpu7x:2x2x1
jax: 0.10.0
libtpu: 0.0.40
codegen_flags: <defaults>
</compile_context>

<pallas_src>
import jax
import jax.numpy as jnp
from jax.experimental import pallas as pl
from jax.experimental.pallas import tpu as pltpu

# Original code uses FIVE = 200 against in_features = 784.  We run small
# shapes, so scale FIVE down (keeps in_features / FIVE - 1 > 0 for the log()
# in the mask_u init, same regime as the original).
FIVE = 8


def _make_fused_net_kernel(num_layers):
    """Kernel over refs: x, then per layer (mask, W1, W2, W3, W4, rand), then out."""

    def kernel(*refs):
        x_ref = refs[0]
        out_ref = refs[-1]
        lrefs = refs[1:-1]

        h = x_ref[...]                                   # (B, F) lane-dense activations
        for l in range(num_layers):
            m_ref, w1_ref, w2_ref, w3_ref, w4_ref, r_ref = lrefs[6 * l:6 * (l + 1)]
            m = m_ref[...]                               # (O, F) binary {0, 1} mask
            # Masked inputs for ALL O output neurons at once: (O, B, F).
            xm = h[None, :, :] * m[:, None, :]
            # Batched MXU contractions over the O axis, f32 accumulation.
            a = jnp.einsum('obf,ofh->obh', xm, w1_ref[...],
                           preferred_element_type=jnp.float32)
            a = jnp.maximum(a, 0.0)
            a = jnp.einsum('obh,ohk->obk', a, w2_ref[...],
                           preferred_element_type=jnp.float32)
            a = jnp.maximum(a, 0.0)
            a = jnp.einsum('obh,ohk->obk', a, w3_ref[...],
                           preferred_element_type=jnp.float32)
            a = jnp.maximum(a, 0.0)
            # h @ W4[o] for every o at once: lane reduction -> (O, B), then a
            # tiny transpose so the activation / output slab is (B, O).
            s = jnp.sum(a * w4_ref[...][:, None, :], axis=-1)    # (O, B)
            p = jax.nn.sigmoid(s.T)                              # (B, O)
            # Quantized.forward: (p >= uniform) * 2 - 1
            h = jnp.where(p >= r_ref[...], 1.0, -1.0)            # (B, O) -> next layer
        out_ref[...] = h                                 # single lane-dense store

    return kernel


def fused_net_apply(x, layers, rand_outs):
    """x: (B, F0). layers[l]: dict(m_bin (O,F), W1 (O,F,H), W2/W3 (O,H,H), W4 (O,H)).
    rand_outs[l]: (B, O) uniforms for the output quantization.  Returns (B, O_last)."""
    B = x.shape[0]
    args = [x]
    for lp, r in zip(layers, rand_outs):
        args += [lp["m_bin"], lp["W1"], lp["W2"], lp["W3"], lp["W4"], r]
    O_last = layers[-1]["W4"].shape[0]
    vmem = pltpu.MemorySpace.VMEM
    return pl.pallas_call(
        _make_fused_net_kernel(len(layers)),
        out_shape=jax.ShapeDtypeStruct((B, O_last), jnp.float32),
        # No grid: single invocation, every array is a whole-array block in VMEM.
        # TODO(synk): at production scale (F_in=784, O~200) re-introduce an O-chunk
        # grid sized for v7x's 64 MiB VMEM and cast matmul operands to bf16.
        in_specs=[pl.BlockSpec(memory_space=vmem) for _ in args],
        out_specs=pl.BlockSpec(memory_space=vmem),
    )(*args)


def quantized_mask(mask, mask_u, rand_u):
    """BLayer._quantized_mask, train path (test=0).  Plain-JAX parameter glue."""
    mean = jnp.mean(mask, axis=-1, keepdims=True)
    std = jnp.std(mask, axis=-1, ddof=1, keepdims=True)   # torch.std is unbiased
    m = (mask - mean) / std
    m = m * 1.0 + mask_u
    m = jax.nn.sigmoid(m)
    mask_loss = jnp.mean((jnp.sum(m, axis=-1) - FIVE) ** 2)
    m_bin = (m >= rand_u).astype(jnp.float32)             # (Quantized(m) + 1) / 2
    return m_bin, mask_loss


def init_blayer(key, in_f, out_f, hid):
    k1, k2, k3, k4, k5 = jax.random.split(key, 5)
    mask = jax.random.normal(k1, (out_f, in_f), jnp.float32)
    mask_u = jnp.log(jnp.zeros((out_f, 1), jnp.float32)
                     + in_f * 1.0 / FIVE - 1.0) / -0.84737
    W1 = jax.random.normal(k2, (out_f, in_f, hid), jnp.float32) / 2.236
    W2 = jax.random.normal(k3, (out_f, hid, hid), jnp.float32) / hid ** 0.5
    W3 = jax.random.normal(k4, (out_f, hid, hid), jnp.float32) / hid ** 0.5
    # Stored as (O, H) == original (O, H, 1) squeezed.
    W4 = jax.random.normal(k5, (out_f, hid), jnp.float32) / hid ** 0.5
    return dict(mask=mask, mask_u=mask_u, W1=W1, W2=W2, W3=W3, W4=W4)


def net_forward(params, x, key):
    B = x.shape[0]
    layers, rand_outs, losses = [], [], []
    for lp in params["layers"]:
        O, F_in = lp["mask"].shape
        key, km, ko = jax.random.split(key, 3)
        # The original draws CUDA uniforms inside Quantized.forward; we draw
        # equivalent uniforms with jax.random (lane-dense (B, O) for the output).
        rand_mask = jax.random.uniform(km, (O, F_in), jnp.float32)
        rand_out = jax.random.uniform(ko, (B, O), jnp.float32)
        m_bin, ml = quantized_mask(lp["mask"], lp["mask_u"], rand_mask)
        layers.append(dict(m_bin=m_bin, W1=lp["W1"], W2=lp["W2"],
                           W3=lp["W3"], W4=lp["W4"]))
        rand_outs.append(rand_out)
        losses.append(ml)
    h = fused_net_apply(x, layers, rand_outs)              # (B, O_last) in {-1, +1}
    score = h.reshape(B, 10, -1).mean(-1) * params["score_K"]
    return score, (losses[0] + losses[1] + losses[2]) / 2.0


if __name__ == "__main__":
    # Small shapes consistent with the module: Net(hid, f) with a 10-way
    # readout at the end (f[-1] must be divisible by 10).
    IN_F, HID, BATCH = 32, 16, 4
    F_SIZES = [20, 20, 20]

    key = jax.random.PRNGKey(0)
    key, k0, k1, k2, kx, kf = jax.random.split(key, 6)
    params = {
        "layers": [
            init_blayer(k0, IN_F, F_SIZES[0], HID),
            init_blayer(k1, F_SIZES[0], F_SIZES[1], HID),
            init_blayer(k2, F_SIZES[1], F_SIZES[2], HID),
        ],
        "score_K": jnp.float32(15.0),
    }
    x = jax.random.uniform(kx, (BATCH, IN_F), jnp.float32)

    score, mask_loss = net_forward(params, x, kf)
    jax.block_until_ready((score, mask_loss))
    assert score.shape == (BATCH, 10) and score.dtype == jnp.float32
    assert jnp.isfinite(score).all() and jnp.isfinite(mask_loss)
    print("KERNEL_OK")
</pallas_src>

<mosaic_0001>
module attributes {stable_mosaic.version = 11 : i64} {
  func.func @kernel(%arg0: memref<4x32xf32, #tpu.memory_space<vmem>>, %arg1: memref<20x32xf32, #tpu.memory_space<vmem>>, %arg2: memref<20x32x16xf32, #tpu.memory_space<vmem>>, %arg3: memref<20x16x16xf32, #tpu.memory_space<vmem>>, %arg4: memref<20x16x16xf32, #tpu.memory_space<vmem>>, %arg5: memref<20x16xf32, #tpu.memory_space<vmem>>, %arg6: memref<4x20xf32, #tpu.memory_space<vmem>>, %arg7: memref<20x20xf32, #tpu.memory_space<vmem>>, %arg8: memref<20x20x16xf32, #tpu.memory_space<vmem>>, %arg9: memref<20x16x16xf32, #tpu.memory_space<vmem>>, %arg10: memref<20x16x16xf32, #tpu.memory_space<vmem>>, %arg11: memref<20x16xf32, #tpu.memory_space<vmem>>, %arg12: memref<4x20xf32, #tpu.memory_space<vmem>>, %arg13: memref<20x20xf32, #tpu.memory_space<vmem>>, %arg14: memref<20x20x16xf32, #tpu.memory_space<vmem>>, %arg15: memref<20x16x16xf32, #tpu.memory_space<vmem>>, %arg16: memref<20x16x16xf32, #tpu.memory_space<vmem>>, %arg17: memref<20x16xf32, #tpu.memory_space<vmem>>, %arg18: memref<4x20xf32, #tpu.memory_space<vmem>>, %arg19: memref<4x20xf32, #tpu.memory_space<vmem>>) attributes {dimension_semantics = [], scalar_prefetch = 0 : i64, scratch_operands = 0 : i64, tpu.core_type = #tpu.core_type<tc>} {
    %c0 = arith.constant 0 : index
    %c0_0 = arith.constant 0 : index
    %0 = vector.load %arg0[%c0, %c0_0] : memref<4x32xf32, #tpu.memory_space<vmem>>, vector<4x32xf32>
    %c0_1 = arith.constant 0 : index
    %c0_2 = arith.constant 0 : index
    %1 = vector.load %arg1[%c0_1, %c0_2] : memref<20x32xf32, #tpu.memory_space<vmem>>, vector<20x32xf32>
    %2 = vector.shape_cast %0 : vector<4x32xf32> to vector<1x4x32xf32>
    %3 = vector.shape_cast %1 : vector<20x32xf32> to vector<20x1x32xf32>
    %4 = vector.broadcast %2 : vector<1x4x32xf32> to vector<20x4x32xf32>
    %5 = vector.broadcast %3 : vector<20x1x32xf32> to vector<20x4x32xf32>
    %6 = arith.mulf %4, %5 : vector<20x4x32xf32>
    %c0_3 = arith.constant 0 : index
    %c0_4 = arith.constant 0 : index
    %c0_5 = arith.constant 0 : index
    %7 = vector.load %arg2[%c0_3, %c0_4, %c0_5] : memref<20x32x16xf32, #tpu.memory_space<vmem>>, vector<20x32x16xf32>
    "tpu.trace_start"() <{level = 10 : i32, message = "obf,ofh->obh"}> : () -> ()
    %cst = arith.constant dense<0.000000e+00> : vector<20x4x16xf32>
    %8 = tpu.matmul %6, %7, %cst {dimension_numbers = #tpu.dot_dimension_numbers<[2], [1], [1], [2], [0, 0, 0, 1, 1, 2], [0], [0]>} : vector<20x4x32xf32>, vector<20x32x16xf32>, vector<20x4x16xf32> -> vector<20x4x16xf32>
    "tpu.trace_stop"() : () -> ()
    %cst_6 = arith.constant 0.000000e+00 : f32
    %9 = vector.broadcast %cst_6 : f32 to vector<20x4x16xf32>
    %10 = arith.maximumf %8, %9 : vector<20x4x16xf32>
    %c0_7 = arith.constant 0 : index
    %c0_8 = arith.constant 0 : index
    %c0_9 = arith.constant 0 : index
    %11 = vector.load %arg3[%c0_7, %c0_8, %c0_9] : memref<20x16x16xf32, #tpu.memory_space<vmem>>, vector<20x16x16xf32>
    "tpu.trace_start"() <{level = 10 : i32, message = "obh,ohk->obk"}> : () -> ()
    %cst_10 = arith.constant dense<0.000000e+00> : vector<20x4x16xf32>
    %12 = tpu.matmul %10, %11, %cst_10 {dimension_numbers = #tpu.dot_dimension_numbers<[2], [1], [1], [2], [0, 0, 0, 1, 1, 2], [0], [0]>} : vector<20x4x16xf32>, vector<20x16x16xf32>, vector<20x4x16xf32> -> vector<20x4x16xf32>
    "tpu.trace_stop"() : () -> ()
    %cst_11 = arith.constant 0.000000e+00 : f32
    %13 = vector.broadcast %cst_11 : f32 to vector<20x4x16xf32>
    %14 = arith.maximumf %12, %13 : vector<20x4x16xf32>
    %c0_12 = arith.constant 0 : index
    %c0_13 = arith.constant 0 : index
    %c0_14 = arith.constant 0 : index
    %15 = vector.load %arg4[%c0_12, %c0_13, %c0_14] : memref<20x16x16xf32, #tpu.memory_space<vmem>>, vector<20x16x16xf32>
    "tpu.trace_start"() <{level = 10 : i32, message = "obh,ohk->obk"}> : () -> ()
    %cst_15 = arith.constant dense<0.000000e+00> : vector<20x4x16xf32>
    %16 = tpu.matmul %14, %15, %cst_15 {dimension_numbers = #tpu.dot_dimension_numbers<[2], [1], [1], [2], [0, 0, 0, 1, 1, 2], [0], [0]>} : vector<20x4x16xf32>, vector<20x16x16xf32>, vector<20x4x16xf32> -> vector<20x4x16xf32>
    "tpu.trace_stop"() : () -> ()
    %cst_16 = arith.constant 0.000000e+00 : f32
    %17 = vector.broadcast %cst_16 : f32 to vector<20x4x16xf32>
    %18 = arith.maximumf %16, %17 : vector<20x4x16xf32>
    %c0_17 = arith.constant 0 : index
    %c0_18 = arith.constant 0 : index
    %19 = vector.load %arg5[%c0_17, %c0_18] : memref<20x16xf32, #tpu.memory_space<vmem>>, vector<20x16xf32>
    %20 = vector.shape_cast %19 : vector<20x16xf32> to vector<20x1x16xf32>
    %21 = vector.broadcast %20 : vector<20x1x16xf32> to vector<20x4x16xf32>
    %22 = arith.mulf %18, %21 : vector<20x4x16xf32>
    %cst_19 = arith.constant dense<0.000000e+00> : vector<20x4xf32>
    %23 = vector.multi_reduction <add>, %22, %cst_19 [2] : vector<20x4x16xf32> to vector<20x4xf32>
    %24 = tpu.transpose %23, [1, 0] : vector<20x4xf32> -> vector<4x20xf32>
    %25 = arith.negf %24 : vector<4x20xf32>
    %26 = math.exp %25 : vector<4x20xf32>
    %cst_20 = arith.constant 1.000000e+00 : f32
    %27 = vector.broadcast %cst_20 : f32 to vector<4x20xf32>
    %28 = arith.addf %27, %26 : vector<4x20xf32>
    %29 = arith.divf %27, %28 : vector<4x20xf32>
    %c0_21 = arith.constant 0 : index
    %c0_22 = arith.constant 0 : index
    %30 = vector.load %arg6[%c0_21, %c0_22] : memref<4x20xf32, #tpu.memory_space<vmem>>, vector<4x20xf32>
    %31 = arith.cmpf oge, %29, %30 : vector<4x20xf32>
    %cst_23 = arith.constant 1.000000e+00 : f32
    %cst_24 = arith.constant -1.000000e+00 : f32
    %32 = vector.broadcast %cst_23 : f32 to vector<4x20xf32>
    %33 = vector.broadcast %cst_24 : f32 to vector<4x20xf32>
    %34 = arith.select %31, %32, %33 : vector<4x20xi1>, vector<4x20xf32>
    %c0_25 = arith.constant 0 : index
    %c0_26 = arith.constant 0 : index
    %35 = vector.load %arg7[%c0_25, %c0_26] : memref<20x20xf32, #tpu.memory_space<vmem>>, vector<20x20xf32>
    %36 = vector.shape_cast %34 : vector<4x20xf32> to vector<1x4x20xf32>
    %37 = vector.shape_cast %35 : vector<20x20xf32> to vector<20x1x20xf32>
    %38 = vector.broadcast %36 : vector<1x4x20xf32> to vector<20x4x20xf32>
    %39 = vector.broadcast %37 : vector<20x1x20xf32> to vector<20x4x20xf32>
    %40 = arith.mulf %38, %39 : vector<20x4x20xf32>
    %c0_27 = arith.constant 0 : index
    %c0_28 = arith.constant 0 : index
    %c0_29 = arith.constant 0 : index
    %41 = vector.load %arg8[%c0_27, %c0_28, %c0_29] : memref<20x20x16xf32, #tpu.memory_space<vmem>>, vector<20x20x16xf32>
    "tpu.trace_start"() <{level = 10 : i32, message = "obf,ofh->obh"}> : () -> ()
    %cst_30 = arith.constant dense<0.000000e+00> : vector<20x4x16xf32>
    %42 = tpu.matmul %40, %41, %cst_30 {dimension_numbers = #tpu.dot_dimension_numbers<[2], [1], [1], [2], [0, 0, 0, 1, 1, 2], [0], [0]>} : vector<20x4x20xf32>, vector<20x20x16xf32>, vector<20x4x16xf32> -> vector<20x4x16xf32>
    "tpu.trace_stop"() : () -> ()
    %cst_31 = arith.constant 0.000000e+00 : f32
    %43 = vector.broadcast %cst_31 : f32 to vector<20x4x16xf32>
    %44 = arith.maximumf %42, %43 : vector<20x4x16xf32>
    %c0_32 = arith.constant 0 : index
    %c0_33 = arith.constant 0 : index
    %c0_34 = arith.constant 0 : index
    %45 = vector.load %arg9[%c0_32, %c0_33, %c0_34] : memref<20x16x16xf32, #tpu.memory_space<vmem>>, vector<20x16x16xf32>
    "tpu.trace_start"() <{level = 10 : i32, message = "obh,ohk->obk"}> : () -> ()
    %cst_35 = arith.constant dense<0.000000e+00> : vector<20x4x16xf32>
    %46 = tpu.matmul %44, %45, %cst_35 {dimension_numbers = #tpu.dot_dimension_numbers<[2], [1], [1], [2], [0, 0, 0, 1, 1, 2], [0], [0]>} : vector<20x4x16xf32>, vector<20x16x16xf32>, vector<20x4x16xf32> -> vector<20x4x16xf32>
    "tpu.trace_stop"() : () -> ()
    %cst_36 = arith.constant 0.000000e+00 : f32
    %47 = vector.broadcast %cst_36 : f32 to vector<20x4x16xf32>
    %48 = arith.maximumf %46, %47 : vector<20x4x16xf32>
    %c0_37 = arith.constant 0 : index
    %c0_38 = arith.constant 0 : index
    %c0_39 = arith.constant 0 : index
    %49 = vector.load %arg10[%c0_37, %c0_38, %c0_39] : memref<20x16x16xf32, #tpu.memory_space<vmem>>, vector<20x16x16xf32>
    "tpu.trace_start"() <{level = 10 : i32, message = "obh,ohk->obk"}> : () -> ()
    %cst_40 = arith.constant dense<0.000000e+00> : vector<20x4x16xf32>
    %50 = tpu.matmul %48, %49, %cst_40 {dimension_numbers = #tpu.dot_dimension_numbers<[2], [1], [1], [2], [0, 0, 0, 1, 1, 2], [0], [0]>} : vector<20x4x16xf32>, vector<20x16x16xf32>, vector<20x4x16xf32> -> vector<20x4x16xf32>
    "tpu.trace_stop"() : () -> ()
    %cst_41 = arith.constant 0.000000e+00 : f32
    %51 = vector.broadcast %cst_41 : f32 to vector<20x4x16xf32>
    %52 = arith.maximumf %50, %51 : vector<20x4x16xf32>
    %c0_42 = arith.constant 0 : index
    %c0_43 = arith.constant 0 : index
    %53 = vector.load %arg11[%c0_42, %c0_43] : memref<20x16xf32, #tpu.memory_space<vmem>>, vector<20x16xf32>
    %54 = vector.shape_cast %53 : vector<20x16xf32> to vector<20x1x16xf32>
    %55 = vector.broadcast %54 : vector<20x1x16xf32> to vector<20x4x16xf32>
    %56 = arith.mulf %52, %55 : vector<20x4x16xf32>
    %cst_44 = arith.constant dense<0.000000e+00> : vector<20x4xf32>
    %57 = vector.multi_reduction <add>, %56, %cst_44 [2] : vector<20x4x16xf32> to vector<20x4xf32>
    %58 = tpu.transpose %57, [1, 0] : vector<20x4xf32> -> vector<4x20xf32>
    %59 = arith.negf %58 : vector<4x20xf32>
    %60 = math.exp %59 : vector<4x20xf32>
    %cst_45 = arith.constant 1.000000e+00 : f32
    %61 = vector.broadcast %cst_45 : f32 to vector<4x20xf32>
    %62 = arith.addf %61, %60 : vector<4x20xf32>
    %63 = arith.divf %61, %62 : vector<4x20xf32>
    %c0_46 = arith.constant 0 : index
    %c0_47 = arith.constant 0 : index
    %64 = vector.load %arg12[%c0_46, %c0_47] : memref<4x20xf32, #tpu.memory_space<vmem>>, vector<4x20xf32>
    %65 = arith.cmpf oge, %63, %64 : vector<4x20xf32>
    %cst_48 = arith.constant 1.000000e+00 : f32
    %cst_49 = arith.constant -1.000000e+00 : f32
    %66 = vector.broadcast %cst_48 : f32 to vector<4x20xf32>
    %67 = vector.broadcast %cst_49 : f32 to vector<4x20xf32>
    %68 = arith.select %65, %66, %67 : vector<4x20xi1>, vector<4x20xf32>
    %c0_50 = arith.constant 0 : index
    %c0_51 = arith.constant 0 : index
    %69 = vector.load %arg13[%c0_50, %c0_51] : memref<20x20xf32, #tpu.memory_space<vmem>>, vector<20x20xf32>
    %70 = vector.shape_cast %68 : vector<4x20xf32> to vector<1x4x20xf32>
    %71 = vector.shape_cast %69 : vector<20x20xf32> to vector<20x1x20xf32>
    %72 = vector.broadcast %70 : vector<1x4x20xf32> to vector<20x4x20xf32>
    %73 = vector.broadcast %71 : vector<20x1x20xf32> to vector<20x4x20xf32>
    %74 = arith.mulf %72, %73 : vector<20x4x20xf32>
    %c0_52 = arith.constant 0 : index
    %c0_53 = arith.constant 0 : index
    %c0_54 = arith.constant 0 : index
    %75 = vector.load %arg14[%c0_52, %c0_53, %c0_54] : memref<20x20x16xf32, #tpu.memory_space<vmem>>, vector<20x20x16xf32>
    "tpu.trace_start"() <{level = 10 : i32, message = "obf,ofh->obh"}> : () -> ()
    %cst_55 = arith.constant dense<0.000000e+00> : vector<20x4x16xf32>
    %76 = tpu.matmul %74, %75, %cst_55 {dimension_numbers = #tpu.dot_dimension_numbers<[2], [1], [1], [2], [0, 0, 0, 1, 1, 2], [0], [0]>} : vector<20x4x20xf32>, vector<20x20x16xf32>, vector<20x4x16xf32> -> vector<20x4x16xf32>
    "tpu.trace_stop"() : () -> ()
    %cst_56 = arith.constant 0.000000e+00 : f32
    %77 = vector.broadcast %cst_56 : f32 to vector<20x4x16xf32>
    %78 = arith.maximumf %76, %77 : vector<20x4x16xf32>
    %c0_57 = arith.constant 0 : index
    %c0_58 = arith.constant 0 : index
    %c0_59 = arith.constant 0 : index
    %79 = vector.load %arg15[%c0_57, %c0_58, %c0_59] : memref<20x16x16xf32, #tpu.memory_space<vmem>>, vector<20x16x16xf32>
    "tpu.trace_start"() <{level = 10 : i32, message = "obh,ohk->obk"}> : () -> ()
    %cst_60 = arith.constant dense<0.000000e+00> : vector<20x4x16xf32>
    %80 = tpu.matmul %78, %79, %cst_60 {dimension_numbers = #tpu.dot_dimension_numbers<[2], [1], [1], [2], [0, 0, 0, 1, 1, 2], [0], [0]>} : vector<20x4x16xf32>, vector<20x16x16xf32>, vector<20x4x16xf32> -> vector<20x4x16xf32>
    "tpu.trace_stop"() : () -> ()
    %cst_61 = arith.constant 0.000000e+00 : f32
    %81 = vector.broadcast %cst_61 : f32 to vector<20x4x16xf32>
    %82 = arith.maximumf %80, %81 : vector<20x4x16xf32>
    %c0_62 = arith.constant 0 : index
    %c0_63 = arith.constant 0 : index
    %c0_64 = arith.constant 0 : index
    %83 = vector.load %arg16[%c0_62, %c0_63, %c0_64] : memref<20x16x16xf32, #tpu.memory_space<vmem>>, vector<20x16x16xf32>
    "tpu.trace_start"() <{level = 10 : i32, message = "obh,ohk->obk"}> : () -> ()
    %cst_65 = arith.constant dense<0.000000e+00> : vector<20x4x16xf32>
    %84 = tpu.matmul %82, %83, %cst_65 {dimension_numbers = #tpu.dot_dimension_numbers<[2], [1], [1], [2], [0, 0, 0, 1, 1, 2], [0], [0]>} : vector<20x4x16xf32>, vector<20x16x16xf32>, vector<20x4x16xf32> -> vector<20x4x16xf32>
    "tpu.trace_stop"() : () -> ()
    %cst_66 = arith.constant 0.000000e+00 : f32
    %85 = vector.broadcast %cst_66 : f32 to vector<20x4x16xf32>
    %86 = arith.maximumf %84, %85 : vector<20x4x16xf32>
    %c0_67 = arith.constant 0 : index
    %c0_68 = arith.constant 0 : index
    %87 = vector.load %arg17[%c0_67, %c0_68] : memref<20x16xf32, #tpu.memory_space<vmem>>, vector<20x16xf32>
    %88 = vector.shape_cast %87 : vector<20x16xf32> to vector<20x1x16xf32>
    %89 = vector.broadcast %88 : vector<20x1x16xf32> to vector<20x4x16xf32>
    %90 = arith.mulf %86, %89 : vector<20x4x16xf32>
    %cst_69 = arith.constant dense<0.000000e+00> : vector<20x4xf32>
    %91 = vector.multi_reduction <add>, %90, %cst_69 [2] : vector<20x4x16xf32> to vector<20x4xf32>
    %92 = tpu.transpose %91, [1, 0] : vector<20x4xf32> -> vector<4x20xf32>
    %93 = arith.negf %92 : vector<4x20xf32>
    %94 = math.exp %93 : vector<4x20xf32>
    %cst_70 = arith.constant 1.000000e+00 : f32
    %95 = vector.broadcast %cst_70 : f32 to vector<4x20xf32>
    %96 = arith.addf %95, %94 : vector<4x20xf32>
    %97 = arith.divf %95, %96 : vector<4x20xf32>
    %c0_71 = arith.constant 0 : index
    %c0_72 = arith.constant 0 : index
    %98 = vector.load %arg18[%c0_71, %c0_72] : memref<4x20xf32, #tpu.memory_space<vmem>>, vector<4x20xf32>
    %99 = arith.cmpf oge, %97, %98 : vector<4x20xf32>
    %cst_73 = arith.constant 1.000000e+00 : f32
    %cst_74 = arith.constant -1.000000e+00 : f32
    %100 = vector.broadcast %cst_73 : f32 to vector<4x20xf32>
    %101 = vector.broadcast %cst_74 : f32 to vector<4x20xf32>
    %102 = arith.select %99, %100, %101 : vector<4x20xi1>, vector<4x20xf32>
    %c0_75 = arith.constant 0 : index
    %c0_76 = arith.constant 0 : index
    %103 = vector.load %arg19[%c0_75, %c0_76] : memref<4x20xf32, #tpu.memory_space<vmem>>, vector<4x20xf32>
    tpu.vector_store %arg19[%c0_75, %c0_76], %102 {strides = array<i32>} : memref<4x20xf32, #tpu.memory_space<vmem>>, vector<4x20xf32>,
    return
  }
}

</mosaic_0001>

<bundles_post_ra>
// kernel: tpu_custom_call.1
= control target key start
LH: loop header
LB: loop body
LE: loop exit
PB: predicated region body
PF: predicated region fallthrough
CT: control target
= control target key end

     0   :  { %s21834_s0 = inlined_call_operand.vmem [shape: f32[4,32], index: 0, kind: input, shape index: {}]   ;;  %s21835_s1 = inlined_call_operand.vmem [shape: f32[20,32], index: 1, kind: input, shape index: {}]   ;;  %s21836_s2 = inlined_call_operand.vmem [shape: f32[20,32,16], index: 2, kind: input, shape index: {}]   ;;  %s21837_s3 = inlined_call_operand.vmem [shape: f32[20,16,16], index: 3, kind: input, shape index: {}]   ;;  %s21838_s4 = inlined_call_operand.vmem [shape: f32[20,16,16], index: 4, kind: input, shape index: {}]   ;;  %s21839_s5 = inlined_call_operand.vmem [shape: f32[20,16], index: 5, kind: input, shape index: {}]   ;;  %s21840_s6 = inlined_call_operand.vmem [shape: f32[4,20], index: 6, kind: input, shape index: {}]   ;;  %s21841_s7 = inlined_call_operand.vmem [shape: f32[20,20], index: 7, kind: input, shape index: {}]   ;;  %s21842_s8 = inlined_call_operand.vmem [shape: f32[20,20,16], index: 8, kind: input, shape index: {}]   ;;  %s21843_s9 = inlined_call_operand.vmem [shape: f32[20,16,16], index: 9, kind: input, shape index: {}]   ;;  %s21844_s10 = inlined_call_operand.vmem [shape: f32[20,16,16], index: 10, kind: input, shape index: {}]   ;;  %s21845_s11 = inlined_call_operand.vmem [shape: f32[20,16], index: 11, kind: input, shape index: {}]   ;;  %s21846_s12 = inlined_call_operand.vmem [shape: f32[4,20], index: 12, kind: input, shape index: {}]   ;;  %s21847_s13 = inlined_call_operand.vmem [shape: f32[20,20], index: 13, kind: input, shape index: {}]   ;;  %s21848_s14 = inlined_call_operand.vmem [shape: f32[20,20,16], index: 14, kind: input, shape index: {}]   ;;  %s21849_s15 = inlined_call_operand.vmem [shape: f32[20,16,16], index: 15, kind: input, shape index: {}]   ;;  %s21850_s16 = inlined_call_operand.vmem [shape: f32[20,16,16], index: 16, kind: input, shape index: {}]   ;;  %s21851_s17 = inlined_call_operand.vmem [shape: f32[20,16], index: 17, kind: input, shape index: {}]   ;;  %s21852_s18 = inlined_call_operand.vmem [shape: f32[4,20], index: 18, kind: input, shape index: {}]   ;;  %s21853_s19 = inlined_call_operand.hbm [shape: f32[4,20], index: 19, kind: output, shape index: {}]  }
   0x1   :  { %21857 = sst [smem:[#allocation5_spill]] %s21834_s0 }
   0x2   :  { %21858 = sst [smem:[#allocation6_spill]] %s21835_s1 }
   0x3   :  { %21859 = sst [smem:[#allocation7_spill]] %s21836_s2 }
   0x4   :  { %21860 = sst [smem:[#allocation8_spill]] %s21837_s3 }
   0x5   :  { %s21861_s20 = sld [smem:[#allocation7_spill]]  ;;  %v74_v3 = vlaneseq  ;;  %v19048_v4 = vmov 0.0|0.0   ;;  %vm19049_vm0 = vmmov 0   ;;  %v19050_v12 = vmov 0.0   ;;  %s21862_s22 = sld [smem:[#allocation6_spill]] }
   0x6   :  { %18394 = vmatprep.subr.bf16.mxu0 %v19048_v4  ;;  %18400 = vmatprep.subr.bf16.mxu1 %v19048_v4  ;;  %v19051_v13 = vmov 1966171168   ;;  %s21863_s27 = sld [smem:[#allocation5_spill]]  ;;  %vm392_vm1 = vcmask 261120  }
   0x7   :  { %16982 = vmatprep.mubr.msk.f32.mxu0 %vm19049_vm0, %v19050_v12  ;;  %v72_v14 = vunpack.c.l.s4 %v19051_v13  ;;  %v19183_v15 = vshrl.u32 %v74_v3, 7  ;;  %16993 = vmatprep.mubr.msk.f32.mxu1 %vm19049_vm0, %v19050_v12 }
   0x9   :  { %v73_v18 = vunpack.c.0.s8 %v72_v14  ;;  %v19198_v22 = vsub.s32 0, %v19183_v15 }
   0xb   :  { %v312_v0 = vld [vmem:[%s21861_s20] sm:$0xff]  ;;  %v313_v1 = vld [vmem:[%s21861_s20 + $0x8] sm:$0xff]  ;;  %v314_v7 = vld [vmem:[%s21861_s20 + $0x10] sm:$0xff]  ;;  %v19193_v20 = vsub.s32 %v73_v18, %v19183_v15 }
   0xc   :  { %v316_v2 = vld [vmem:[%s21861_s20 + $0x20] sm:$0xff]  ;;  %v18395_v5 = vpack.c.bf16 %v313_v1, %v312_v0  ;;  %v317_v6 = vld [vmem:[%s21861_s20 + $0x28] sm:$0xff]  ;;  %v315_v8 = vld [vmem:[%s21861_s20 + $0x18] sm:$0xff] }
   0xd   :  { %v18401_v9 = vpack.c.bf16 %v317_v6, %v316_v2  ;;  %v318_v10 = vld [vmem:[%s21861_s20 + $0x30] sm:$0xff]  ;;  %v319_v11 = vld [vmem:[%s21861_s20 + $0x38] sm:$0xff]  ;;  %v18398_v16 = vpack.c.bf16 %v315_v8, %v314_v7  ;;  %v64_v19 = vld [vmem:[%s21862_s22] sm:$0xff] }
   0xe   :  { %18396 = vmatpush3.bf16.msra.mxu0 %v18395_v5  ;;  %v18404_v17 = vpack.c.bf16 %v319_v11, %v318_v10  ;;  %v77_v21 = vrot.slane %v64_v19, %v19193_v20  ;;  %v70_v23 = vcombine.high %v64_v19, %v64_v19  ;;  %v320_v25 = vld [vmem:[%s21861_s20 + $0x40] sm:$0xff]  ;;  %v321_v26 = vld [vmem:[%s21861_s20 + $0x48] sm:$0xff]  ;;  %v322_v39 = vld [vmem:[%s21861_s20 + $0x50] sm:$0xff] }
   0xf   :  { %18402 = vmatpush3.bf16.msra.mxu1 %v18401_v9  ;;  %18397 = vmatprep.subr.bf16.mxu0 %v19048_v4  ;;  %v19211_v28 = vld [vmem:[%s21863_s27] sm:$0xf]  ;;  %v325_v33 = vld [vmem:[%s21861_s20 + $0x68] sm:$0xff]  ;;  %v18407_v34 = vpack.c.bf16 %v321_v26, %v320_v25  ;;  %v323_v40 = vld [vmem:[%s21861_s20 + $0x58] sm:$0xff] }
  0x10   :  { %18403 = vmatprep.subr.bf16.mxu1 %v19048_v4  ;;  %v93_v24 = vrot.slane %v77_v21, %v19193_v20  ;;  %v85_v27 = vcombine.high %v77_v21, %v77_v21  ;;  %v324_v32 = vld [vmem:[%s21861_s20 + $0x60] sm:$0xff]  ;;  %v84_v35 = vrot.slane %v70_v23, %v19193_v20  ;;  %v326_v43 = vld [vmem:[%s21861_s20 + $0x70] sm:$0xff]  ;;  %v327_v44 = vld [vmem:[%s21861_s20 + $0x78] sm:$0xff]  ;;  %v18410_v46 = vpack.c.bf16 %v323_v40, %v322_v39 }
  0x11   :  { %v18413_v41 = vpack.c.bf16 %v325_v33, %v324_v32  ;;  %v328_v47 = vld [vmem:[%s21861_s20 + $0x80] sm:$0xff]  ;;  %v329_v48 = vld [vmem:[%s21861_s20 + $0x88] sm:$0xff]  ;;  %v18416_v51 = vpack.c.bf16 %v327_v44, %v326_v43  ;;  %v330_v58 = vld [vmem:[%s21861_s20 + $0x90] sm:$0xff] }
  0x12   :  { %18399 = vmatpush3.bf16.msra.mxu0 %v18398_v16  ;;  %v115_v29 = vcombine.high %v93_v24, %v93_v24  ;;  %v195_v30 = vrot.slane %v93_v24, %v19198_v22  ;;  %v107_v31 = vrot.slane %v85_v27, %v19193_v20  ;;  %v86_v50 = vcombine.high %v84_v35, %v84_v35  ;;  %v332_v53 = vld [vmem:[%s21861_s20 + $0xa0] sm:$0xff]  ;;  %v333_v54 = vld [vmem:[%s21861_s20 + $0xa8] sm:$0xff]  ;;  %v331_v59 = vld [vmem:[%s21861_s20 + $0x98] sm:$0xff] }
  0x13   :  { %18405 = vmatpush3.bf16.msra.mxu1 %v18404_v17  ;;  %18406 = vmatprep.subr.bf16.mxu0 %v19048_v4  ;;  %v100_v55 = vrot.slane %v84_v35, %v19193_v20  ;;  %v18419_v56 = vpack.c.bf16 %v329_v48, %v328_v47  ;;  %v18425_v61 = vpack.c.bf16 %v333_v54, %v332_v53  ;;  %v334_v62 = vld [vmem:[%s21861_s20 + $0xb0] sm:$0xff]  ;;  %v335_v63 = vld [vmem:[%s21861_s20 + $0xb8] sm:$0xff]  ;;  %v336_v2 = vld [vmem:[%s21861_s20 + $0xc0] sm:$0xff] }
  0x14   :  { %18412 = vmatprep.subr.bf16.mxu1 %v19048_v4  ;;  %v292_v36 = vmul.f32 %v195_v30, %v19211_v28  ;;  %v117_v37 = vcombine.high %v107_v31, %v107_v31  ;;  %v199_v38 = vrot.slane %v107_v31, %v19198_v22  ;;  %v203_v45 = vrot.slane %v115_v29, %v19198_v22  ;;  %v337_v5 = vld [vmem:[%s21861_s20 + $0xc8] sm:$0xff]  ;;  %v340_v10 = vld [vmem:[%s21861_s20 + $0xe0] sm:$0xff] }
  0x15   :  { %v114_v60 = vrot.slane %v86_v50, %v19193_v20  ;;  %v211_v0 = vrot.slane %v100_v55, %v19198_v22  ;;  %v18422_v1 = vpack.c.bf16 %v331_v59, %v330_v58  ;;  %v18428_v7 = vpack.c.bf16 %v335_v63, %v334_v62  ;;  %v19295_v8 = vld [vmem:[%s21862_s22 + $0x8] sm:$0xff] }
  0x16   :  { %16983 = vmatmul.mubr.msk.f32.vlgmr.msra.gmra.mrb[0].mxu0 %vm392_vm1, %v292_v36  ;;  %v293_v42 = vmul.f32 %v199_v38, %v19211_v28  ;;  %v207_v49 = vrot.slane %v117_v37, %v19198_v22  ;;  %v294_v52 = vmul.f32 %v203_v45, %v19211_v28  ;;  %v341_v11 = vld [vmem:[%s21861_s20 + $0xe8] sm:$0xff]  ;;  %v116_v13 = vcombine.high %v100_v55, %v100_v55 }
  0x17   :  { %18408 = vmatpush3.bf16.msra.mxu0 %v18407_v34  ;;  %17004 = vmatprep.mubr.msk.f32.mxu0 %vm19049_vm0, %v19050_v12  ;;  %v215_v6 = vrot.slane %v114_v60, %v19198_v22  ;;  %v296_v9 = vmul.f32 %v211_v0, %v19211_v28 }
  0x18   :  { %16994 = vmatmul.mubr.msk.f32.vlgmr.msra.gmra.mrb[0].mxu1 %vm392_vm1, %v293_v42  ;;  %18409 = vmatprep.subr.bf16.mxu0 %v19048_v4  ;;  %v295_v57 = vmul.f32 %v207_v49, %v19211_v28 }
  0x19   :  { %18414 = vmatpush3.bf16.msra.mxu1 %v18413_v41  ;;  %17015 = vmatprep.mubr.msk.f32.mxu1 %vm19049_vm0, %v19050_v12 }
  0x1a   :  { %18415 = vmatprep.subr.bf16.mxu1 %v19048_v4 }
  0x1b   :  { %18411 = vmatpush3.bf16.msra.mxu0 %v18410_v46 }
  0x1c   :  { %18418 = vmatprep.subr.bf16.mxu0 %v19048_v4 }
  0x1d   :  { %18417 = vmatpush3.bf16.msra.mxu1 %v18416_v51 }
  0x1e   :  { %17005 = vmatmul.mubr.msk.f32.vlgmr.msra.gmra.mrb[2].mxu0 %vm392_vm1, %v294_v52  ;;  %18424 = vmatprep.subr.bf16.mxu1 %v19048_v4 }
  0x1f   :  { %18420 = vmatpush3.bf16.msra.mxu0 %v18419_v56  ;;  %17026 = vmatprep.mubr.msk.f32.mxu0 %vm19049_vm0, %v19050_v12 }
  0x20   :  { %17016 = vmatmul.mubr.msk.f32.vlgmr.msra.gmra.mrb[2].mxu1 %vm392_vm1, %v295_v57  ;;  %18421 = vmatprep.subr.bf16.mxu0 %v19048_v4 }
  0x21   :  { %18426 = vmatpush3.bf16.msra.mxu1 %v18425_v61  ;;  %17037 = vmatprep.mubr.msk.f32.mxu1 %vm19049_vm0, %v19050_v12 }
  0x22   :  { %18427 = vmatprep.subr.bf16.mxu1 %v19048_v4 }
  0x23   :  { %24 = vsyncpa [#allocation3], 0  ;;  %18423 = vmatpush3.bf16.msra.mxu0 %v18422_v1  ;;  %v18431_v14 = vpack.c.bf16 %v337_v5, %v336_v2  ;;  %v297_v16 = vmul.f32 %v215_v6, %v19211_v28  ;;  %v338_v17 = vld [vmem:[%s21861_s20 + $0xd0] sm:$0xff]  ;;  %v339_v18 = vld [vmem:[%s21861_s20 + $0xd8] sm:$0xff]  ;;  %v118_v19 = vcombine.high %v114_v60, %v114_v60  ;;  %v126_v21 = vrot.slane %v19295_v8, %v19193_v20  ;;  %s21864_s27 = sld [smem:[#allocation8_spill]]  ;;  %s19053_s25 = smov [#allocation2]  }
  0x24   :  { %18430 = vmatprep.subr.bf16.mxu0 %v19048_v4  ;;  %v18437_v23 = vpack.c.bf16 %v341_v11, %v340_v10  ;;  %v342_v24 = vld [vmem:[%s21861_s20 + $0xf0] sm:$0xff]  ;;  %v343_v25 = vld [vmem:[%s21861_s20 + $0xf8] sm:$0xff]  ;;  %v219_v26 = vrot.slane %v116_v13, %v19198_v22  ;;  %v18434_v27 = vpack.c.bf16 %v339_v18, %v338_v17  ;;  %v344_v29 = vld [vmem:[%s21861_s20 + $0x100] sm:$0xff]  ;;  %v119_v51 = vcombine.high %v19295_v8, %v19295_v8  ;;  %s16117_s3 = sshll.u32 %s19053_s25, 4  ;;  %s16118_s3 = int_to_ptr.vmem [resolvable:$true] %s16117_s3 }
  0x25   :  { %18429 = vmatpush3.bf16.msra.mxu1 %v18428_v7  ;;  %v345_v30 = vld [vmem:[%s21861_s20 + $0x108] sm:$0xff]  ;;  %v223_v31 = vrot.slane %v118_v19, %v19198_v22  ;;  %v134_v32 = vcombine.high %v126_v21, %v126_v21  ;;  %v18440_v33 = vpack.c.bf16 %v343_v25, %v342_v24  ;;  %v348_v35 = vld [vmem:[%s21861_s20 + $0x120] sm:$0xff]  ;;  %v142_v37 = vrot.slane %v126_v21, %v19193_v20  ;;  %v346_v40 = vld [vmem:[%s21861_s20 + $0x110] sm:$0xff]  ;;  %p19029_p1 = scmp.lt.s32.totalorder %s16118_s3, %s16118_s3 }
  0x26   :  { %17027 = vmatmul.mubr.msk.f32.vlgmr.msra.gmra.mrb[4].mxu0 %vm392_vm1, %v296_v9  ;;  %18436 = vmatprep.subr.bf16.mxu1 %v19048_v4  ;;  %v298_v34 = vmul.f32 %v219_v26, %v19211_v28  ;;  %v349_v36 = vld [vmem:[%s21861_s20 + $0x128] sm:$0xff]  ;;  %v18443_v38 = vpack.c.bf16 %v345_v30, %v344_v29  ;;  %v347_v41 = vld [vmem:[%s21861_s20 + $0x118] sm:$0xff]  ;;  %v350_v44 = vld [vmem:[%s21861_s20 + $0x130] sm:$0xff]  ;;  %v133_v62 = vrot.slane %v119_v51, %v19193_v20  ;;  %vm1913_vm2 = vcmask 130048  }
  0x27   :  { %18432 = vmatpush3.bf16.msra.mxu0 %v18431_v14  ;;  %17048 = vmatprep.mubr.msk.f32.mxu0 %vm19049_vm0, %v19050_v12  ;;  %v299_v39 = vmul.f32 %v223_v31, %v19211_v28  ;;  %v156_v42 = vrot.slane %v134_v32, %v19193_v20  ;;  %v18449_v43 = vpack.c.bf16 %v349_v36, %v348_v35  ;;  %v351_v45 = vld [vmem:[%s21861_s20 + $0x138] sm:$0xff]  ;;  %v352_v48 = vld [vmem:[%s21861_s20 + $0x140] sm:$0xff]  ;;  %v353_v49 = vld [vmem:[%s21861_s20 + $0x148] sm:$0xff]  ;;  %vm5162_vm3 = vcmask 125952  }
  0x28   :  { %17038 = vmatmul.mubr.msk.f32.vlgmr.msra.gmra.mrb[4].mxu1 %vm392_vm1, %v297_v16  ;;  %18433 = vmatprep.subr.bf16.mxu0 %v19048_v4  ;;  %v227_v46 = vrot.slane %v142_v37, %v19198_v22  ;;  %v18446_v47 = vpack.c.bf16 %v347_v41, %v346_v40  ;;  %v18452_v52 = vpack.c.bf16 %v351_v45, %v350_v44  ;;  %v356_v54 = vld [vmem:[%s21861_s20 + $0x160] sm:$0xff]  ;;  %v357_v55 = vld [vmem:[%s21861_s20 + $0x168] sm:$0xff]  ;;  %v354_v59 = vld [vmem:[%s21861_s20 + $0x150] sm:$0xff]  ;;  %vm5325_vm4 = vcmask 1041409  }
  0x29   :  { %18438 = vmatpush3.bf16.msra.mxu1 %v18437_v23  ;;  %17059 = vmatprep.mubr.msk.f32.mxu1 %vm19049_vm0, %v19050_v12  ;;  %v231_v50 = vrot.slane %v156_v42, %v19198_v22  ;;  %v164_v56 = vcombine.high %v142_v37, %v142_v37  ;;  %v18455_v57 = vpack.c.bf16 %v353_v49, %v352_v48  ;;  %v355_v60 = vld [vmem:[%s21861_s20 + $0x158] sm:$0xff]  ;;  %v358_v0 = vld [vmem:[%s21861_s20 + $0x170] sm:$0xff]  ;;  %v360_v6 = vld [vmem:[%s21861_s20 + $0x180] sm:$0xff]  ;;  %vm5327_vm5 = vcmask 1042434  }
  0x2a   :  { %18439 = vmatprep.subr.bf16.mxu1 %v19048_v4  ;;  %v300_v53 = vmul.f32 %v227_v46, %v19211_v28  ;;  %v166_v61 = vcombine.high %v156_v42, %v156_v42  ;;  %v18461_v63 = vpack.c.bf16 %v357_v55, %v356_v54  ;;  %v359_v1 = vld [vmem:[%s21861_s20 + $0x178] sm:$0xff]  ;;  %v18458_v5 = vpack.c.bf16 %v355_v60, %v354_v59  ;;  %v361_v7 = vld [vmem:[%s21861_s20 + $0x188] sm:$0xff]  ;;  %v364_v13 = vld [vmem:[%s21861_s20 + $0x1a0] sm:$0xff] }
  0x2b   :  { %18435 = vmatpush3.bf16.msra.mxu0 %v18434_v27  ;;  %v301_v58 = vmul.f32 %v231_v50, %v19211_v28  ;;  %v235_v2 = vrot.slane %v164_v56, %v19198_v22  ;;  %v135_v9 = vcombine.high %v133_v62, %v133_v62  ;;  %v18464_v10 = vpack.c.bf16 %v359_v1, %v358_v0  ;;  %v365_v14 = vld [vmem:[%s21861_s20 + $0x1a8] sm:$0xff]  ;;  %v362_v19 = vld [vmem:[%s21861_s20 + $0x190] sm:$0xff]  ;;  %v363_v21 = vld [vmem:[%s21861_s20 + $0x198] sm:$0xff] }
  0x2c   :  { %18442 = vmatprep.subr.bf16.mxu0 %v19048_v4  ;;  %v239_v8 = vrot.slane %v166_v61, %v19198_v22  ;;  %v149_v16 = vrot.slane %v133_v62, %v19193_v20  ;;  %v18467_v17 = vpack.c.bf16 %v361_v7, %v360_v6  ;;  %v18473_v24 = vpack.c.bf16 %v365_v14, %v364_v13  ;;  %v366_v25 = vld [vmem:[%s21861_s20 + $0x1b0] sm:$0xff]  ;;  %v367_v26 = vld [vmem:[%s21861_s20 + $0x1b8] sm:$0xff]  ;;  %v368_v30 = vld [vmem:[%s21861_s20 + $0x1c0] sm:$0xff] }
  0x2d   :  { %18441 = vmatpush3.bf16.msra.mxu1 %v18440_v33  ;;  %v302_v11 = vmul.f32 %v235_v2, %v19211_v28  ;;  %v163_v23 = vrot.slane %v135_v9, %v19193_v20  ;;  %v18470_v29 = vpack.c.bf16 %v363_v21, %v362_v19  ;;  %v369_v31 = vld [vmem:[%s21861_s20 + $0x1c8] sm:$0xff]  ;;  %v18476_v33 = vpack.c.bf16 %v367_v26, %v366_v25  ;;  %v372_v35 = vld [vmem:[%s21861_s20 + $0x1e0] sm:$0xff]  ;;  %v370_v40 = vld [vmem:[%s21861_s20 + $0x1d0] sm:$0xff] }
  0x2e   :  { %17049 = vmatmul.mubr.msk.f32.vlgmr.msra.gmra.mrb[6].mxu0 %vm392_vm1, %v298_v34  ;;  %18448 = vmatprep.subr.bf16.mxu1 %v19048_v4  ;;  %v303_v18 = vmul.f32 %v239_v8, %v19211_v28  ;;  %v243_v27 = vrot.slane %v149_v16, %v19198_v22  ;;  %v373_v36 = vld [vmem:[%s21861_s20 + $0x1e8] sm:$0xff]  ;;  %v165_v37 = vcombine.high %v149_v16, %v149_v16  ;;  %v371_v41 = vld [vmem:[%s21861_s20 + $0x1d8] sm:$0xff]  ;;  %v16125_v44 = vld.sshfl [vmem:[%s21862_s22 + $0x10] sm:$0x33 pattern:$0x75316420] }
  0x2f   :  { %18444 = vmatpush3.bf16.msra.mxu0 %v18443_v38  ;;  %17070 = vmatprep.mubr.msk.f32.mxu0 %vm19049_vm0, %v19050_v12  ;;  %v247_v32 = vrot.slane %v163_v23, %v19198_v22  ;;  %v18479_v38 = vpack.c.bf16 %v369_v31, %v368_v30  ;;  %v167_v42 = vcombine.high %v163_v23, %v163_v23  ;;  %v374_v45 = vld [vmem:[%s21861_s20 + $0x1f0] sm:$0xff]  ;;  %v375_v46 = vld [vmem:[%s21861_s20 + $0x1f8] sm:$0xff]  ;;  %v376_v49 = vld [vmem:[%s21861_s20 + $0x200] sm:$0xff]  ;;  %vm5329_vm6 = vcmask 1043459  }
  0x30   :  { %17060 = vmatmul.mubr.msk.f32.vlgmr.msra.gmra.mrb[6].mxu1 %vm392_vm1, %v299_v39  ;;  %18445 = vmatprep.subr.bf16.mxu0 %v19048_v4  ;;  %v304_v34 = vmul.f32 %v243_v27, %v19211_v28  ;;  %v18482_v48 = vpack.c.bf16 %v371_v41, %v370_v40  ;;  %v377_v50 = vld [vmem:[%s21861_s20 + $0x208] sm:$0xff]  ;;  %v380_v55 = vld [vmem:[%s21861_s20 + $0x220] sm:$0xff]  ;;  %v378_v60 = vld [vmem:[%s21861_s20 + $0x210] sm:$0xff]  ;;  %vm5331_vm7 = vcmask 1044484   ;;  %vm5333_vm8 = vcmask 1045509  }
  0x31   :  { %18450 = vmatpush3.bf16.msra.mxu1 %v18449_v43  ;;  %17081 = vmatprep.mubr.msk.f32.mxu1 %vm19049_vm0, %v19050_v12  ;;  %v305_v39 = vmul.f32 %v247_v32, %v19211_v28  ;;  %v18485_v43 = vpack.c.bf16 %v373_v36, %v372_v35  ;;  %v255_v51 = vrot.slane %v167_v42, %v19198_v22  ;;  %v381_v56 = vld [vmem:[%s21861_s20 + $0x228] sm:$0xff]  ;;  %v379_v61 = vld [vmem:[%s21861_s20 + $0x218] sm:$0xff]  ;;  %v382_v0 = vld [vmem:[%s21861_s20 + $0x230] sm:$0xff]  ;;  %vm5335_vm9 = vcmask 1046534  }
  0x32   :  { %18451 = vmatprep.subr.bf16.mxu1 %v19048_v4  ;;  %v383_v1 = vld [vmem:[%s21861_s20 + $0x238] sm:$0xff]  ;;  %v384_v6 = vld [vmem:[%s21861_s20 + $0x240] sm:$0xff]  ;;  %v385_v7 = vld [vmem:[%s21861_s20 + $0x248] sm:$0xff]  ;;  %vm5337_vm10 = vcmask 1047559   ;;  %vm5705_vm11 = vcmask 1043456   ;;  %vm5701_vm13 = vcmask 162816  }
  0x33   :  { %18447 = vmatpush3.bf16.msra.mxu0 %v18446_v47  ;;  %v251_v47 = vrot.slane %v165_v37, %v19198_v22  ;;  %v307_v59 = vmul.f32 %v255_v51, %v19211_v28  ;;  %v18500_v9 = vpack.c.bf16 %v383_v1, %v382_v0  ;;  %v389_v13 = vld [vmem:[%s21861_s20 + $0x268] sm:$0xff]  ;;  %v18503_v16 = vpack.c.bf16 %v385_v7, %v384_v6  ;;  %v387_v19 = vld [vmem:[%s21861_s20 + $0x258] sm:$0xff]  ;;  %v1875_v35 = vld [vmem:[%s21864_s27 + $0x10] sm:$0xff] }
  0x34   :  { %18454 = vmatprep.subr.bf16.mxu0 %v19048_v4  ;;  %v391_v25 = vld [vmem:[%s21861_s20 + $0x278] sm:$0xff]  ;;  %v1879_v40 = vld [vmem:[%s21864_s27 + $0x30] sm:$0xff]  ;;  %v1882_v51 = vld [vmem:[%s21864_s27 + $0x48] sm:$0xff]  ;;  %vm16109_vm15 = vcmask 158720  }
  0x35   :  { %18453 = vmatpush3.bf16.msra.mxu1 %v18452_v52  ;;  %v175_v52 = vcombine.high %v16125_v44, %v16125_v44  ;;  %v306_v54 = vmul.f32 %v251_v47, %v19211_v28  ;;  %v1876_v36 = vld [vmem:[%s21864_s27 + $0x18] sm:$0xff]  ;;  %v1887_v0 = vld [vmem:[%s21864_s27 + $0x70] sm:$0xff] }
  0x36   :  { %17071 = vmatmul.mubr.msk.f32.vlgmr.msra.gmra.mrb[8].mxu0 %vm392_vm1, %v300_v53  ;;  %18460 = vmatprep.subr.bf16.mxu1 %v19048_v4  ;;  %v18488_v53 = vpack.c.bf16 %v375_v46, %v374_v45  ;;  %v18518_v37 = vpack.c.bf16 %v1876_v36, %v1875_v35  ;;  %v1880_v41 = vld [vmem:[%s21864_s27 + $0x38] sm:$0xff] }
  0x37   :  { %18456 = vmatpush3.bf16.msra.mxu0 %v18455_v57  ;;  %17092 = vmatprep.mubr.msk.f32.mxu0 %vm19049_vm0, %v19050_v12  ;;  %v182_v57 = vrot.slane %v16125_v44, %v19193_v20  ;;  %v189_v62 = vrot.slane %v175_v52, %v19193_v20  ;;  %v18524_v47 = vpack.c.bf16 %v1880_v41, %v1879_v40  ;;  %v1883_v52 = vld [vmem:[%s21864_s27 + $0x50] sm:$0xff]  ;;  %v1888_v1 = vld [vmem:[%s21864_s27 + $0x78] sm:$0xff]  ;;  %v1897_v40 = vld [vmem:[%s21864_s27 + $0xc0] sm:$0xff] }
  0x38   :  { %17082 = vmatmul.mubr.msk.f32.vlgmr.msra.gmra.mrb[8].mxu1 %vm392_vm1, %v301_v58  ;;  %18457 = vmatprep.subr.bf16.mxu0 %v19048_v4  ;;  %v18491_v58 = vpack.c.bf16 %v377_v50, %v376_v49  ;;  %v1881_v50 = vld [vmem:[%s21864_s27 + $0x40] sm:$0xff]  ;;  %v1898_v41 = vld [vmem:[%s21864_s27 + $0xc8] sm:$0xff] }
  0x39   :  { %18462 = vmatpush3.bf16.msra.mxu1 %v18461_v63  ;;  %17103 = vmatprep.mubr.msk.f32.mxu1 %vm19049_vm0, %v19050_v12  ;;  %v18497_v63 = vpack.c.bf16 %v381_v56, %v380_v55  ;;  %v259_v2 = vrot.slane %v182_v57, %v19198_v22  ;;  %v263_v8 = vrot.slane %v189_v62, %v19198_v22 }
  0x3a   :  { %18463 = vmatprep.subr.bf16.mxu1 %v19048_v4  ;;  %v190_v14 = vcombine.high %v182_v57, %v182_v57  ;;  %v191_v21 = vcombine.high %v189_v62, %v189_v62  ;;  %v18527_v55 = vpack.c.bf16 %v1882_v51, %v1881_v50  ;;  %v1885_v62 = vld [vmem:[%s21864_s27 + $0x60] sm:$0xff] }
  0x3b   :  { %18459 = vmatpush3.bf16.msra.mxu0 %v18458_v5  ;;  %v18494_v5 = vpack.c.bf16 %v379_v61, %v378_v60 }
  0x3c   :  { %18466 = vmatprep.subr.bf16.mxu0 %v19048_v4  ;;  %v267_v26 = vrot.slane %v190_v14, %v19198_v22  ;;  %v1890_v14 = vld [vmem:[%s21864_s27 + $0x88] sm:$0xff] }
  0x3d   :  { %18465 = vmatpush3.bf16.msra.mxu1 %v18464_v10  ;;  %v308_v10 = vmul.f32 %v259_v2, %v19211_v28 }
  0x3e   :  { %17093 = vmatmul.mubr.msk.f32.vlgmr.msra.gmra.mrb[10].mxu0 %vm392_vm1, %v302_v11  ;;  %18472 = vmatprep.subr.bf16.mxu1 %v19048_v4  ;;  %v388_v11 = vld [vmem:[%s21861_s20 + $0x260] sm:$0xff]  ;;  %v310_v31 = vmul.f32 %v267_v26, %v19211_v28 }
  0x3f   :  { %18468 = vmatpush3.bf16.msra.mxu0 %v18467_v17  ;;  %17114 = vmatprep.mubr.msk.f32.mxu0 %vm19049_vm0, %v19050_v12  ;;  %v309_v17 = vmul.f32 %v263_v8, %v19211_v28  ;;  %v18509_v23 = vpack.c.bf16 %v389_v13, %v388_v11  ;;  %v1889_v13 = vld [vmem:[%s21864_s27 + $0x80] sm:$0xff] }
  0x40   :  { %17104 = vmatmul.mubr.msk.f32.vlgmr.msra.gmra.mrb[10].mxu1 %vm392_vm1, %v303_v18  ;;  %18469 = vmatprep.subr.bf16.mxu0 %v19048_v4  ;;  %v386_v18 = vld [vmem:[%s21861_s20 + $0x250] sm:$0xff] }
  0x41   :  { %18474 = vmatpush3.bf16.msra.mxu1 %v18473_v24  ;;  %17125 = vmatprep.mubr.msk.f32.mxu1 %vm19049_vm0, %v19050_v12  ;;  %v390_v24 = vld [vmem:[%s21861_s20 + $0x270] sm:$0xff]  ;;  %v18506_v27 = vpack.c.bf16 %v387_v19, %v386_v18  ;;  %v18539_v19 = vpack.c.bf16 %v1890_v14, %v1889_v13 }
  0x42   :  { %18475 = vmatprep.subr.bf16.mxu1 %v19048_v4  ;;  %v18512_v30 = vpack.c.bf16 %v391_v25, %v390_v24 }
  0x43   :  { %18471 = vmatpush3.bf16.msra.mxu0 %v18470_v29  ;;  %v271_v29 = vrot.slane %v191_v21, %v19198_v22 }
  0x44   :  { %18478 = vmatprep.subr.bf16.mxu0 %v19048_v4 }
  0x45   :  { %18477 = vmatpush3.bf16.msra.mxu1 %v18476_v33  ;;  %v311_v32 = vmul.f32 %v271_v29, %v19211_v28  ;;  %v1873_v33 = vld [vmem:[%s21864_s27] sm:$0xff]  ;;  %v1874_v28 = vld [vmem:[%s21864_s27 + $0x8] sm:$0xff] }
  0x46   :  { %17115 = vmatmul.mubr.msk.f32.vlgmr.msra.gmra.mrb[12].mxu0 %vm392_vm1, %v304_v34  ;;  %18484 = vmatprep.subr.bf16.mxu1 %v19048_v4  ;;  %v18515_v34 = vpack.c.bf16 %v1874_v28, %v1873_v33  ;;  %v1893_v29 = vld [vmem:[%s21864_s27 + $0xa0] sm:$0xff] }
  0x47   :  { %18480 = vmatpush3.bf16.msra.mxu0 %v18479_v38  ;;  %17136 = vmatprep.mubr.msk.f32.mxu0 %vm19049_vm0, %v19050_v12  ;;  %v1877_v38 = vld [vmem:[%s21864_s27 + $0x20] sm:$0xff] }
  0x48   :  { %17126 = vmatmul.mubr.msk.f32.vlgmr.msra.gmra.mrb[12].mxu1 %vm392_vm1, %v305_v39  ;;  %18481 = vmatprep.subr.bf16.mxu0 %v19048_v4  ;;  %v1878_v39 = vld [vmem:[%s21864_s27 + $0x28] sm:$0xff] }
  0x49   :  { %18486 = vmatpush3.bf16.msra.mxu1 %v18485_v43  ;;  %17147 = vmatprep.mubr.msk.f32.mxu1 %vm19049_vm0, %v19050_v12  ;;  %v18521_v43 = vpack.c.bf16 %v1878_v39, %v1877_v38 }
  0x4a   :  { %18487 = vmatprep.subr.bf16.mxu1 %v19048_v4 }
  0x4b   :  { %18483 = vmatpush3.bf16.msra.mxu0 %v18482_v48 }
  0x4c   :  { %18490 = vmatprep.subr.bf16.mxu0 %v19048_v4 }
  0x4d   :  { %18489 = vmatpush3.bf16.msra.mxu1 %v18488_v53  ;;  %v1884_v53 = vld [vmem:[%s21864_s27 + $0x58] sm:$0xff] }
  0x4e   :  { %17137 = vmatmul.mubr.msk.f32.vlgmr.msra.gmra.mrb[14].mxu0 %vm392_vm1, %v306_v54  ;;  %18496 = vmatprep.subr.bf16.mxu1 %v19048_v4 }
  0x4f   :  { %18492 = vmatpush3.bf16.msra.mxu0 %v18491_v58  ;;  %17158 = vmatprep.mubr.msk.f32.mxu0 %vm19049_vm0, %v19050_v12 }
  0x50   :  { %17148 = vmatmul.mubr.msk.f32.vlgmr.msra.gmra.mrb[14].mxu1 %vm392_vm1, %v307_v59  ;;  %18493 = vmatprep.subr.bf16.mxu0 %v19048_v4  ;;  %v18530_v59 = vpack.c.bf16 %v1884_v53, %v1883_v52  ;;  %v1901_v52 = vld [vmem:[%s21864_s27 + $0xe0] sm:$0xff]  ;;  %v1902_v53 = vld [vmem:[%s21864_s27 + $0xe8] sm:$0xff] }
  0x51   :  { %18498 = vmatpush3.bf16.msra.mxu1 %v18497_v63  ;;  %17169 = vmatprep.mubr.msk.f32.mxu1 %vm19049_vm0, %v19050_v12  ;;  %v1886_v63 = vld [vmem:[%s21864_s27 + $0x68] sm:$0xff] }
  0x52   :  { %18499 = vmatprep.subr.bf16.mxu1 %v19048_v4 }
  0x53   :  { %18495 = vmatpush3.bf16.msra.mxu0 %v18494_v5  ;;  %v18533_v5 = vpack.c.bf16 %v1886_v63, %v1885_v62 }
  0x54   :  { %18502 = vmatprep.subr.bf16.mxu0 %v19048_v4 }
  0x55   :  { %18501 = vmatpush3.bf16.msra.mxu1 %v18500_v9  ;;  %v18536_v9 = vpack.c.bf16 %v1888_v1, %v1887_v0  ;;  %v1905_v0 = vld [vmem:[%s21864_s27 + $0x100] sm:$0xff]  ;;  %v1906_v1 = vld [vmem:[%s21864_s27 + $0x108] sm:$0xff] }
  0x56   :  { %17159 = vmatmul.mubr.msk.f32.vlgmr.msra.gmra.mrb[16].mxu0 %vm392_vm1, %v308_v10  ;;  %18508 = vmatprep.subr.bf16.mxu1 %v19048_v4 }
  0x57   :  { %18504 = vmatpush3.bf16.msra.mxu0 %v18503_v16  ;;  %17180 = vmatprep.mubr.msk.f32.mxu0 %vm19049_vm0, %v19050_v12  ;;  %v1891_v16 = vld [vmem:[%s21864_s27 + $0x90] sm:$0xff] }
  0x58   :  { %17170 = vmatmul.mubr.msk.f32.vlgmr.msra.gmra.mrb[16].mxu1 %vm392_vm1, %v309_v17  ;;  %18505 = vmatprep.subr.bf16.mxu0 %v19048_v4  ;;  %v1892_v17 = vld [vmem:[%s21864_s27 + $0x98] sm:$0xff] }
  0x59   :  { %18510 = vmatpush3.bf16.msra.mxu1 %v18509_v23  ;;  %17191 = vmatprep.mubr.msk.f32.mxu1 %vm19049_vm0, %v19050_v12  ;;  %v18542_v25 = vpack.c.bf16 %v1892_v17, %v1891_v16  ;;  %v1909_v16 = vld [vmem:[%s21864_s27 + $0x120] sm:$0xff]  ;;  %v1910_v17 = vld [vmem:[%s21864_s27 + $0x128] sm:$0xff] }
  0x5a   :  { %18511 = vmatprep.subr.bf16.mxu1 %v19048_v4 }
  0x5b   :  { %18507 = vmatpush3.bf16.msra.mxu0 %v18506_v27 }
  0x5c   :  { %18514 = vmatprep.subr.bf16.mxu0 %v19048_v4 }
  0x5d   :  { %18513 = vmatpush3.bf16.msra.mxu1 %v18512_v30  ;;  %v1894_v30 = vld [vmem:[%s21864_s27 + $0xa8] sm:$0xff] }
  0x5e   :  { %17181 = vmatmul.mubr.msk.f32.vlgmr.msra.gmra.mrb[18].mxu0 %vm392_vm1, %v310_v31  ;;  %18517 = vmatprep.subr.bf16.mxu1 %v19048_v4  ;;  %v1895_v31 = vld [vmem:[%s21864_s27 + $0xb0] sm:$0xff]  ;;  %v18545_v28 = vpack.c.bf16 %v1894_v30, %v1893_v29 }
  0x5f   :  { %17198 = vmatprep.mubr.msk.f32.mxu0 %vm19049_vm0, %v19050_v12  ;;  %18516 = vmatpush3.bf16.msra.mxu0 %v18515_v34 }
  0x60   :  { %17192 = vmatmul.mubr.msk.f32.vlgmr.msra.gmra.mrb[18].mxu1 %vm392_vm1, %v311_v32  ;;  %18520 = vmatprep.subr.bf16.mxu0 %v19048_v4  ;;  %v1896_v32 = vld [vmem:[%s21864_s27 + $0xb8] sm:$0xff] }
  0x61   :  { %17205 = vmatprep.mubr.msk.f32.mxu1 %vm19049_vm0, %v19050_v12  ;;  %18519 = vmatpush3.bf16.msra.mxu1 %v18518_v37  ;;  %v18548_v37 = vpack.c.bf16 %v1896_v32, %v1895_v31 }
  0x62   :  { %18523 = vmatprep.subr.bf16.mxu1 %v19048_v4 }
  0xe9   :  { %v462_v42 = vpop.f32.mrb[0].mxu0 }
  0xea   :  { %v1853_v44 = vmax.f32 %v462_v42, 0.0  ;;  %v16984_v45 = vpop.f32.mrb[1].mxu0  ;;  %v1899_v42 = vld [vmem:[%s21864_s27 + $0xd0] sm:$0xff] }
  0xeb   :  { %v535_v46 = vpop.f32.mrb[0].mxu1  ;;  %v18551_v45 = vpack.c.bf16 %v1898_v41, %v1897_v40  ;;  %v3397_v40 = vld [vmem:[%s21838_s4 + $0x18] sm:$0xff] }
  0xec   :  { %v1854_v48 = vmax.f32 %v535_v46, 0.0  ;;  %v16995_v49 = vpop.f32.mrb[1].mxu1  ;;  %17199 = vmatmul.mubr.msk.f32.vlgmr.msra.gmra.mrb[20].mxu0 %vm1913_vm2, %v1853_v44 }
  0xed   :  { %18522 = vmatpush3.bf16.msra.mxu0 %v18521_v43  ;;  %17212 = vmatprep.mubr.msk.f32.mxu0 %vm19049_vm0, %v19050_v12  ;;  %v1900_v43 = vld [vmem:[%s21864_s27 + $0xd8] sm:$0xff] }
  0xee   :  { %17206 = vmatmul.mubr.msk.f32.vlgmr.msra.gmra.mrb[20].mxu1 %vm1913_vm2, %v1854_v48  ;;  %18526 = vmatprep.subr.bf16.mxu0 %v19048_v4  ;;  %v18554_v49 = vpack.c.bf16 %v1900_v43, %v1899_v42  ;;  %v3398_v42 = vld [vmem:[%s21838_s4 + $0x20] sm:$0xff]  ;;  %v3399_v43 = vld [vmem:[%s21838_s4 + $0x28] sm:$0xff] }
  0xef   :  { %18525 = vmatpush3.bf16.msra.mxu1 %v18524_v47  ;;  %17219 = vmatprep.mubr.msk.f32.mxu1 %vm19049_vm0, %v19050_v12 }
  0xf0   :  { %18529 = vmatprep.subr.bf16.mxu1 %v19048_v4 }
  0xf1   :  { %v608_v54 = vpop.f32.mrb[2].mxu0 }
  0xf2   :  { %v1855_v56 = vmax.f32 %v608_v54, 0.0  ;;  %v17006_v57 = vpop.f32.mrb[3].mxu0  ;;  %v1903_v54 = vld [vmem:[%s21864_s27 + $0xf0] sm:$0xff] }
  0xf3   :  { %v681_v58 = vpop.f32.mrb[2].mxu1  ;;  %v18557_v57 = vpack.c.bf16 %v1902_v53, %v1901_v52 }
  0xf4   :  { %v1856_v60 = vmax.f32 %v681_v58, 0.0  ;;  %v17017_v61 = vpop.f32.mrb[3].mxu1  ;;  %17213 = vmatmul.mubr.msk.f32.vlgmr.msra.gmra.mrb[22].mxu0 %vm1913_vm2, %v1855_v56 }
  0xf5   :  { %18528 = vmatpush3.bf16.msra.mxu0 %v18527_v55  ;;  %17226 = vmatprep.mubr.msk.f32.mxu0 %vm19049_vm0, %v19050_v12  ;;  %v1904_v55 = vld [vmem:[%s21864_s27 + $0xf8] sm:$0xff] }
  0xf6   :  { %17220 = vmatmul.mubr.msk.f32.vlgmr.msra.gmra.mrb[22].mxu1 %vm1913_vm2, %v1856_v60  ;;  %18532 = vmatprep.subr.bf16.mxu0 %v19048_v4  ;;  %v18560_v61 = vpack.c.bf16 %v1904_v55, %v1903_v54  ;;  %v3402_v54 = vld [vmem:[%s21838_s4 + $0x40] sm:$0xff]  ;;  %v3403_v55 = vld [vmem:[%s21838_s4 + $0x48] sm:$0xff] }
  0xf7   :  { %18531 = vmatpush3.bf16.msra.mxu1 %v18530_v59  ;;  %17233 = vmatprep.mubr.msk.f32.mxu1 %vm19049_vm0, %v19050_v12 }
  0xf8   :  { %18535 = vmatprep.subr.bf16.mxu1 %v19048_v4 }
  0xf9   :  { %v754_v2 = vpop.f32.mrb[4].mxu0 }
  0xfa   :  { %v1857_v6 = vmax.f32 %v754_v2, 0.0  ;;  %v17028_v7 = vpop.f32.mrb[5].mxu0  ;;  %v1907_v2 = vld [vmem:[%s21864_s27 + $0x110] sm:$0xff] }
  0xfb   :  { %v827_v8 = vpop.f32.mrb[4].mxu1  ;;  %v18563_v7 = vpack.c.bf16 %v1906_v1, %v1905_v0 }
  0xfc   :  { %v1858_v10 = vmax.f32 %v827_v8, 0.0  ;;  %v17039_v11 = vpop.f32.mrb[5].mxu1  ;;  %17227 = vmatmul.mubr.msk.f32.vlgmr.msra.gmra.mrb[24].mxu0 %vm1913_vm2, %v1857_v6 }
  0xfd   :  { %18534 = vmatpush3.bf16.msra.mxu0 %v18533_v5  ;;  %17240 = vmatprep.mubr.msk.f32.mxu0 %vm19049_vm0, %v19050_v12  ;;  %v1908_v5 = vld [vmem:[%s21864_s27 + $0x118] sm:$0xff] }
  0xfe   :  { %17234 = vmatmul.mubr.msk.f32.vlgmr.msra.gmra.mrb[24].mxu1 %vm1913_vm2, %v1858_v10  ;;  %18538 = vmatprep.subr.bf16.mxu0 %v19048_v4  ;;  %v18566_v11 = vpack.c.bf16 %v1908_v5, %v1907_v2  ;;  %v3406_v2 = vld [vmem:[%s21838_s4 + $0x60] sm:$0xff]  ;;  %v3407_v5 = vld [vmem:[%s21838_s4 + $0x68] sm:$0xff] }
  0xff   :  { %18537 = vmatpush3.bf16.msra.mxu1 %v18536_v9  ;;  %17247 = vmatprep.mubr.msk.f32.mxu1 %vm19049_vm0, %v19050_v12 }
 0x100   :  { %18541 = vmatprep.subr.bf16.mxu1 %v19048_v4 }
 0x101   :  { %v900_v18 = vpop.f32.mrb[6].mxu0 }
 0x102   :  { %v1859_v21 = vmax.f32 %v900_v18, 0.0  ;;  %v17050_v23 = vpop.f32.mrb[7].mxu0  ;;  %v1911_v18 = vld [vmem:[%s21864_s27 + $0x130] sm:$0xff] }
 0x103   :  { %v973_v24 = vpop.f32.mrb[6].mxu1  ;;  %v18569_v23 = vpack.c.bf16 %v1910_v17, %v1909_v16 }
 0x104   :  { %v1860_v26 = vmax.f32 %v973_v24, 0.0  ;;  %v17061_v27 = vpop.f32.mrb[7].mxu1  ;;  %17241 = vmatmul.mubr.msk.f32.vlgmr.msra.gmra.mrb[26].mxu0 %vm1913_vm2, %v1859_v21 }
 0x105   :  { %18540 = vmatpush3.bf16.msra.mxu0 %v18539_v19  ;;  %17254 = vmatprep.mubr.msk.f32.mxu0 %vm19049_vm0, %v19050_v12  ;;  %v1912_v19 = vld [vmem:[%s21864_s27 + $0x138] sm:$0xff] }
 0x106   :  { %17248 = vmatmul.mubr.msk.f32.vlgmr.msra.gmra.mrb[26].mxu1 %vm1913_vm2, %v1860_v26  ;;  %18544 = vmatprep.subr.bf16.mxu0 %v19048_v4  ;;  %v18572_v27 = vpack.c.bf16 %v1912_v19, %v1911_v18  ;;  %v3410_v18 = vld [vmem:[%s21838_s4 + $0x80] sm:$0xff]  ;;  %v3411_v19 = vld [vmem:[%s21838_s4 + $0x88] sm:$0xff] }
 0x107   :  { %18543 = vmatpush3.bf16.msra.mxu1 %v18542_v25  ;;  %17261 = vmatprep.mubr.msk.f32.mxu1 %vm19049_vm0, %v19050_v12 }
 0x108   :  { %18547 = vmatprep.subr.bf16.mxu1 %v19048_v4 }
 0x109   :  { %v1046_v33 = vpop.f32.mrb[8].mxu0 }
 0x10a   :  { %v1861_v34 = vmax.f32 %v1046_v33, 0.0  ;;  %v17072_v35 = vpop.f32.mrb[9].mxu0 }
 0x10b   :  { %v1119_v36 = vpop.f32.mrb[8].mxu1 }
 0x10c   :  { %v1862_v38 = vmax.f32 %v1119_v36, 0.0  ;;  %v17083_v39 = vpop.f32.mrb[9].mxu1  ;;  %17255 = vmatmul.mubr.msk.f32.vlgmr.msra.gmra.mrb[28].mxu0 %vm1913_vm2, %v1861_v34  ;;  %v3394_v36 = vld [vmem:[%s21838_s4] sm:$0xff] }
 0x10d   :  { %18546 = vmatpush3.bf16.msra.mxu0 %v18545_v28  ;;  %17268 = vmatprep.mubr.msk.f32.mxu0 %vm19049_vm0, %v19050_v12  ;;  %v3396_v39 = vld [vmem:[%s21838_s4 + $0x10] sm:$0xff] }
 0x10e   :  { %17262 = vmatmul.mubr.msk.f32.vlgmr.msra.gmra.mrb[28].mxu1 %vm1913_vm2, %v1862_v38  ;;  %18550 = vmatprep.subr.bf16.mxu0 %v19048_v4  ;;  %v18578_v41 = vpack.c.bf16 %v3397_v40, %v3396_v39 }
 0x10f   :  { %18549 = vmatpush3.bf16.msra.mxu1 %v18548_v37  ;;  %17275 = vmatprep.mubr.msk.f32.mxu1 %vm19049_vm0, %v19050_v12  ;;  %v3395_v37 = vld [vmem:[%s21838_s4 + $0x8] sm:$0xff] }
 0x110   :  { %18553 = vmatprep.subr.bf16.mxu1 %v19048_v4  ;;  %v18575_v38 = vpack.c.bf16 %v3395_v37, %v3394_v36 }
 0x111   :  { %v1192_v44 = vpop.f32.mrb[10].mxu0 }
 0x112   :  { %v1863_v46 = vmax.f32 %v1192_v44, 0.0  ;;  %v17094_v47 = vpop.f32.mrb[11].mxu0  ;;  %v3400_v44 = vld [vmem:[%s21838_s4 + $0x30] sm:$0xff] }
 0x113   :  { %v1265_v48 = vpop.f32.mrb[10].mxu1  ;;  %v18581_v47 = vpack.c.bf16 %v3399_v43, %v3398_v42 }
 0x114   :  { %v1864_v50 = vmax.f32 %v1265_v48, 0.0  ;;  %v17105_v51 = vpop.f32.mrb[11].mxu1  ;;  %17269 = vmatmul.mubr.msk.f32.vlgmr.msra.gmra.mrb[30].mxu0 %vm1913_vm2, %v1863_v46 }
 0x115   :  { %18552 = vmatpush3.bf16.msra.mxu0 %v18551_v45  ;;  %17282 = vmatprep.mubr.msk.f32.mxu0 %vm19049_vm0, %v19050_v12  ;;  %v3401_v45 = vld [vmem:[%s21838_s4 + $0x38] sm:$0xff] }
 0x116   :  { %17276 = vmatmul.mubr.msk.f32.vlgmr.msra.gmra.mrb[30].mxu1 %vm1913_vm2, %v1864_v50  ;;  %18556 = vmatprep.subr.bf16.mxu0 %v19048_v4  ;;  %v18584_v51 = vpack.c.bf16 %v3401_v45, %v3400_v44  ;;  %v3418_v44 = vld [vmem:[%s21838_s4 + $0xc0] sm:$0xff]  ;;  %v3419_v45 = vld [vmem:[%s21838_s4 + $0xc8] sm:$0xff] }
 0x117   :  { %18555 = vmatpush3.bf16.msra.mxu1 %v18554_v49  ;;  %17289 = vmatprep.mubr.msk.f32.mxu1 %vm19049_vm0, %v19050_v12 }
 0x118   :  { %18559 = vmatprep.subr.bf16.mxu1 %v19048_v4 }
 0x119   :  { %v1338_v56 = vpop.f32.mrb[12].mxu0 }
 0x11a   :  { %v1865_v58 = vmax.f32 %v1338_v56, 0.0  ;;  %v17116_v59 = vpop.f32.mrb[13].mxu0  ;;  %v3404_v56 = vld [vmem:[%s21838_s4 + $0x50] sm:$0xff] }
 0x11b   :  { %v1411_v60 = vpop.f32.mrb[12].mxu1  ;;  %v18587_v59 = vpack.c.bf16 %v3403_v55, %v3402_v54 }
 0x11c   :  { %v1866_v62 = vmax.f32 %v1411_v60, 0.0  ;;  %v17127_v63 = vpop.f32.mrb[13].mxu1  ;;  %17283 = vmatmul.mubr.msk.f32.vlgmr.msra.gmra.mrb[32].mxu0 %vm1913_vm2, %v1865_v58 }
 0x11d   :  { %18558 = vmatpush3.bf16.msra.mxu0 %v18557_v57  ;;  %17296 = vmatprep.mubr.msk.f32.mxu0 %vm19049_vm0, %v19050_v12  ;;  %v3405_v57 = vld [vmem:[%s21838_s4 + $0x58] sm:$0xff] }
 0x11e   :  { %17290 = vmatmul.mubr.msk.f32.vlgmr.msra.gmra.mrb[32].mxu1 %vm1913_vm2, %v1866_v62  ;;  %18562 = vmatprep.subr.bf16.mxu0 %v19048_v4  ;;  %v18590_v63 = vpack.c.bf16 %v3405_v57, %v3404_v56  ;;  %v3422_v56 = vld [vmem:[%s21838_s4 + $0xe0] sm:$0xff]  ;;  %v3423_v57 = vld [vmem:[%s21838_s4 + $0xe8] sm:$0xff] }
 0x11f   :  { %18561 = vmatpush3.bf16.msra.mxu1 %v18560_v61  ;;  %17303 = vmatprep.mubr.msk.f32.mxu1 %vm19049_vm0, %v19050_v12 }
 0x120   :  { %18565 = vmatprep.subr.bf16.mxu1 %v19048_v4 }
 0x121   :  { %v1484_v6 = vpop.f32.mrb[14].mxu0 }
 0x122   :  { %v1867_v8 = vmax.f32 %v1484_v6, 0.0  ;;  %v17138_v9 = vpop.f32.mrb[15].mxu0  ;;  %v3408_v6 = vld [vmem:[%s21838_s4 + $0x70] sm:$0xff] }
 0x123   :  { %v1557_v10 = vpop.f32.mrb[14].mxu1  ;;  %v18593_v9 = vpack.c.bf16 %v3407_v5, %v3406_v2 }
 0x124   :  { %v1868_v13 = vmax.f32 %v1557_v10, 0.0  ;;  %v17149_v14 = vpop.f32.mrb[15].mxu1  ;;  %17297 = vmatmul.mubr.msk.f32.vlgmr.msra.gmra.mrb[34].mxu0 %vm1913_vm2, %v1867_v8 }
 0x125   :  { %18564 = vmatpush3.bf16.msra.mxu0 %v18563_v7  ;;  %17310 = vmatprep.mubr.msk.f32.mxu0 %vm19049_vm0, %v19050_v12  ;;  %v3409_v7 = vld [vmem:[%s21838_s4 + $0x78] sm:$0xff] }
 0x126   :  { %17304 = vmatmul.mubr.msk.f32.vlgmr.msra.gmra.mrb[34].mxu1 %vm1913_vm2, %v1868_v13  ;;  %18568 = vmatprep.subr.bf16.mxu0 %v19048_v4  ;;  %v18596_v14 = vpack.c.bf16 %v3409_v7, %v3408_v6  ;;  %v3426_v6 = vld [vmem:[%s21838_s4 + $0x100] sm:$0xff]  ;;  %v3427_v7 = vld [vmem:[%s21838_s4 + $0x108] sm:$0xff] }
 0x127   :  { %18567 = vmatpush3.bf16.msra.mxu1 %v18566_v11  ;;  %17317 = vmatprep.mubr.msk.f32.mxu1 %vm19049_vm0, %v19050_v12 }
 0x128   :  { %18571 = vmatprep.subr.bf16.mxu1 %v19048_v4 }
 0x129   :  { %v1630_v21 = vpop.f32.mrb[16].mxu0 }
 0x12a   :  { %v1869_v24 = vmax.f32 %v1630_v21, 0.0  ;;  %v17160_v25 = vpop.f32.mrb[17].mxu0  ;;  %v3412_v21 = vld [vmem:[%s21838_s4 + $0x90] sm:$0xff] }
 0x12b   :  { %v1703_v26 = vpop.f32.mrb[16].mxu1  ;;  %v18599_v25 = vpack.c.bf16 %v3411_v19, %v3410_v18 }
 0x12c   :  { %v1870_v29 = vmax.f32 %v1703_v26, 0.0  ;;  %v17171_v30 = vpop.f32.mrb[17].mxu1  ;;  %17311 = vmatmul.mubr.msk.f32.vlgmr.msra.gmra.mrb[36].mxu0 %vm1913_vm2, %v1869_v24 }
 0x12d   :  { %18570 = vmatpush3.bf16.msra.mxu0 %v18569_v23  ;;  %17324 = vmatprep.mubr.msk.f32.mxu0 %vm19049_vm0, %v19050_v12  ;;  %v3413_v23 = vld [vmem:[%s21838_s4 + $0x98] sm:$0xff] }
 0x12e   :  { %17318 = vmatmul.mubr.msk.f32.vlgmr.msra.gmra.mrb[36].mxu1 %vm1913_vm2, %v1870_v29  ;;  %18574 = vmatprep.subr.bf16.mxu0 %v19048_v4  ;;  %v18602_v30 = vpack.c.bf16 %v3413_v23, %v3412_v21  ;;  %v3430_v21 = vld [vmem:[%s21838_s4 + $0x120] sm:$0xff]  ;;  %v3431_v23 = vld [vmem:[%s21838_s4 + $0x128] sm:$0xff] }
 0x12f   :  { %18573 = vmatpush3.bf16.msra.mxu1 %v18572_v27  ;;  %17331 = vmatprep.mubr.msk.f32.mxu1 %vm19049_vm0, %v19050_v12 }
 0x130   :  { %18577 = vmatprep.subr.bf16.mxu1 %v19048_v4 }
 0x131   :  { %v1776_v31 = vpop.f32.mrb[18].mxu0 }
 0x132   :  { %v1871_v32 = vmax.f32 %v1776_v31, 0.0  ;;  %v17182_v33 = vpop.f32.mrb[19].mxu0 }
 0x133   :  { %v1849_v28 = vpop.f32.mrb[18].mxu1  ;;  %v3414_v33 = vld [vmem:[%s21838_s4 + $0xa0] sm:$0xff] }
 0x134   :  { %v1872_v34 = vmax.f32 %v1849_v28, 0.0  ;;  %v17193_v35 = vpop.f32.mrb[19].mxu1  ;;  %17325 = vmatmul.mubr.msk.f32.vlgmr.msra.gmra.mrb[38].mxu0 %vm1913_vm2, %v1871_v32  ;;  %v3415_v28 = vld [vmem:[%s21838_s4 + $0xa8] sm:$0xff] }
 0x135   :  { %17338 = vmatprep.mubr.msk.f32.mxu0 %vm19049_vm0, %v19050_v12  ;;  %18576 = vmatpush3.bf16.msra.mxu0 %v18575_v38  ;;  %v3417_v35 = vld [vmem:[%s21838_s4 + $0xb8] sm:$0xff]  ;;  %v18605_v37 = vpack.c.bf16 %v3415_v28, %v3414_v33 }
 0x136   :  { %17332 = vmatmul.mubr.msk.f32.vlgmr.msra.gmra.mrb[38].mxu1 %vm1913_vm2, %v1872_v34  ;;  %18580 = vmatprep.subr.bf16.mxu0 %v19048_v4  ;;  %v3416_v34 = vld [vmem:[%s21838_s4 + $0xb0] sm:$0xff] }
 0x137   :  { %17345 = vmatprep.mubr.msk.f32.mxu1 %vm19049_vm0, %v19050_v12  ;;  %18579 = vmatpush3.bf16.msra.mxu1 %v18578_v41  ;;  %v18608_v41 = vpack.c.bf16 %v3417_v35, %v3416_v34 }
 0x138   :  { %18583 = vmatprep.subr.bf16.mxu1 %v19048_v4 }
 0x1bf   :  { %v1983_v46 = vpop.f32.mrb[20].mxu0 }
 0x1c0   :  { %v3374_v48 = vmax.f32 %v1983_v46, 0.0  ;;  %v17200_v49 = vpop.f32.mrb[21].mxu0  ;;  %v3420_v46 = vld [vmem:[%s21838_s4 + $0xd0] sm:$0xff] }
 0x1c1   :  { %v2056_v50 = vpop.f32.mrb[20].mxu1  ;;  %v18611_v49 = vpack.c.bf16 %v3419_v45, %v3418_v44 }
 0x1c2   :  { %v3375_v52 = vmax.f32 %v2056_v50, 0.0  ;;  %v17207_v53 = vpop.f32.mrb[21].mxu1  ;;  %17339 = vmatmul.mubr.msk.f32.vlgmr.msra.gmra.mrb[40].mxu0 %vm1913_vm2, %v3374_v48 }
 0x1c3   :  { %18582 = vmatpush3.bf16.msra.mxu0 %v18581_v47  ;;  %17352 = vmatprep.mubr.msk.f32.mxu0 %vm19049_vm0, %v19050_v12  ;;  %v3421_v47 = vld [vmem:[%s21838_s4 + $0xd8] sm:$0xff] }
 0x1c4   :  { %17346 = vmatmul.mubr.msk.f32.vlgmr.msra.gmra.mrb[40].mxu1 %vm1913_vm2, %v3375_v52  ;;  %18586 = vmatprep.subr.bf16.mxu0 %v19048_v4  ;;  %v18614_v53 = vpack.c.bf16 %v3421_v47, %v3420_v46 }
 0x1c5   :  { %18585 = vmatpush3.bf16.msra.mxu1 %v18584_v51  ;;  %17359 = vmatprep.mubr.msk.f32.mxu1 %vm19049_vm0, %v19050_v12 }
 0x1c6   :  { %18589 = vmatprep.subr.bf16.mxu1 %v19048_v4 }
 0x1c7   :  { %v2129_v58 = vpop.f32.mrb[22].mxu0 }
 0x1c8   :  { %v3376_v60 = vmax.f32 %v2129_v58, 0.0  ;;  %v17214_v61 = vpop.f32.mrb[23].mxu0  ;;  %v3424_v58 = vld [vmem:[%s21838_s4 + $0xf0] sm:$0xff] }
 0x1c9   :  { %v2202_v62 = vpop.f32.mrb[22].mxu1  ;;  %v18617_v61 = vpack.c.bf16 %v3423_v57, %v3422_v56 }
 0x1ca   :  { %v3377_v0 = vmax.f32 %v2202_v62, 0.0  ;;  %v17221_v1 = vpop.f32.mrb[23].mxu1  ;;  %17353 = vmatmul.mubr.msk.f32.vlgmr.msra.gmra.mrb[42].mxu0 %vm1913_vm2, %v3376_v60 }
 0x1cb   :  { %18588 = vmatpush3.bf16.msra.mxu0 %v18587_v59  ;;  %17366 = vmatprep.mubr.msk.f32.mxu0 %vm19049_vm0, %v19050_v12  ;;  %v3425_v59 = vld [vmem:[%s21838_s4 + $0xf8] sm:$0xff] }
 0x1cc   :  { %17360 = vmatmul.mubr.msk.f32.vlgmr.msra.gmra.mrb[42].mxu1 %vm1913_vm2, %v3377_v0  ;;  %18592 = vmatprep.subr.bf16.mxu0 %v19048_v4  ;;  %v18620_v1 = vpack.c.bf16 %v3425_v59, %v3424_v58 }
 0x1cd   :  { %18591 = vmatpush3.bf16.msra.mxu1 %v18590_v63  ;;  %17373 = vmatprep.mubr.msk.f32.mxu1 %vm19049_vm0, %v19050_v12 }
 0x1ce   :  { %18595 = vmatprep.subr.bf16.mxu1 %v19048_v4 }
 0x1cf   :  { %v2275_v8 = vpop.f32.mrb[24].mxu0 }
 0x1d0   :  { %v3378_v10 = vmax.f32 %v2275_v8, 0.0  ;;  %v17228_v11 = vpop.f32.mrb[25].mxu0  ;;  %v3428_v8 = vld [vmem:[%s21838_s4 + $0x110] sm:$0xff] }
 0x1d1   :  { %v2348_v13 = vpop.f32.mrb[24].mxu1  ;;  %v18623_v11 = vpack.c.bf16 %v3427_v7, %v3426_v6 }
 0x1d2   :  { %v3379_v16 = vmax.f32 %v2348_v13, 0.0  ;;  %v17235_v17 = vpop.f32.mrb[25].mxu1  ;;  %17367 = vmatmul.mubr.msk.f32.vlgmr.msra.gmra.mrb[44].mxu0 %vm1913_vm2, %v3378_v10 }
 0x1d3   :  { %18594 = vmatpush3.bf16.msra.mxu0 %v18593_v9  ;;  %17380 = vmatprep.mubr.msk.f32.mxu0 %vm19049_vm0, %v19050_v12  ;;  %v3429_v9 = vld [vmem:[%s21838_s4 + $0x118] sm:$0xff] }
 0x1d4   :  { %17374 = vmatmul.mubr.msk.f32.vlgmr.msra.gmra.mrb[44].mxu1 %vm1913_vm2, %v3379_v16  ;;  %18598 = vmatprep.subr.bf16.mxu0 %v19048_v4  ;;  %v18626_v17 = vpack.c.bf16 %v3429_v9, %v3428_v8 }
 0x1d5   :  { %18597 = vmatpush3.bf16.msra.mxu1 %v18596_v14  ;;  %17387 = vmatprep.mubr.msk.f32.mxu1 %vm19049_vm0, %v19050_v12 }
 0x1d6   :  { %18601 = vmatprep.subr.bf16.mxu1 %v19048_v4 }
 0x1d7   :  { %v2421_v24 = vpop.f32.mrb[26].mxu0 }
 0x1d8   :  { %v3380_v26 = vmax.f32 %v2421_v24, 0.0  ;;  %v17242_v27 = vpop.f32.mrb[27].mxu0  ;;  %v3432_v24 = vld [vmem:[%s21838_s4 + $0x130] sm:$0xff] }
 0x1d9   :  { %v2494_v29 = vpop.f32.mrb[26].mxu1  ;;  %v18629_v27 = vpack.c.bf16 %v3431_v23, %v3430_v21 }
 0x1da   :  { %v3381_v31 = vmax.f32 %v2494_v29, 0.0  ;;  %v17249_v32 = vpop.f32.mrb[27].mxu1  ;;  %17381 = vmatmul.mubr.msk.f32.vlgmr.msra.gmra.mrb[46].mxu0 %vm1913_vm2, %v3380_v26 }
 0x1db   :  { %18600 = vmatpush3.bf16.msra.mxu0 %v18599_v25  ;;  %17394 = vmatprep.mubr.msk.f32.mxu0 %vm19049_vm0, %v19050_v12  ;;  %v3433_v25 = vld [vmem:[%s21838_s4 + $0x138] sm:$0xff]  ;;  %s19024_s4 = scalar_lea.vmem %s16118_s3, 64 }
 0x1dc   :  { %17388 = vmatmul.mubr.msk.f32.vlgmr.msra.gmra.mrb[46].mxu1 %vm1913_vm2, %v3381_v31  ;;  %18604 = vmatprep.subr.bf16.mxu0 %v19048_v4  ;;  %v18632_v32 = vpack.c.bf16 %v3433_v25, %v3432_v24  ;;  %v4915_v24 = vld [vmem:[%s21839_s5 + $0x8] sm:$0xff]  ;;  %p19025_p0 = scmp.ne.s32.totalorder %s16118_s3, %s19024_s4  ;;  %p19030_p2 = scmp.lt.s32.totalorder %s19024_s4, %s19024_s4 }
 0x1dd   :  { %18603 = vmatpush3.bf16.msra.mxu1 %v18602_v30  ;;  %17401 = vmatprep.mubr.msk.f32.mxu1 %vm19049_vm0, %v19050_v12 }
 0x1de   :  { %18607 = vmatprep.subr.bf16.mxu1 %v19048_v4  ;;  %p19031_p3 = por %p19030_p2, %p19029_p1 }
 0x1df   :  { %v2567_v36 = vpop.f32.mrb[28].mxu0 }
 0x1e0   :  { %v3382_v38 = vmax.f32 %v2567_v36, 0.0  ;;  %v17256_v39 = vpop.f32.mrb[29].mxu0  ;;  %p19032_p4 = pnand %p19031_p3, %p19025_p0 }
 0x1e1   :  { %v2640_v40 = vpop.f32.mrb[28].mxu1 }
 0x1e2   :  { %v3383_v42 = vmax.f32 %v2640_v40, 0.0  ;;  %v17263_v43 = vpop.f32.mrb[29].mxu1  ;;  %17395 = vmatmul.mubr.msk.f32.vlgmr.msra.gmra.mrb[48].mxu0 %vm1913_vm2, %v3382_v38  ;;  %v4914_v40 = vld [vmem:[%s21839_s5] sm:$0xff] }
 0x1e3   :  { %18606 = vmatpush3.bf16.msra.mxu0 %v18605_v37  ;;  %17408 = vmatprep.mubr.msk.f32.mxu0 %vm19049_vm0, %v19050_v12 }
 0x1e4   :  { %17402 = vmatmul.mubr.msk.f32.vlgmr.msra.gmra.mrb[48].mxu1 %vm1913_vm2, %v3383_v42  ;;  %18610 = vmatprep.subr.bf16.mxu0 %v19048_v4 }
 0x1e5   :  { %18609 = vmatpush3.bf16.msra.mxu1 %v18608_v41  ;;  %17415 = vmatprep.mubr.msk.f32.mxu1 %vm19049_vm0, %v19050_v12  ;;  %v4927_v41 = vrot.slane %v4914_v40, %v19193_v20 }
 0x1e6   :  { %18613 = vmatprep.subr.bf16.mxu1 %v19048_v4 }
 0x1e7   :  { %v2713_v48 = vpop.f32.mrb[30].mxu0  ;;  %v4935_v42 = vcombine.high %v4927_v41, %v4927_v41  ;;  %v4943_v43 = vrot.slane %v4927_v41, %v19193_v20 }
 0x1e8   :  { %v3384_v50 = vmax.f32 %v2713_v48, 0.0  ;;  %v17270_v51 = vpop.f32.mrb[31].mxu0 }
 0x1e9   :  { %v2786_v52 = vpop.f32.mrb[30].mxu1  ;;  %v4957_v44 = vrot.slane %v4935_v42, %v19193_v20  ;;  %v5045_v45 = vrot.slane %v4943_v43, %v19198_v22 }
 0x1ea   :  { %v3385_v54 = vmax.f32 %v2786_v52, 0.0  ;;  %v17277_v55 = vpop.f32.mrb[31].mxu1  ;;  %17409 = vmatmul.mubr.msk.f32.vlgmr.msra.gmra.mrb[50].mxu0 %vm1913_vm2, %v3384_v50 }
 0x1eb   :  { %18612 = vmatpush3.bf16.msra.mxu0 %v18611_v49  ;;  %17422 = vmatprep.mubr.msk.f32.mxu0 %vm19049_vm0, %v19050_v12  ;;  %v4920_v49 = vcombine.high %v4914_v40, %v4914_v40  ;;  %v5049_v50 = vrot.slane %v4957_v44, %v19198_v22  ;;  %v4965_v55 = vcombine.high %v4943_v43, %v4943_v43 }
 0x1ec   :  { %17416 = vmatmul.mubr.msk.f32.vlgmr.msra.gmra.mrb[50].mxu1 %vm1913_vm2, %v3385_v54  ;;  %18616 = vmatprep.subr.bf16.mxu0 %v19048_v4  ;;  %v4967_v58 = vcombine.high %v4957_v44, %v4957_v44 }
 0x1ed   :  { %18615 = vmatpush3.bf16.msra.mxu1 %v18614_v53  ;;  %17429 = vmatprep.mubr.msk.f32.mxu1 %vm19049_vm0, %v19050_v12  ;;  %v4934_v59 = vrot.slane %v4920_v49, %v19193_v20 }
 0x1ee   :  { %18619 = vmatprep.subr.bf16.mxu1 %v19048_v4 }
 0x1ef   :  { %v2859_v60 = vpop.f32.mrb[32].mxu0  ;;  %v4950_v9 = vrot.slane %v4934_v59, %v19193_v20 }
 0x1f0   :  { %v3386_v62 = vmax.f32 %v2859_v60, 0.0  ;;  %v17284_v63 = vpop.f32.mrb[33].mxu0  ;;  %v5053_v60 = vrot.slane %v4965_v55, %v19198_v22 }
 0x1f1   :  { %v2932_v0 = vpop.f32.mrb[32].mxu1 }
 0x1f2   :  { %v3387_v2 = vmax.f32 %v2932_v0, 0.0  ;;  %v17291_v5 = vpop.f32.mrb[33].mxu1  ;;  %17423 = vmatmul.mubr.msk.f32.vlgmr.msra.gmra.mrb[52].mxu0 %vm1913_vm2, %v3386_v62 }
 0x1f3   :  { %18618 = vmatpush3.bf16.msra.mxu0 %v18617_v61  ;;  %17436 = vmatprep.mubr.msk.f32.mxu0 %vm19049_vm0, %v19050_v12 }
 0x1f4   :  { %17430 = vmatmul.mubr.msk.f32.vlgmr.msra.gmra.mrb[52].mxu1 %vm1913_vm2, %v3387_v2  ;;  %18622 = vmatprep.subr.bf16.mxu0 %v19048_v4  ;;  %v4936_v2 = vcombine.high %v4934_v59, %v4934_v59 }
 0x1f5   :  { %18621 = vmatpush3.bf16.msra.mxu1 %v18620_v1  ;;  %17443 = vmatprep.mubr.msk.f32.mxu1 %vm19049_vm0, %v19050_v12  ;;  %v5057_v1 = vrot.slane %v4967_v58, %v19198_v22 }
 0x1f6   :  { %18625 = vmatprep.subr.bf16.mxu1 %v19048_v4 }
 0x1f7   :  { %v3005_v10 = vpop.f32.mrb[34].mxu0 }
 0x1f8   :  { %v3388_v13 = vmax.f32 %v3005_v10, 0.0  ;;  %v17298_v14 = vpop.f32.mrb[35].mxu0 }
 0x1f9   :  { %v3078_v16 = vpop.f32.mrb[34].mxu1 }
 0x1fa   :  { %v3389_v18 = vmax.f32 %v3078_v16, 0.0  ;;  %v17305_v19 = vpop.f32.mrb[35].mxu1  ;;  %17437 = vmatmul.mubr.msk.f32.vlgmr.msra.gmra.mrb[54].mxu0 %vm1913_vm2, %v3388_v13  ;;  %v4964_v13 = vrot.slane %v4936_v2, %v19193_v20  ;;  %v5061_v16 = vrot.slane %v4950_v9, %v19198_v22 }
 0x1fb   :  { %18624 = vmatpush3.bf16.msra.mxu0 %v18623_v11  ;;  %17450 = vmatprep.mubr.msk.f32.mxu0 %vm19049_vm0, %v19050_v12 }
 0x1fc   :  { %17444 = vmatmul.mubr.msk.f32.vlgmr.msra.gmra.mrb[54].mxu1 %vm1913_vm2, %v3389_v18  ;;  %18628 = vmatprep.subr.bf16.mxu0 %v19048_v4  ;;  %v5065_v21 = vrot.slane %v4964_v13, %v19198_v22 }
 0x1fd   :  { %18627 = vmatpush3.bf16.msra.mxu1 %v18626_v17  ;;  %17457 = vmatprep.mubr.msk.f32.mxu1 %vm19049_vm0, %v19050_v12 }
 0x1fe   :  { %18631 = vmatprep.subr.bf16.mxu1 %v19048_v4 }
 0x1ff   :  { %v3151_v26 = vpop.f32.mrb[36].mxu0 }
 0x200   :  { %v3390_v29 = vmax.f32 %v3151_v26, 0.0  ;;  %v17312_v30 = vpop.f32.mrb[37].mxu0 }
 0x201   :  { %v3224_v31 = vpop.f32.mrb[36].mxu1 }
 0x202   :  { %v3391_v33 = vmax.f32 %v3224_v31, 0.0  ;;  %v17319_v28 = vpop.f32.mrb[37].mxu1  ;;  %17451 = vmatmul.mubr.msk.f32.vlgmr.msra.gmra.mrb[56].mxu0 %vm1913_vm2, %v3390_v29  ;;  %v4966_v29 = vcombine.high %v4950_v9, %v4950_v9 }
 0x203   :  { %18630 = vmatpush3.bf16.msra.mxu0 %v18629_v27  ;;  %17464 = vmatprep.mubr.msk.f32.mxu0 %vm19049_vm0, %v19050_v12 }
 0x204   :  { %17458 = vmatmul.mubr.msk.f32.vlgmr.msra.gmra.mrb[56].mxu1 %vm1913_vm2, %v3391_v33  ;;  %18634 = vmatprep.subr.bf16.mxu0 %v19048_v4  ;;  %v4976_v33 = vrot.slane %v4915_v24, %v19193_v20 }
 0x205   :  { %18633 = vmatpush3.bf16.msra.mxu1 %v18632_v32  ;;  %17471 = vmatprep.mubr.msk.f32.mxu1 %vm19049_vm0, %v19050_v12  ;;  %v4968_v32 = vcombine.high %v4964_v13, %v4964_v13 }
 0x206   :  { %18637 = vmatprep.subr.bf16.mxu1 %v19048_v4  ;;  %v4992_v44 = vrot.slane %v4976_v33, %v19193_v20 }
 0x207   :  { %v3297_v34 = vpop.f32.mrb[38].mxu0 }
 0x208   :  { %v3392_v35 = vmax.f32 %v3297_v34, 0.0  ;;  %v17326_v36 = vpop.f32.mrb[39].mxu0  ;;  %v5069_v34 = vrot.slane %v4966_v29, %v19198_v22  ;;  %v5077_v49 = vrot.slane %v4992_v44, %v19198_v22  ;;  %v5014_v59 = vcombine.high %v4992_v44, %v4992_v44 }
 0x209   :  { %v3370_v37 = vpop.f32.mrb[38].mxu1 }
 0x20a   :  { %v3393_v38 = vmax.f32 %v3370_v37, 0.0  ;;  %v17333_v39 = vpop.f32.mrb[39].mxu1  ;;  %17465 = vmatmul.mubr.msk.f32.vlgmr.msra.gmra.mrb[58].mxu0 %vm1913_vm2, %v3392_v35 }
 0x20b   :  { %17480 = vmatprep.mubr.msk.f32.mxu0 %vm19049_vm0, %v19050_v12  ;;  %v4984_v39 = vcombine.high %v4976_v33, %v4976_v33 }
 0x20c   :  { %17472 = vmatmul.mubr.msk.f32.vlgmr.msra.gmra.mrb[58].mxu1 %vm1913_vm2, %v3393_v38  ;;  %v5073_v38 = vrot.slane %v4968_v32, %v19198_v22 }
 0x20d   :  { %17489 = vmatprep.mubr.msk.f32.mxu1 %vm19049_vm0, %v19050_v12 }
 0x295   :  { %v3503_v46 = vpop.f32.mrb[40].mxu0 }
 0x296   :  { %v4894_v47 = vmax.f32 %v3503_v46, 0.0  ;;  %v17340_v48 = vpop.f32.mrb[41].mxu0 }
 0x297   :  { %v3576_v51 = vpop.f32.mrb[40].mxu1 }
 0x298   :  { %v4895_v52 = vmax.f32 %v3576_v51, 0.0  ;;  %v17347_v53 = vpop.f32.mrb[41].mxu1  ;;  %v5142_v54 = vmul.f32 %v5045_v45, %v4894_v47  ;;  %v5006_v47 = vrot.slane %v4984_v39, %v19193_v20 }
 0x29a   :  { %v5163_v56 = vsel %vm5162_vm3, %v5142_v54, 0.0  ;;  %v5143_v57 = vmul.f32 %v5049_v50, %v4895_v52  ;;  %v5081_v53 = vrot.slane %v5006_v47, %v19198_v22  ;;  %v4969_v54 = vcombine.high %v4915_v24, %v4915_v24 }
 0x29b   :  { %5164 = vadd.xlane.f32.xlu0 %v5163_v56 }
 0x29c   :  { %v5166_v0 = vsel %vm5162_vm3, %v5143_v57, 0.0 }
 0x29d   :  { %v3649_v61 = vpop.f32.mrb[42].mxu0 }
 0x29e   :  { %v4896_v62 = vmax.f32 %v3649_v61, 0.0  ;;  %v17354_v63 = vpop.f32.mrb[43].mxu0 }
 0x29f   :  { %v3722_v5 = vpop.f32.mrb[42].mxu1  ;;  %5167 = vadd.xlane.f32.xlu0 %v5166_v0  ;;  %v4983_v63 = vrot.slane %v4969_v54, %v19193_v20 }
 0x2a0   :  { %v4897_v6 = vmax.f32 %v3722_v5, 0.0  ;;  %v17361_v7 = vpop.f32.mrb[43].mxu1  ;;  %v5144_v8 = vmul.f32 %v5053_v60, %v4896_v62  ;;  %v5016_v62 = vcombine.high %v5006_v47, %v5006_v47 }
 0x2a2   :  { %v5169_v10 = vsel %vm5162_vm3, %v5144_v8, 0.0  ;;  %v5145_v11 = vmul.f32 %v5057_v1, %v4897_v6  ;;  %v5085_v1 = vrot.slane %v5014_v59, %v19198_v22  ;;  %v5089_v7 = vrot.slane %v5016_v62, %v19198_v22 }
 0x2a3   :  { %5170 = vadd.xlane.f32.xlu1 %v5169_v10  ;;  %v4985_v8 = vcombine.high %v4983_v63, %v4983_v63 }
 0x2a4   :  { %v5172_v14 = vsel %vm5162_vm3, %v5145_v11, 0.0 }
 0x2a5   :  { %v3795_v17 = vpop.f32.mrb[44].mxu0 }
 0x2a6   :  { %v4898_v18 = vmax.f32 %v3795_v17, 0.0  ;;  %v17368_v19 = vpop.f32.mrb[45].mxu0 }
 0x2a7   :  { %v3868_v23 = vpop.f32.mrb[44].mxu1  ;;  %5173 = vadd.xlane.f32.xlu1 %v5172_v14  ;;  %v4999_v14 = vrot.slane %v4983_v63, %v19193_v20 }
 0x2a8   :  { %v4899_v25 = vmax.f32 %v3868_v23, 0.0  ;;  %v17375_v26 = vpop.f32.mrb[45].mxu1  ;;  %v5146_v27 = vmul.f32 %v5061_v16, %v4898_v18  ;;  %v5013_v18 = vrot.slane %v4985_v8, %v19193_v20 }
 0x2a9   :  { %v5015_v32 = vcombine.high %v4999_v14, %v4999_v14 }
 0x2aa   :  { %v5175_v30 = vsel %vm5162_vm3, %v5146_v27, 0.0  ;;  %v5147_v31 = vmul.f32 %v5065_v21, %v4899_v25  ;;  %v5093_v21 = vrot.slane %v4999_v14, %v19198_v22  ;;  %v5097_v26 = vrot.slane %v5013_v18, %v19198_v22 }
 0x2ab   :  { %5176 = vadd.xlane.f32.xlu0 %v5175_v30 }
 0x2ac   :  { %v5178_v28 = vsel %vm5162_vm3, %v5147_v31, 0.0 }
 0x2ad   :  { %v3941_v35 = vpop.f32.mrb[46].mxu0 }
 0x2ae   :  { %v4900_v36 = vmax.f32 %v3941_v35, 0.0  ;;  %v17382_v37 = vpop.f32.mrb[47].mxu0  ;;  %v16186_v35 = vld.sshfl [vmem:[%s21839_s5 + $0x10] sm:$0x33 pattern:$0x75316420] }
 0x2af   :  { %v4014_v40 = vpop.f32.mrb[46].mxu1  ;;  %5179 = vadd.xlane.f32.xlu0 %v5178_v28  ;;  %v5101_v37 = vrot.slane %v5015_v32, %v19198_v22  ;;  %v5032_v47 = vrot.slane %v16186_v35, %v19193_v20 }
 0x2b0   :  { %v4901_v41 = vmax.f32 %v4014_v40, 0.0  ;;  %v17389_v42 = vpop.f32.mrb[47].mxu1  ;;  %v5148_v43 = vmul.f32 %v5069_v34, %v4900_v36  ;;  %v5017_v34 = vcombine.high %v5013_v18, %v5013_v18 }
 0x2b1   :  { %v5025_v42 = vcombine.high %v16186_v35, %v16186_v35 }
 0x2b2   :  { %v5181_v45 = vsel %vm5162_vm3, %v5148_v43, 0.0  ;;  %v5149_v46 = vmul.f32 %v5073_v38, %v4901_v41  ;;  %v5105_v41 = vrot.slane %v5017_v34, %v19198_v22 }
 0x2b3   :  { %5182 = vadd.xlane.f32.xlu0 %v5181_v45 }
 0x2b4   :  { %v5184_v48 = vsel %vm5162_vm3, %v5149_v46, 0.0 }
 0x2b5   :  { %v4087_v50 = vpop.f32.mrb[48].mxu0 }
 0x2b6   :  { %v4902_v51 = vmax.f32 %v4087_v50, 0.0  ;;  %v17396_v52 = vpop.f32.mrb[49].mxu0  ;;  %v5039_v50 = vrot.slane %v5025_v42, %v19193_v20 }
 0x2b7   :  { %v4160_v55 = vpop.f32.mrb[48].mxu1  ;;  %5185 = vadd.xlane.f32.xlu0 %v5184_v48  ;;  %v5109_v52 = vrot.slane %v5032_v47, %v19198_v22 }
 0x2b8   :  { %v4903_v56 = vmax.f32 %v4160_v55, 0.0  ;;  %v17403_v57 = vpop.f32.mrb[49].mxu1  ;;  %v5150_v58 = vmul.f32 %v5077_v49, %v4902_v51 }
 0x2ba   :  { %v5151_v60 = vmul.f32 %v5081_v53, %v4903_v56  ;;  %v5187_v61 = vsel %vm5162_vm3, %v5150_v58, 0.0  ;;  %v5113_v56 = vrot.slane %v5039_v50, %v19198_v22 }
 0x2bb   :  { %5188 = vadd.xlane.f32.xlu0 %v5187_v61  ;;  %v5040_v61 = vcombine.high %v5032_v47, %v5032_v47 }
 0x2bc   :  { %v5190_v0 = vsel %vm5162_vm3, %v5151_v60, 0.0 }
 0x2bd   :  { %5191 = vadd.xlane.f32.xlu1 %v5190_v0  ;;  %v4233_v2 = vpop.f32.mrb[50].mxu0  ;;  %v5041_v0 = vcombine.high %v5039_v50, %v5039_v50 }
 0x2be   :  { %v4904_v5 = vmax.f32 %v4233_v2, 0.0  ;;  %v17410_v6 = vpop.f32.mrb[51].mxu0  ;;  %v5117_v2 = vrot.slane %v5040_v61, %v19198_v22 }
 0x2bf   :  { %v4306_v9 = vpop.f32.mrb[50].mxu1  ;;  %v5121_v8 = vrot.slane %v5041_v0, %v19198_v22 }
 0x2c0   :  { %v4905_v10 = vmax.f32 %v4306_v9, 0.0  ;;  %v17417_v11 = vpop.f32.mrb[51].mxu1  ;;  %v5152_v13 = vmul.f32 %v5085_v1, %v4904_v5 }
 0x2c2   :  { %v5193_v16 = vsel %vm5162_vm3, %v5152_v13, 0.0  ;;  %v5153_v17 = vmul.f32 %v5089_v7, %v4905_v10 }
 0x2c3   :  { %5194 = vadd.xlane.f32.xlu1 %v5193_v16 }
 0x2c4   :  { %v5196_v19 = vsel %vm5162_vm3, %v5153_v17, 0.0 }
 0x2c5   :  { %v4379_v23 = vpop.f32.mrb[52].mxu0 }
 0x2c6   :  { %v4906_v24 = vmax.f32 %v4379_v23, 0.0  ;;  %v17424_v25 = vpop.f32.mrb[53].mxu0  ;;  %v5244_v23 = vand.u32 127, %v74_v3 }
 0x2c7   :  { %v4452_v27 = vpop.f32.mrb[52].mxu1  ;;  %5197 = vadd.xlane.f32.xlu1 %v5196_v19 }
 0x2c8   :  { %v4907_v29 = vmax.f32 %v4452_v27, 0.0  ;;  %v17431_v30 = vpop.f32.mrb[53].mxu1  ;;  %v5154_v31 = vmul.f32 %v5093_v21, %v4906_v24  ;;  %v20047_v25 = vsub.s32 %v5244_v23, %v19183_v15  ;;  %v5645_v23 = vld [vmem:[%s21842_s8 + $0x20] sm:$0xff] }
 0x2ca   :  { %v5199_v33 = vsel %vm5162_vm3, %v5154_v31, 0.0  ;;  %v5155_v28 = vmul.f32 %v5097_v26, %v4907_v29 }
 0x2cb   :  { %5200 = vadd.xlane.f32.xlu1 %v5199_v33 }
 0x2cc   :  { %v5202_v36 = vsel %vm5162_vm3, %v5155_v28, 0.0 }
 0x2cd   :  { %v4525_v38 = vpop.f32.mrb[54].mxu0 }
 0x2ce   :  { %v4908_v39 = vmax.f32 %v4525_v38, 0.0  ;;  %v17438_v40 = vpop.f32.mrb[55].mxu0 }
 0x2cf   :  { %v4598_v43 = vpop.f32.mrb[54].mxu1  ;;  %5203 = vadd.xlane.f32.xlu1 %v5202_v36 }
 0x2d0   :  { %v4909_v44 = vmax.f32 %v4598_v43, 0.0  ;;  %v17445_v45 = vpop.f32.mrb[55].mxu1  ;;  %v5156_v46 = vmul.f32 %v5101_v37, %v4908_v39 }
 0x2d2   :  { %v5205_v48 = vsel %vm5162_vm3, %v5156_v46, 0.0  ;;  %v5157_v49 = vmul.f32 %v5105_v41, %v4909_v44 }
 0x2d3   :  { %5206 = vadd.xlane.f32.xlu0 %v5205_v48 }
 0x2d4   :  { %v5208_v51 = vsel %vm5162_vm3, %v5157_v49, 0.0 }
 0x2d5   :  { %5209 = vadd.xlane.f32.xlu1 %v5208_v51  ;;  %v4671_v53 = vpop.f32.mrb[56].mxu0 }
 0x2d6   :  { %v4910_v54 = vmax.f32 %v4671_v53, 0.0  ;;  %v17452_v55 = vpop.f32.mrb[57].mxu0 }
 0x2d7   :  { %v4744_v57 = vpop.f32.mrb[56].mxu1 }
 0x2d8   :  { %v4911_v58 = vmax.f32 %v4744_v57, 0.0  ;;  %v17459_v59 = vpop.f32.mrb[57].mxu1  ;;  %v5158_v60 = vmul.f32 %v5109_v52, %v4910_v54 }
 0x2da   :  { %v5159_v62 = vmul.f32 %v5113_v56, %v4911_v58  ;;  %v5211_v63 = vsel %vm5162_vm3, %v5158_v60, 0.0 }
 0x2db   :  { %5212 = vadd.xlane.f32.xlu0 %v5211_v63 }
 0x2dc   :  { %v5214_v1 = vsel %vm5162_vm3, %v5159_v62, 0.0 }
 0x2dd   :  { %5215 = vadd.xlane.f32.xlu1 %v5214_v1  ;;  %v4817_v5 = vpop.f32.mrb[58].mxu0 }
 0x2de   :  { %v4912_v6 = vmax.f32 %v4817_v5, 0.0  ;;  %v17466_v7 = vpop.f32.mrb[59].mxu0 }
 0x2df   :  { %v4890_v9 = vpop.f32.mrb[58].mxu1 }
 0x2e0   :  { %v4913_v10 = vmax.f32 %v4890_v9, 0.0  ;;  %v17473_v11 = vpop.f32.mrb[59].mxu1  ;;  %v5160_v13 = vmul.f32 %v5117_v2, %v4912_v6 }
 0x2e2   :  { %v5217_v14 = vsel %vm5162_vm3, %v5160_v13, 0.0  ;;  %v5161_v16 = vmul.f32 %v5121_v8, %v4913_v10 }
 0x2e3   :  { %5218 = vadd.xlane.f32.xlu0 %v5217_v14 }
 0x2e4   :  { %v5220_v17 = vsel %vm5162_vm3, %v5161_v16, 0.0 }
 0x2e5   :  { %5221 = vadd.xlane.f32.xlu1 %v5220_v17  ;;  %v5641_v17 = vld [vmem:[%s21842_s8] sm:$0xff] }
 0x328   :  { %v5165_v18 = vpop.xlane.xlu0 %5164 }
 0x329   :  { %v5248_v31 = vrot.slane %v5165_v18, %v20047_v25  ;;  %v5642_v18 = vld [vmem:[%s21842_s8 + $0x8] sm:$0xff] }
 0x32c   :  { %v5168_v19 = vpop.xlane.xlu0 %5167 }
 0x32d   :  { %v5252_v29 = vrot.slane %v5168_v19, %v20047_v25  ;;  %v5644_v19 = vld [vmem:[%s21842_s8 + $0x18] sm:$0xff] }
 0x32f   :  { %v5326_v28 = vsel %vm5325_vm4, %v5252_v29, %v5248_v31 }
 0x330   :  { %v5171_v21 = vpop.xlane.xlu1 %5170 }
 0x331   :  { %v5256_v30 = vrot.slane %v5171_v21, %v20047_v25  ;;  %v18635_v21 = vpack.c.bf16 %v5642_v18, %v5641_v17 }
 0x333   :  { %v5328_v34 = vsel %vm5327_vm5, %v5256_v30, %v5326_v28  ;;  %18636 = vmatpush3.bf16.msra.mxu0 %v18635_v21 }
 0x334   :  { %v5174_v26 = vpop.xlane.xlu1 %5173  ;;  %17478 = vmatprep.subr.mxu0 %v19050_v12 }
 0x335   :  { %v5260_v32 = vrot.slane %v5174_v26, %v20047_v25  ;;  %v5643_v26 = vld [vmem:[%s21842_s8 + $0x10] sm:$0xf] }
 0x337   :  { %v5330_v36 = vsel %vm5329_vm6, %v5260_v32, %v5328_v34  ;;  %17479 = vmatpush3.msk.msra.mxu0 %vm5705_vm11, %v5643_v26 }
 0x338   :  { %v5177_v24 = vpop.xlane.xlu0 %5176  ;;  %18640 = vmatprep.subr.bf16.mxu0 %v19048_v4 }
 0x339   :  { %v5264_v33 = vrot.slane %v5177_v24, %v20047_v25  ;;  %v18638_v24 = vpack.c.bf16 %v5645_v23, %v5644_v19 }
 0x33b   :  { %v5332_v37 = vsel %vm5331_vm7, %v5264_v33, %v5330_v36  ;;  %18639 = vmatpush3.bf16.msra.mxu1 %v18638_v24  ;;  %v5393_v33 = vld [vmem:[%s21841_s7] sm:$0xff] }
 0x33c   :  { %v5180_v27 = vpop.xlane.xlu0 %5179  ;;  %17487 = vmatprep.subr.mxu1 %v19050_v12  ;;  %v5390_v36 = vld [vmem:[%s21840_s6] sm:$0xf] }
 0x33d   :  { %v5268_v15 = vrot.slane %v5180_v27, %v20047_v25  ;;  %v5646_v27 = vld [vmem:[%s21842_s8 + $0x28] sm:$0xf] }
 0x33f   :  { %v5334_v40 = vsel %vm5333_vm8, %v5268_v15, %v5332_v37  ;;  %17488 = vmatpush3.msk.msra.mxu1 %vm5705_vm11, %v5646_v27  ;;  %v5647_v37 = vld [vmem:[%s21842_s8 + $0x30] sm:$0xff] }
 0x340   :  { %v5183_v3 = vpop.xlane.xlu0 %5182  ;;  %18643 = vmatprep.subr.bf16.mxu1 %v19048_v4 }
 0x341   :  { %v5272_v35 = vrot.slane %v5183_v3, %v20047_v25  ;;  %v5406_v3 = vrot.slane %v5393_v33, %v19193_v20 }
 0x343   :  { %v5336_v41 = vsel %vm5335_vm9, %v5272_v35, %v5334_v40  ;;  %v5414_v28 = vcombine.high %v5406_v3, %v5406_v3  ;;  %v5422_v15 = vrot.slane %v5406_v3, %v19193_v20  ;;  %v5399_v35 = vcombine.high %v5393_v33, %v5393_v33  ;;  %v5648_v40 = vld [vmem:[%s21842_s8 + $0x38] sm:$0xff]  ;;  %v5669_v33 = vld [vmem:[%s21842_s8 + $0xe0] sm:$0xff] }
 0x344   :  { %v5186_v38 = vpop.xlane.xlu0 %5185 }
 0x345   :  { %v5276_v39 = vrot.slane %v5186_v38, %v20047_v25  ;;  %v5436_v34 = vrot.slane %v5414_v28, %v19193_v20  ;;  %v5524_v38 = vrot.slane %v5422_v15, %v19198_v22  ;;  %v5661_v28 = vld [vmem:[%s21842_s8 + $0xa0] sm:$0xf] }
 0x347   :  { %v5338_v42 = vsel %vm5337_vm10, %v5276_v39, %v5336_v41  ;;  %v5528_v39 = vrot.slane %v5436_v34, %v19198_v22  ;;  %v5650_v41 = vld [vmem:[%s21842_s8 + $0x48] sm:$0xff] }
 0x348   :  { %5352 = vxpose.xlu0.b32.start [1/3] (short) (narrow) %v5338_v42, 8  ;;  %v5189_v46 = vpop.xlane.xlu0 %5188  ;;  %v5651_v42 = vld [vmem:[%s21842_s8 + $0x50] sm:$0xff] }
 0x349   :  { %v5280_v49 = vrot.slane %v5189_v46, %v20047_v25  ;;  %v5413_v46 = vrot.slane %v5399_v35, %v19193_v20 }
 0x34a   :  { %v5192_v43 = vpop.xlane.xlu1 %5191 }
 0x34b   :  { %v5284_v48 = vrot.slane %v5192_v43, %v20047_v25 }
 0x34d   :  { %v5339_v54 = vsel %vm5325_vm4, %v5284_v48, %v5280_v49  ;;  %v18641_v49 = vpack.c.bf16 %v5648_v40, %v5647_v37 }
 0x350   :  { %v5195_v44 = vpop.xlane.xlu1 %5194 }
 0x351   :  { %v5288_v50 = vrot.slane %v5195_v44, %v20047_v25  ;;  %v5444_v44 = vcombine.high %v5422_v15, %v5422_v15  ;;  %v5664_v15 = vld [vmem:[%s21842_s8 + $0xb8] sm:$0xf] }
 0x353   :  { %v5340_v56 = vsel %vm5327_vm5, %v5288_v50, %v5339_v54  ;;  %v18644_v50 = vpack.c.bf16 %v5651_v42, %v5650_v41 }
 0x354   :  { %v5198_v45 = vpop.xlane.xlu1 %5197 }
 0x355   :  { %v5292_v51 = vrot.slane %v5198_v45, %v20047_v25  ;;  %v5446_v45 = vcombine.high %v5436_v34, %v5436_v34 }
 0x357   :  { %v5341_v57 = vsel %vm5329_vm6, %v5292_v51, %v5340_v56  ;;  %v5536_v54 = vrot.slane %v5446_v45, %v19198_v22  ;;  %v5654_v56 = vld [vmem:[%s21842_s8 + $0x68] sm:$0xff] }
 0x358   :  { %v5201_v47 = vpop.xlane.xlu1 %5200  ;;  %v5674_v45 = vld [vmem:[%s21842_s8 + $0x108] sm:$0xff] }
 0x359   :  { %v5296_v53 = vrot.slane %v5201_v47, %v20047_v25  ;;  %v19052_v47 = vmov -1.0  }
 0x35b   :  { %v5342_v59 = vsel %vm5331_vm7, %v5296_v53, %v5341_v57  ;;  %v5532_v53 = vrot.slane %v5444_v44, %v19198_v22  ;;  %v5656_v57 = vld [vmem:[%s21842_s8 + $0x78] sm:$0xff] }
 0x35c   :  { %v5204_v52 = vpop.xlane.xlu1 %5203  ;;  %v5672_v44 = vld [vmem:[%s21842_s8 + $0xf8] sm:$0xff] }
 0x35d   :  { %v5300_v55 = vrot.slane %v5204_v52, %v20047_v25 }
 0x35f   :  { %v5343_v61 = vsel %vm5333_vm8, %v5300_v55, %v5342_v59  ;;  %v5653_v55 = vld [vmem:[%s21842_s8 + $0x60] sm:$0xff]  ;;  %v5415_v59 = vcombine.high %v5413_v46, %v5413_v46 }
 0x360   :  { %v5207_v58 = vpop.xlane.xlu0 %5206 }
 0x361   :  { %v5304_v60 = vrot.slane %v5207_v58, %v20047_v25  ;;  %v5657_v58 = vld [vmem:[%s21842_s8 + $0x80] sm:$0xff] }
 0x362   :  { %v5210_v62 = vpop.xlane.xlu1 %5209 }
 0x363   :  { %v5308_v63 = vrot.slane %v5210_v62, %v20047_v25  ;;  %v5344_v0 = vsel %vm5335_vm9, %v5304_v60, %v5343_v61  ;;  %v5649_v60 = vld [vmem:[%s21842_s8 + $0x40] sm:$0xf]  ;;  %v5652_v61 = vld [vmem:[%s21842_s8 + $0x58] sm:$0xf] }
 0x365   :  { %v5345_v1 = vsel %vm5337_vm10, %v5308_v63, %v5344_v0  ;;  %v18647_v0 = vpack.c.bf16 %v5654_v56, %v5653_v55 }
 0x366   :  { %5353 = vxpose.xlu0.b32.cont [2/3] (short) (narrow) %v5345_v1, 8  ;;  %v18650_v1 = vpack.c.bf16 %v5657_v58, %v5656_v57 }
 0x368   :  { %v5213_v5 = vpop.xlane.xlu0 %5212 }
 0x369   :  { %v5312_v7 = vrot.slane %v5213_v5, %v20047_v25  ;;  %v5443_v5 = vrot.slane %v5415_v59, %v19193_v20 }
 0x36a   :  { %v5216_v2 = vpop.xlane.xlu1 %5215 }
 0x36b   :  { %v5316_v6 = vrot.slane %v5216_v2, %v20047_v25  ;;  %v5429_v2 = vrot.slane %v5413_v46, %v19193_v20  ;;  %v5447_v18 = vcombine.high %v5443_v5, %v5443_v5  ;;  %v5675_v46 = vld [vmem:[%s21842_s8 + $0x110] sm:$0xff] }
 0x36c   :  { %v18668_v57 = vpack.c.bf16 %v5675_v46, %v5674_v45  ;;  %v5695_v46 = vld [vmem:[%s21842_s8 + $0x1b0] sm:$0xff] }
 0x36d   :  { %v5346_v10 = vsel %vm5325_vm4, %v5316_v6, %v5312_v7  ;;  %v5540_v6 = vrot.slane %v5429_v2, %v19198_v22  ;;  %v5544_v7 = vrot.slane %v5443_v5, %v19198_v22  ;;  %v5445_v17 = vcombine.high %v5429_v2, %v5429_v2  ;;  %v5676_v2 = vld [vmem:[%s21842_s8 + $0x118] sm:$0xf] }
 0x36f   :  { %v5548_v27 = vrot.slane %v5445_v17, %v19198_v22  ;;  %v5686_v17 = vld [vmem:[%s21842_s8 + $0x168] sm:$0xff] }
 0x370   :  { %v5219_v8 = vpop.xlane.xlu0 %5218 }
 0x371   :  { %v5320_v9 = vrot.slane %v5219_v8, %v20047_v25  ;;  %v5659_v8 = vld [vmem:[%s21842_s8 + $0x90] sm:$0xff] }
 0x372   :  { %v5222_v11 = vpop.xlane.xlu1 %5221 }
 0x373   :  { %v5324_v13 = vrot.slane %v5222_v11, %v20047_v25  ;;  %v5347_v14 = vsel %vm5327_vm5, %v5320_v9, %v5346_v10  ;;  %v5660_v9 = vld [vmem:[%s21842_s8 + $0x98] sm:$0xff]  ;;  %v5662_v10 = vld [vmem:[%s21842_s8 + $0xa8] sm:$0xff]  ;;  %v5663_v11 = vld [vmem:[%s21842_s8 + $0xb0] sm:$0xff] }
 0x374   :  { %v18653_v24 = vpack.c.bf16 %v5660_v9, %v5659_v8  ;;  %v18656_v26 = vpack.c.bf16 %v5663_v11, %v5662_v10 }
 0x375   :  { %v5348_v16 = vsel %vm5329_vm6, %v5324_v13, %v5347_v14  ;;  %v5655_v13 = vld [vmem:[%s21842_s8 + $0x70] sm:$0xf]  ;;  %v5658_v14 = vld [vmem:[%s21842_s8 + $0x88] sm:$0xf] }
 0x376   :  { %5354 = vxpose.xlu0.b32.end [3/3] (short) (narrow) %v5348_v16, 8  ;;  %v5394_v16 = vld [vmem:[%s21841_s7 + $0x8] sm:$0xff] }
 0x377   :  { %v5455_v19 = vrot.slane %v5394_v16, %v19193_v20  ;;  %v5448_v40 = vcombine.high %v5394_v16, %v5394_v16  ;;  %v5684_v16 = vld [vmem:[%s21842_s8 + $0x158] sm:$0xff] }
 0x379   :  { %v5463_v3 = vcombine.high %v5455_v19, %v5455_v19 }
 0x3ee   :  { %v5368_v29 = vpop.trf.xlu0 }
 0x3ef   :  { %v16187_v30 = vmul.f32 -1.442695, %v5368_v29  ;;  %v5552_v29 = vrot.slane %v5447_v18, %v19198_v22  ;;  %v5687_v18 = vld [vmem:[%s21842_s8 + $0x170] sm:$0xff] }
 0x3f1   :  { %19012 = vpow2.f32 %v16187_v30  ;;  %v5665_v30 = vld [vmem:[%s21842_s8 + $0xc0] sm:$0xff] }
 0x3fb   :  { %v19013_v31 = vpop.eup %19012 }
 0x3fc   :  { %v5387_v32 = vadd.f32 1.0, %v19013_v31  ;;  %v5666_v31 = vld [vmem:[%s21842_s8 + $0xc8] sm:$0xff] }
 0x3fe   :  { %19014 = vrcp.f32 %v5387_v32  ;;  %v5668_v32 = vld [vmem:[%s21842_s8 + $0xd8] sm:$0xff] }
 0x3ff   :  { %v18662_v37 = vpack.c.bf16 %v5669_v33, %v5668_v32 }
 0x408   :  { %v19015_v43 = vpop.eup %19014 }
 0x409   :  { %vm5391_vm12 = vcmp.ge.f32.partialorder %v19015_v43, %v5390_v36  ;;  %v18659_v36 = vpack.c.bf16 %v5666_v31, %v5665_v30  ;;  %v5671_v43 = vld [vmem:[%s21842_s8 + $0xf0] sm:$0xff]  ;;  %v18680_v30 = vpack.c.bf16 %v5687_v18, %v5686_v17 }
 0x40a   :  { %v20135_v48 = vsel %vm5391_vm12, 1.0, %v19052_v47  ;;  %v18665_v56 = vpack.c.bf16 %v5672_v44, %v5671_v43  ;;  %v16188_v31 = vld.sshfl [vmem:[%s21841_s7 + $0x10] sm:$0x33 pattern:$0x75316420] }
 0x40b   :  { %v5621_v51 = vmul.f32 %v5524_v38, %v20135_v48  ;;  %v5622_v52 = vmul.f32 %v5528_v39, %v20135_v48  ;;  %v5623_v62 = vmul.f32 %v5532_v53, %v20135_v48  ;;  %v5624_v63 = vmul.f32 %v5536_v54, %v20135_v48 }
 0x40c   :  { %v5625_v21 = vmul.f32 %v5540_v6, %v20135_v48  ;;  %v5626_v23 = vmul.f32 %v5544_v7, %v20135_v48  ;;  %v5627_v34 = vmul.f32 %v5548_v27, %v20135_v48  ;;  %v5628_v35 = vmul.f32 %v5552_v29, %v20135_v48 }
 0x40d   :  { %17481 = vmatmul.mubr.msk.f32.vlgmr.msra.gmra.mrb[60].mxu0 %vm5701_vm13, %v5621_v51  ;;  %17490 = vmatmul.mubr.msk.f32.vlgmr.msra.gmra.mrb[60].mxu1 %vm5701_vm13, %v5622_v52  ;;  %v5471_v38 = vrot.slane %v5455_v19, %v19193_v20  ;;  %v5485_v39 = vrot.slane %v5463_v3, %v19193_v20  ;;  %v5462_v53 = vrot.slane %v5448_v40, %v19193_v20  ;;  %v5679_v19 = vld [vmem:[%s21842_s8 + $0x130] sm:$0xf]  ;;  %v5689_v3 = vld [vmem:[%s21842_s8 + $0x180] sm:$0xff] }
 0x40e   :  { %18642 = vmatpush3.bf16.msra.mxu0 %v18641_v49  ;;  %18645 = vmatpush3.bf16.msra.mxu1 %v18644_v50  ;;  %v5667_v49 = vld [vmem:[%s21842_s8 + $0xd0] sm:$0xf]  ;;  %v5670_v50 = vld [vmem:[%s21842_s8 + $0xe8] sm:$0xf] }
 0x40f   :  { %17496 = vmatprep.subr.mxu0 %v19050_v12  ;;  %17505 = vmatprep.subr.mxu1 %v19050_v12  ;;  %v5556_v41 = vrot.slane %v5471_v38, %v19198_v22  ;;  %v5560_v42 = vrot.slane %v5485_v39, %v19198_v22  ;;  %v5493_v51 = vcombine.high %v5471_v38, %v5471_v38 }
 0x410   :  { %17498 = vmatprep.mubr.msk.f32.mxu0 %vm19049_vm0, %v19050_v12  ;;  %17507 = vmatprep.mubr.msk.f32.mxu1 %vm19049_vm0, %v19050_v12  ;;  %v5495_v52 = vcombine.high %v5485_v39, %v5485_v39  ;;  %v5478_v9 = vrot.slane %v5462_v53, %v19193_v20 }
 0x411   :  { %v5629_v54 = vmul.f32 %v5556_v41, %v20135_v48  ;;  %v5630_v55 = vmul.f32 %v5560_v42, %v20135_v48  ;;  %v5564_v58 = vrot.slane %v5493_v51, %v19198_v22  ;;  %v5511_v42 = vrot.slane %v16188_v31, %v19193_v20  ;;  %v5699_v51 = vld [vmem:[%s21842_s8 + $0x1d0] sm:$0xff] }
 0x412   :  { %17497 = vmatpush3.msk.msra.mxu0 %vm5705_vm11, %v5649_v60  ;;  %17506 = vmatpush3.msk.msra.mxu1 %vm5705_vm11, %v5652_v61  ;;  %v5568_v59 = vrot.slane %v5495_v52, %v19198_v22  ;;  %v5677_v60 = vld [vmem:[%s21842_s8 + $0x120] sm:$0xff]  ;;  %v5678_v61 = vld [vmem:[%s21842_s8 + $0x128] sm:$0xff]  ;;  %v5572_v11 = vrot.slane %v5478_v9, %v19198_v22  ;;  %v5691_v52 = vld [vmem:[%s21842_s8 + $0x190] sm:$0xf] }
 0x413   :  { %17499 = vmatmul.mubr.msk.f32.vlgmr.msra.gmra.mrb[62].mxu0 %vm5701_vm13, %v5623_v62  ;;  %17508 = vmatmul.mubr.msk.f32.vlgmr.msra.gmra.mrb[62].mxu1 %vm5701_vm13, %v5624_v63  ;;  %v5680_v62 = vld [vmem:[%s21842_s8 + $0x138] sm:$0xff]  ;;  %v5681_v63 = vld [vmem:[%s21842_s8 + $0x140] sm:$0xff]  ;;  %v5631_v5 = vmul.f32 %v5564_v58, %v20135_v48  ;;  %v18671_v7 = vpack.c.bf16 %v5678_v61, %v5677_v60  ;;  %v5588_v44 = vrot.slane %v5511_v42, %v19198_v22 }
 0x414   :  { %18646 = vmatprep.subr.bf16.mxu0 %v19048_v4  ;;  %18649 = vmatprep.subr.bf16.mxu1 %v19048_v4  ;;  %v5632_v6 = vmul.f32 %v5568_v59, %v20135_v48  ;;  %v18674_v8 = vpack.c.bf16 %v5681_v63, %v5680_v62  ;;  %v7243_v62 = vld [vmem:[%s21843_s9] sm:$0xff]  ;;  %v7244_v63 = vld [vmem:[%s21843_s9 + $0x8] sm:$0xff] }
 0x415   :  { %18648 = vmatpush3.bf16.msra.mxu0 %v18647_v0  ;;  %18651 = vmatpush3.bf16.msra.mxu1 %v18650_v1  ;;  %v5464_v0 = vcombine.high %v5462_v53, %v5462_v53  ;;  %v5673_v1 = vld [vmem:[%s21842_s8 + $0x100] sm:$0xf]  ;;  %v5694_v53 = vld [vmem:[%s21842_s8 + $0x1a8] sm:$0xf] }
 0x416   :  { %17514 = vmatprep.subr.mxu0 %v19050_v12  ;;  %17523 = vmatprep.subr.mxu1 %v19050_v12 }
 0x417   :  { %17516 = vmatprep.mubr.msk.f32.mxu0 %vm19049_vm0, %v19050_v12  ;;  %17525 = vmatprep.mubr.msk.f32.mxu1 %vm19049_vm0, %v19050_v12  ;;  %v5492_v10 = vrot.slane %v5464_v0, %v19193_v20  ;;  %v5697_v0 = vld [vmem:[%s21842_s8 + $0x1c0] sm:$0xf] }
 0x419   :  { %17515 = vmatpush3.msk.msra.mxu0 %vm5705_vm11, %v5655_v13  ;;  %17524 = vmatpush3.msk.msra.mxu1 %vm5705_vm11, %v5658_v14  ;;  %v5576_v13 = vrot.slane %v5492_v10, %v19198_v22  ;;  %v5683_v14 = vld [vmem:[%s21842_s8 + $0x150] sm:$0xff] }
 0x41a   :  { %17517 = vmatmul.mubr.msk.f32.vlgmr.msra.gmra.mrb[64].mxu0 %vm5701_vm13, %v5625_v21  ;;  %17526 = vmatmul.mubr.msk.f32.vlgmr.msra.gmra.mrb[64].mxu1 %vm5701_vm13, %v5626_v23  ;;  %v5682_v21 = vld [vmem:[%s21842_s8 + $0x148] sm:$0xf]  ;;  %v5494_v23 = vcombine.high %v5478_v9, %v5478_v9  ;;  %v18677_v29 = vpack.c.bf16 %v5684_v16, %v5683_v14  ;;  %v7247_v9 = vld [vmem:[%s21843_s9 + $0x20] sm:$0xff] }
 0x41b   :  { %18652 = vmatprep.subr.bf16.mxu0 %v19048_v4  ;;  %18655 = vmatprep.subr.bf16.mxu1 %v19048_v4  ;;  %v5634_v27 = vmul.f32 %v5576_v13, %v20135_v48  ;;  %v7250_v13 = vld [vmem:[%s21843_s9 + $0x38] sm:$0xff] }
 0x41c   :  { %18654 = vmatpush3.bf16.msra.mxu0 %v18653_v24  ;;  %18657 = vmatpush3.bf16.msra.mxu1 %v18656_v26  ;;  %v5496_v24 = vcombine.high %v5492_v10, %v5492_v10  ;;  %v5633_v26 = vmul.f32 %v5572_v11, %v20135_v48  ;;  %v5580_v32 = vrot.slane %v5494_v23, %v19198_v22  ;;  %v7248_v10 = vld [vmem:[%s21843_s9 + $0x28] sm:$0xff]  ;;  %v7249_v11 = vld [vmem:[%s21843_s9 + $0x30] sm:$0xff] }
 0x41d   :  { %17532 = vmatprep.subr.mxu0 %v19050_v12  ;;  %17541 = vmatprep.subr.mxu1 %v19050_v12  ;;  %v18701_v17 = vpack.c.bf16 %v7248_v10, %v7247_v9  ;;  %v18704_v18 = vpack.c.bf16 %v7250_v13, %v7249_v11  ;;  %v7267_v11 = vld [vmem:[%s21843_s9 + $0xc0] sm:$0xff]  ;;  %v7268_v13 = vld [vmem:[%s21843_s9 + $0xc8] sm:$0xff] }
 0x41e   :  { %17534 = vmatprep.mubr.msk.f32.mxu0 %vm19049_vm0, %v19050_v12  ;;  %17543 = vmatprep.mubr.msk.f32.mxu1 %vm19049_vm0, %v19050_v12  ;;  %v5584_v33 = vrot.slane %v5496_v24, %v19198_v22  ;;  %v5635_v38 = vmul.f32 %v5580_v32, %v20135_v48 }
 0x420   :  { %17533 = vmatpush3.msk.msra.mxu0 %vm5705_vm11, %v5661_v28  ;;  %17542 = vmatpush3.msk.msra.mxu1 %vm5705_vm11, %v5664_v15  ;;  %v5690_v28 = vld [vmem:[%s21842_s8 + $0x188] sm:$0xff]  ;;  %v5692_v15 = vld [vmem:[%s21842_s8 + $0x198] sm:$0xff]  ;;  %v5636_v39 = vmul.f32 %v5584_v33, %v20135_v48 }
 0x421   :  { %17535 = vmatmul.mubr.msk.f32.vlgmr.msra.gmra.mrb[66].mxu0 %vm5701_vm13, %v5627_v34  ;;  %17544 = vmatmul.mubr.msk.f32.vlgmr.msra.gmra.mrb[66].mxu1 %vm5701_vm13, %v5628_v35  ;;  %v5693_v34 = vld [vmem:[%s21842_s8 + $0x1a0] sm:$0xff]  ;;  %v5504_v35 = vcombine.high %v16188_v31, %v16188_v31  ;;  %v18683_v40 = vpack.c.bf16 %v5690_v28, %v5689_v3 }
 0x422   :  { %18658 = vmatprep.subr.bf16.mxu0 %v19048_v4  ;;  %18661 = vmatprep.subr.bf16.mxu1 %v19048_v4  ;;  %v18686_v41 = vpack.c.bf16 %v5693_v34, %v5692_v15 }
 0x423   :  { %18660 = vmatpush3.bf16.msra.mxu0 %v18659_v36  ;;  %18663 = vmatpush3.bf16.msra.mxu1 %v18662_v37  ;;  %v5685_v36 = vld [vmem:[%s21842_s8 + $0x160] sm:$0xf]  ;;  %v5688_v37 = vld [vmem:[%s21842_s8 + $0x178] sm:$0xf]  ;;  %v5518_v43 = vrot.slane %v5504_v35, %v19193_v20 }
 0x424   :  { %17550 = vmatprep.subr.mxu0 %v19050_v12  ;;  %17559 = vmatprep.subr.mxu1 %v19050_v12 }
 0x425   :  { %17552 = vmatprep.mubr.msk.f32.mxu0 %vm19049_vm0, %v19050_v12  ;;  %17561 = vmatprep.mubr.msk.f32.mxu1 %vm19049_vm0, %v19050_v12  ;;  %v5592_v45 = vrot.slane %v5518_v43, %v19198_v22 }
 0x427   :  { %17551 = vmatpush3.msk.msra.mxu0 %vm5705_vm11, %v5667_v49  ;;  %17560 = vmatpush3.msk.msra.mxu1 %vm5705_vm11, %v5670_v50  ;;  %v5696_v49 = vld [vmem:[%s21842_s8 + $0x1b8] sm:$0xff]  ;;  %v5698_v50 = vld [vmem:[%s21842_s8 + $0x1c8] sm:$0xff] }
 0x428   :  { %17553 = vmatmul.mubr.msk.f32.vlgmr.msra.gmra.mrb[68].mxu0 %vm5701_vm13, %v5629_v54  ;;  %17562 = vmatmul.mubr.msk.f32.vlgmr.msra.gmra.mrb[68].mxu1 %vm5701_vm13, %v5630_v55  ;;  %v5519_v54 = vcombine.high %v5511_v42, %v5511_v42  ;;  %v5520_v55 = vcombine.high %v5518_v43, %v5518_v43  ;;  %v18689_v58 = vpack.c.bf16 %v5696_v49, %v5695_v46 }
 0x429   :  { %18664 = vmatprep.subr.bf16.mxu0 %v19048_v4  ;;  %18667 = vmatprep.subr.bf16.mxu1 %v19048_v4  ;;  %v18692_v59 = vpack.c.bf16 %v5699_v51, %v5698_v50  ;;  %v7259_v50 = vld [vmem:[%s21843_s9 + $0x80] sm:$0xff]  ;;  %v7260_v51 = vld [vmem:[%s21843_s9 + $0x88] sm:$0xff] }
 0x42a   :  { %18666 = vmatpush3.bf16.msra.mxu0 %v18665_v56  ;;  %18669 = vmatpush3.bf16.msra.mxu1 %v18668_v57  ;;  %v5637_v56 = vmul.f32 %v5588_v44, %v20135_v48  ;;  %v5638_v57 = vmul.f32 %v5592_v45, %v20135_v48  ;;  %v5596_v60 = vrot.slane %v5519_v54, %v19198_v22 }
 0x42b   :  { %17568 = vmatprep.subr.mxu0 %v19050_v12  ;;  %17577 = vmatprep.subr.mxu1 %v19050_v12  ;;  %v5600_v61 = vrot.slane %v5520_v55, %v19198_v22 }
 0x42c   :  { %17570 = vmatprep.mubr.msk.f32.mxu0 %vm19049_vm0, %v19050_v12  ;;  %17579 = vmatprep.mubr.msk.f32.mxu1 %vm19049_vm0, %v19050_v12 }
 0x42e   :  { %17569 = vmatpush3.msk.msra.mxu0 %vm5705_vm11, %v5673_v1  ;;  %17578 = vmatpush3.msk.msra.mxu1 %vm5705_vm11, %v5676_v2  ;;  %v5700_v1 = vld [vmem:[%s21842_s8 + $0x1d8] sm:$0xf]  ;;  %v5639_v2 = vmul.f32 %v5596_v60, %v20135_v48 }
 0x42f   :  { %17571 = vmatmul.mubr.msk.f32.vlgmr.msra.gmra.mrb[70].mxu0 %vm5701_vm13, %v5631_v5  ;;  %17580 = vmatmul.mubr.msk.f32.vlgmr.msra.gmra.mrb[70].mxu1 %vm5701_vm13, %v5632_v6  ;;  %v5640_v5 = vmul.f32 %v5600_v61, %v20135_v48  ;;  %v18695_v6 = vpack.c.bf16 %v7244_v63, %v7243_v62  ;;  %v7245_v48 = vld [vmem:[%s21843_s9 + $0x10] sm:$0xff]  ;;  %v7263_v62 = vld [vmem:[%s21843_s9 + $0xa0] sm:$0xff]  ;;  %v7264_v63 = vld [vmem:[%s21843_s9 + $0xa8] sm:$0xff] }
 0x430   :  { %18670 = vmatprep.subr.bf16.mxu0 %v19048_v4  ;;  %18673 = vmatprep.subr.bf16.mxu1 %v19048_v4 }
 0x431   :  { %18672 = vmatpush3.bf16.msra.mxu0 %v18671_v7  ;;  %18675 = vmatpush3.bf16.msra.mxu1 %v18674_v8  ;;  %v7246_v7 = vld [vmem:[%s21843_s9 + $0x18] sm:$0xff] }
 0x432   :  { %17586 = vmatprep.subr.mxu0 %v19050_v12  ;;  %17595 = vmatprep.subr.mxu1 %v19050_v12  ;;  %v18698_v8 = vpack.c.bf16 %v7246_v7, %v7245_v48 }
 0x433   :  { %17588 = vmatprep.mubr.msk.f32.mxu0 %vm19049_vm0, %v19050_v12  ;;  %17597 = vmatprep.mubr.msk.f32.mxu1 %vm19049_vm0, %v19050_v12 }
 0x435   :  { %17587 = vmatpush3.msk.msra.mxu0 %vm5705_vm11, %v5679_v19  ;;  %17596 = vmatpush3.msk.msra.mxu1 %vm5705_vm11, %v5682_v21 }
 0x436   :  { %17589 = vmatmul.mubr.msk.f32.vlgmr.msra.gmra.mrb[72].mxu0 %vm5701_vm13, %v5633_v26  ;;  %17598 = vmatmul.mubr.msk.f32.vlgmr.msra.gmra.mrb[72].mxu1 %vm5701_vm13, %v5634_v27  ;;  %v7251_v26 = vld [vmem:[%s21843_s9 + $0x40] sm:$0xff]  ;;  %v7252_v27 = vld [vmem:[%s21843_s9 + $0x48] sm:$0xff] }
 0x437   :  { %18676 = vmatprep.subr.bf16.mxu0 %v19048_v4  ;;  %18679 = vmatprep.subr.bf16.mxu1 %v19048_v4  ;;  %v18707_v33 = vpack.c.bf16 %v7252_v27, %v7251_v26 }
 0x438   :  { %18678 = vmatpush3.bf16.msra.mxu0 %v18677_v29  ;;  %18681 = vmatpush3.bf16.msra.mxu1 %v18680_v30  ;;  %v7253_v29 = vld [vmem:[%s21843_s9 + $0x50] sm:$0xff]  ;;  %v7254_v30 = vld [vmem:[%s21843_s9 + $0x58] sm:$0xff] }
 0x439   :  { %17604 = vmatprep.subr.mxu0 %v19050_v12  ;;  %17613 = vmatprep.subr.mxu1 %v19050_v12  ;;  %v18710_v3 = vpack.c.bf16 %v7254_v30, %v7253_v29  ;;  %v7271_v29 = vld [vmem:[%s21843_s9 + $0xe0] sm:$0xff]  ;;  %v7272_v30 = vld [vmem:[%s21843_s9 + $0xe8] sm:$0xff] }
 0x43a   :  { %17606 = vmatprep.mubr.msk.f32.mxu0 %vm19049_vm0, %v19050_v12  ;;  %17615 = vmatprep.mubr.msk.f32.mxu1 %vm19049_vm0, %v19050_v12 }
 0x43c   :  { %17605 = vmatpush3.msk.msra.mxu0 %vm5705_vm11, %v5685_v36  ;;  %17614 = vmatpush3.msk.msra.mxu1 %vm5705_vm11, %v5688_v37  ;;  %v7255_v36 = vld [vmem:[%s21843_s9 + $0x60] sm:$0xff]  ;;  %v7256_v37 = vld [vmem:[%s21843_s9 + $0x68] sm:$0xff] }
 0x43d   :  { %17607 = vmatmul.mubr.msk.f32.vlgmr.msra.gmra.mrb[74].mxu0 %vm5701_vm13, %v5635_v38  ;;  %17616 = vmatmul.mubr.msk.f32.vlgmr.msra.gmra.mrb[74].mxu1 %vm5701_vm13, %v5636_v39  ;;  %v7257_v38 = vld [vmem:[%s21843_s9 + $0x70] sm:$0xff]  ;;  %v7258_v39 = vld [vmem:[%s21843_s9 + $0x78] sm:$0xff]  ;;  %v18713_v42 = vpack.c.bf16 %v7256_v37, %v7255_v36 }
 0x43e   :  { %18682 = vmatprep.subr.bf16.mxu0 %v19048_v4  ;;  %18685 = vmatprep.subr.bf16.mxu1 %v19048_v4  ;;  %v18716_v43 = vpack.c.bf16 %v7258_v39, %v7257_v38  ;;  %v7275_v38 = vld [vmem:[%s21843_s9 + $0x100] sm:$0xff]  ;;  %v7276_v39 = vld [vmem:[%s21843_s9 + $0x108] sm:$0xff] }
 0x43f   :  { %18684 = vmatpush3.bf16.msra.mxu0 %v18683_v40  ;;  %18687 = vmatpush3.bf16.msra.mxu1 %v18686_v41 }
 0x440   :  { %17622 = vmatprep.subr.mxu0 %v19050_v12  ;;  %17631 = vmatprep.subr.mxu1 %v19050_v12 }
 0x441   :  { %17624 = vmatprep.mubr.msk.f32.mxu0 %vm19049_vm0, %v19050_v12  ;;  %17633 = vmatprep.mubr.msk.f32.mxu1 %vm19049_vm0, %v19050_v12 }
 0x443   :  { %17623 = vmatpush3.msk.msra.mxu0 %vm5705_vm11, %v5691_v52  ;;  %17632 = vmatpush3.msk.msra.mxu1 %vm5705_vm11, %v5694_v53  ;;  %v7261_v52 = vld [vmem:[%s21843_s9 + $0x90] sm:$0xff]  ;;  %v7262_v53 = vld [vmem:[%s21843_s9 + $0x98] sm:$0xff] }
 0x444   :  { %17625 = vmatmul.mubr.msk.f32.vlgmr.msra.gmra.mrb[76].mxu0 %vm5701_vm13, %v5637_v56  ;;  %17634 = vmatmul.mubr.msk.f32.vlgmr.msra.gmra.mrb[76].mxu1 %vm5701_vm13, %v5638_v57  ;;  %v18719_v56 = vpack.c.bf16 %v7260_v51, %v7259_v50  ;;  %v18722_v57 = vpack.c.bf16 %v7262_v53, %v7261_v52  ;;  %v7279_v52 = vld [vmem:[%s21843_s9 + $0x120] sm:$0xff]  ;;  %v7280_v53 = vld [vmem:[%s21843_s9 + $0x128] sm:$0xff] }
 0x445   :  { %18688 = vmatprep.subr.bf16.mxu0 %v19048_v4  ;;  %18691 = vmatprep.subr.bf16.mxu1 %v19048_v4 }
 0x446   :  { %18690 = vmatpush3.bf16.msra.mxu0 %v18689_v58  ;;  %18693 = vmatpush3.bf16.msra.mxu1 %v18692_v59 }
 0x447   :  { %17640 = vmatprep.subr.mxu0 %v19050_v12  ;;  %17649 = vmatprep.subr.mxu1 %v19050_v12 }
 0x448   :  { %17642 = vmatprep.mubr.msk.f32.mxu0 %vm19049_vm0, %v19050_v12  ;;  %17651 = vmatprep.mubr.msk.f32.mxu1 %vm19049_vm0, %v19050_v12 }
 0x44a   :  { %17641 = vmatpush3.msk.msra.mxu0 %vm5705_vm11, %v5697_v0  ;;  %17650 = vmatpush3.msk.msra.mxu1 %vm5705_vm11, %v5700_v1  ;;  %v7265_v0 = vld [vmem:[%s21843_s9 + $0xb0] sm:$0xff]  ;;  %v7266_v1 = vld [vmem:[%s21843_s9 + $0xb8] sm:$0xff] }
 0x44b   :  { %17643 = vmatmul.mubr.msk.f32.vlgmr.msra.gmra.mrb[78].mxu0 %vm5701_vm13, %v5639_v2  ;;  %17652 = vmatmul.mubr.msk.f32.vlgmr.msra.gmra.mrb[78].mxu1 %vm5701_vm13, %v5640_v5  ;;  %v18728_v48 = vpack.c.bf16 %v7266_v1, %v7265_v0  ;;  %v8763_v0 = vld [vmem:[%s21844_s10] sm:$0xff]  ;;  %v8764_v1 = vld [vmem:[%s21844_s10 + $0x8] sm:$0xff] }
 0x44c   :  { %18694 = vmatprep.subr.bf16.mxu0 %v19048_v4  ;;  %18697 = vmatprep.subr.bf16.mxu1 %v19048_v4 }
 0x44d   :  { %18696 = vmatpush3.bf16.msra.mxu0 %v18695_v6  ;;  %17658 = vmatprep.mubr.msk.f32.mxu0 %vm19049_vm0, %v19050_v12  ;;  %v18725_v6 = vpack.c.bf16 %v7264_v63, %v7263_v62 }
 0x44e   :  { %17665 = vmatprep.mubr.msk.f32.mxu1 %vm19049_vm0, %v19050_v12  ;;  %18700 = vmatprep.subr.bf16.mxu0 %v19048_v4 }
 0x44f   :  { %18699 = vmatpush3.bf16.msra.mxu1 %v18698_v8 }
 0x450   :  { %18703 = vmatprep.subr.bf16.mxu1 %v19048_v4 }
 0x4e0   :  { %v5775_v14 = vpop.f32.mrb[60].mxu0  ;;  %v5851_v16 = vpop.f32.mrb[60].mxu1 }
 0x4e1   :  { %v7223_v19 = vmax.f32 %v5775_v14, 0.0  ;;  %v7224_v21 = vmax.f32 %v5851_v16, 0.0  ;;  %v17482_v23 = vpop.f32.mrb[61].mxu0  ;;  %v17491_v24 = vpop.f32.mrb[61].mxu1  ;;  %v7269_v14 = vld [vmem:[%s21843_s9 + $0xd0] sm:$0xff]  ;;  %v7270_v16 = vld [vmem:[%s21843_s9 + $0xd8] sm:$0xff] }
 0x4e3   :  { %17659 = vmatmul.mubr.msk.f32.vlgmr.msra.gmra.mrb[80].mxu0 %vm1913_vm2, %v7223_v19  ;;  %17666 = vmatmul.mubr.msk.f32.vlgmr.msra.gmra.mrb[80].mxu1 %vm1913_vm2, %v7224_v21  ;;  %v18731_v19 = vpack.c.bf16 %v7268_v13, %v7267_v11  ;;  %v18734_v21 = vpack.c.bf16 %v7270_v16, %v7269_v14  ;;  %v8766_v11 = vld [vmem:[%s21844_s10 + $0x18] sm:$0xff]  ;;  %v8767_v14 = vld [vmem:[%s21844_s10 + $0x20] sm:$0xff]  ;;  %v8768_v16 = vld [vmem:[%s21844_s10 + $0x28] sm:$0xff] }
 0x4e4   :  { %18702 = vmatpush3.bf16.msra.mxu0 %v18701_v17  ;;  %18705 = vmatpush3.bf16.msra.mxu1 %v18704_v18 }
 0x4e5   :  { %17672 = vmatprep.mubr.msk.f32.mxu0 %vm19049_vm0, %v19050_v12  ;;  %17679 = vmatprep.mubr.msk.f32.mxu1 %vm19049_vm0, %v19050_v12 }
 0x4e6   :  { %v5927_v31 = vpop.f32.mrb[62].mxu0  ;;  %v6003_v32 = vpop.f32.mrb[62].mxu1  ;;  %18706 = vmatprep.subr.bf16.mxu0 %v19048_v4  ;;  %18709 = vmatprep.subr.bf16.mxu1 %v19048_v4 }
 0x4e7   :  { %v7225_v28 = vmax.f32 %v5927_v31, 0.0  ;;  %v7226_v15 = vmax.f32 %v6003_v32, 0.0  ;;  %v17500_v34 = vpop.f32.mrb[63].mxu0  ;;  %v17509_v35 = vpop.f32.mrb[63].mxu1  ;;  %v7273_v31 = vld [vmem:[%s21843_s9 + $0xf0] sm:$0xff]  ;;  %v7274_v32 = vld [vmem:[%s21843_s9 + $0xf8] sm:$0xff] }
 0x4e9   :  { %17673 = vmatmul.mubr.msk.f32.vlgmr.msra.gmra.mrb[82].mxu0 %vm1913_vm2, %v7225_v28  ;;  %17680 = vmatmul.mubr.msk.f32.vlgmr.msra.gmra.mrb[82].mxu1 %vm1913_vm2, %v7226_v15  ;;  %v18737_v28 = vpack.c.bf16 %v7272_v30, %v7271_v29  ;;  %v18740_v15 = vpack.c.bf16 %v7274_v32, %v7273_v31  ;;  %v8771_v31 = vld [vmem:[%s21844_s10 + $0x40] sm:$0xff]  ;;  %v8772_v32 = vld [vmem:[%s21844_s10 + $0x48] sm:$0xff] }
 0x4ea   :  { %18708 = vmatpush3.bf16.msra.mxu0 %v18707_v33  ;;  %18711 = vmatpush3.bf16.msra.mxu1 %v18710_v3 }
 0x4eb   :  { %17686 = vmatprep.mubr.msk.f32.mxu0 %vm19049_vm0, %v19050_v12  ;;  %17693 = vmatprep.mubr.msk.f32.mxu1 %vm19049_vm0, %v19050_v12 }
 0x4ec   :  { %18712 = vmatprep.subr.bf16.mxu0 %v19048_v4  ;;  %18715 = vmatprep.subr.bf16.mxu1 %v19048_v4 }
 0x4ed   :  { %v6079_v40 = vpop.f32.mrb[64].mxu0  ;;  %v6155_v41 = vpop.f32.mrb[64].mxu1 }
 0x4ee   :  { %v7227_v44 = vmax.f32 %v6079_v40, 0.0  ;;  %v7228_v45 = vmax.f32 %v6155_v41, 0.0  ;;  %v17518_v46 = vpop.f32.mrb[65].mxu0  ;;  %v17527_v49 = vpop.f32.mrb[65].mxu1  ;;  %v7277_v40 = vld [vmem:[%s21843_s9 + $0x110] sm:$0xff]  ;;  %v7278_v41 = vld [vmem:[%s21843_s9 + $0x118] sm:$0xff] }
 0x4f0   :  { %17687 = vmatmul.mubr.msk.f32.vlgmr.msra.gmra.mrb[84].mxu0 %vm1913_vm2, %v7227_v44  ;;  %17694 = vmatmul.mubr.msk.f32.vlgmr.msra.gmra.mrb[84].mxu1 %vm1913_vm2, %v7228_v45  ;;  %v18743_v44 = vpack.c.bf16 %v7276_v39, %v7275_v38  ;;  %v18746_v45 = vpack.c.bf16 %v7278_v41, %v7277_v40  ;;  %v8775_v40 = vld [vmem:[%s21844_s10 + $0x60] sm:$0xff]  ;;  %v8776_v41 = vld [vmem:[%s21844_s10 + $0x68] sm:$0xff] }
 0x4f1   :  { %18714 = vmatpush3.bf16.msra.mxu0 %v18713_v42  ;;  %18717 = vmatpush3.bf16.msra.mxu1 %v18716_v43 }
 0x4f2   :  { %17700 = vmatprep.mubr.msk.f32.mxu0 %vm19049_vm0, %v19050_v12  ;;  %17707 = vmatprep.mubr.msk.f32.mxu1 %vm19049_vm0, %v19050_v12 }
 0x4f3   :  { %18718 = vmatprep.subr.bf16.mxu0 %v19048_v4  ;;  %18721 = vmatprep.subr.bf16.mxu1 %v19048_v4 }
 0x4f4   :  { %v6231_v54 = vpop.f32.mrb[66].mxu0  ;;  %v6307_v55 = vpop.f32.mrb[66].mxu1 }
 0x4f5   :  { %v7229_v58 = vmax.f32 %v6231_v54, 0.0  ;;  %v7230_v59 = vmax.f32 %v6307_v55, 0.0  ;;  %v17536_v60 = vpop.f32.mrb[67].mxu0  ;;  %v17545_v61 = vpop.f32.mrb[67].mxu1  ;;  %v7281_v54 = vld [vmem:[%s21843_s9 + $0x130] sm:$0xff]  ;;  %v7282_v55 = vld [vmem:[%s21843_s9 + $0x138] sm:$0xff] }
 0x4f7   :  { %17701 = vmatmul.mubr.msk.f32.vlgmr.msra.gmra.mrb[86].mxu0 %vm1913_vm2, %v7229_v58  ;;  %17708 = vmatmul.mubr.msk.f32.vlgmr.msra.gmra.mrb[86].mxu1 %vm1913_vm2, %v7230_v59  ;;  %v18749_v58 = vpack.c.bf16 %v7280_v53, %v7279_v52  ;;  %v18752_v59 = vpack.c.bf16 %v7282_v55, %v7281_v54  ;;  %v8779_v54 = vld [vmem:[%s21844_s10 + $0x80] sm:$0xff]  ;;  %v8780_v55 = vld [vmem:[%s21844_s10 + $0x88] sm:$0xff] }
 0x4f8   :  { %18720 = vmatpush3.bf16.msra.mxu0 %v18719_v56  ;;  %18723 = vmatpush3.bf16.msra.mxu1 %v18722_v57 }
 0x4f9   :  { %17714 = vmatprep.mubr.msk.f32.mxu0 %vm19049_vm0, %v19050_v12  ;;  %17721 = vmatprep.mubr.msk.f32.mxu1 %vm19049_vm0, %v19050_v12 }
 0x4fa   :  { %18724 = vmatprep.subr.bf16.mxu0 %v19048_v4  ;;  %18727 = vmatprep.subr.bf16.mxu1 %v19048_v4 }
 0x4fb   :  { %v6383_v2 = vpop.f32.mrb[68].mxu0  ;;  %v6459_v5 = vpop.f32.mrb[68].mxu1 }
 0x4fc   :  { %v7231_v7 = vmax.f32 %v6383_v2, 0.0  ;;  %v7232_v8 = vmax.f32 %v6459_v5, 0.0  ;;  %v17554_v9 = vpop.f32.mrb[69].mxu0  ;;  %v17563_v10 = vpop.f32.mrb[69].mxu1 }
 0x4fd   :  { %v8765_v10 = vld [vmem:[%s21844_s10 + $0x10] sm:$0xff] }
 0x4fe   :  { %17715 = vmatmul.mubr.msk.f32.vlgmr.msra.gmra.mrb[88].mxu0 %vm1913_vm2, %v7231_v7  ;;  %17722 = vmatmul.mubr.msk.f32.vlgmr.msra.gmra.mrb[88].mxu1 %vm1913_vm2, %v7232_v8  ;;  %v18758_v13 = vpack.c.bf16 %v8766_v11, %v8765_v10 }
 0x4ff   :  { %18726 = vmatpush3.bf16.msra.mxu0 %v18725_v6  ;;  %18729 = vmatpush3.bf16.msra.mxu1 %v18728_v48  ;;  %v18755_v6 = vpack.c.bf16 %v8764_v1, %v8763_v0 }
 0x500   :  { %17728 = vmatprep.mubr.msk.f32.mxu0 %vm19049_vm0, %v19050_v12  ;;  %17735 = vmatprep.mubr.msk.f32.mxu1 %vm19049_vm0, %v19050_v12 }
 0x501   :  { %18730 = vmatprep.subr.bf16.mxu0 %v19048_v4  ;;  %18733 = vmatprep.subr.bf16.mxu1 %v19048_v4 }
 0x502   :  { %v6535_v17 = vpop.f32.mrb[70].mxu0  ;;  %v6611_v18 = vpop.f32.mrb[70].mxu1 }
 0x503   :  { %v7233_v23 = vmax.f32 %v6535_v17, 0.0  ;;  %v7234_v24 = vmax.f32 %v6611_v18, 0.0  ;;  %v17572_v26 = vpop.f32.mrb[71].mxu0  ;;  %v17581_v27 = vpop.f32.mrb[71].mxu1  ;;  %v8769_v17 = vld [vmem:[%s21844_s10 + $0x30] sm:$0xff]  ;;  %v8770_v18 = vld [vmem:[%s21844_s10 + $0x38] sm:$0xff] }
 0x505   :  { %17729 = vmatmul.mubr.msk.f32.vlgmr.msra.gmra.mrb[90].mxu0 %vm1913_vm2, %v7233_v23  ;;  %17736 = vmatmul.mubr.msk.f32.vlgmr.msra.gmra.mrb[90].mxu1 %vm1913_vm2, %v7234_v24  ;;  %v18761_v23 = vpack.c.bf16 %v8768_v16, %v8767_v14  ;;  %v18764_v24 = vpack.c.bf16 %v8770_v18, %v8769_v17  ;;  %v8787_v17 = vld [vmem:[%s21844_s10 + $0xc0] sm:$0xff]  ;;  %v8788_v18 = vld [vmem:[%s21844_s10 + $0xc8] sm:$0xff] }
 0x506   :  { %18732 = vmatpush3.bf16.msra.mxu0 %v18731_v19  ;;  %18735 = vmatpush3.bf16.msra.mxu1 %v18734_v21 }
 0x507   :  { %17742 = vmatprep.mubr.msk.f32.mxu0 %vm19049_vm0, %v19050_v12  ;;  %17749 = vmatprep.mubr.msk.f32.mxu1 %vm19049_vm0, %v19050_v12 }
 0x508   :  { %18736 = vmatprep.subr.bf16.mxu0 %v19048_v4  ;;  %18739 = vmatprep.subr.bf16.mxu1 %v19048_v4 }
 0x509   :  { %v6687_v33 = vpop.f32.mrb[72].mxu0  ;;  %v6763_v3 = vpop.f32.mrb[72].mxu1 }
 0x50a   :  { %v7235_v34 = vmax.f32 %v6687_v33, 0.0  ;;  %v7236_v35 = vmax.f32 %v6763_v3, 0.0  ;;  %v17590_v36 = vpop.f32.mrb[73].mxu0  ;;  %v17599_v37 = vpop.f32.mrb[73].mxu1  ;;  %v8773_v33 = vld [vmem:[%s21844_s10 + $0x50] sm:$0xff]  ;;  %v8774_v3 = vld [vmem:[%s21844_s10 + $0x58] sm:$0xff] }
 0x50c   :  { %17743 = vmatmul.mubr.msk.f32.vlgmr.msra.gmra.mrb[92].mxu0 %vm1913_vm2, %v7235_v34  ;;  %17750 = vmatmul.mubr.msk.f32.vlgmr.msra.gmra.mrb[92].mxu1 %vm1913_vm2, %v7236_v35  ;;  %v18767_v34 = vpack.c.bf16 %v8772_v32, %v8771_v31  ;;  %v18770_v35 = vpack.c.bf16 %v8774_v3, %v8773_v33  ;;  %v8791_v33 = vld [vmem:[%s21844_s10 + $0xe0] sm:$0xff]  ;;  %v8792_v3 = vld [vmem:[%s21844_s10 + $0xe8] sm:$0xff] }
 0x50d   :  { %18738 = vmatpush3.bf16.msra.mxu0 %v18737_v28  ;;  %18741 = vmatpush3.bf16.msra.mxu1 %v18740_v15 }
 0x50e   :  { %17756 = vmatprep.mubr.msk.f32.mxu0 %vm19049_vm0, %v19050_v12  ;;  %17763 = vmatprep.mubr.msk.f32.mxu1 %vm19049_vm0, %v19050_v12 }
 0x50f   :  { %18742 = vmatprep.subr.bf16.mxu0 %v19048_v4  ;;  %18745 = vmatprep.subr.bf16.mxu1 %v19048_v4 }
 0x510   :  { %v6839_v42 = vpop.f32.mrb[74].mxu0  ;;  %v6915_v43 = vpop.f32.mrb[74].mxu1 }
 0x511   :  { %v7237_v46 = vmax.f32 %v6839_v42, 0.0  ;;  %v7238_v49 = vmax.f32 %v6915_v43, 0.0  ;;  %v17608_v50 = vpop.f32.mrb[75].mxu0  ;;  %v17617_v51 = vpop.f32.mrb[75].mxu1  ;;  %v8777_v42 = vld [vmem:[%s21844_s10 + $0x70] sm:$0xff]  ;;  %v8778_v43 = vld [vmem:[%s21844_s10 + $0x78] sm:$0xff] }
 0x513   :  { %17757 = vmatmul.mubr.msk.f32.vlgmr.msra.gmra.mrb[94].mxu0 %vm1913_vm2, %v7237_v46  ;;  %17764 = vmatmul.mubr.msk.f32.vlgmr.msra.gmra.mrb[94].mxu1 %vm1913_vm2, %v7238_v49  ;;  %v18773_v46 = vpack.c.bf16 %v8776_v41, %v8775_v40  ;;  %v18776_v49 = vpack.c.bf16 %v8778_v43, %v8777_v42  ;;  %v8795_v42 = vld [vmem:[%s21844_s10 + $0x100] sm:$0xff]  ;;  %v8796_v43 = vld [vmem:[%s21844_s10 + $0x108] sm:$0xff] }
 0x514   :  { %18744 = vmatpush3.bf16.msra.mxu0 %v18743_v44  ;;  %18747 = vmatpush3.bf16.msra.mxu1 %v18746_v45 }
 0x515   :  { %17770 = vmatprep.mubr.msk.f32.mxu0 %vm19049_vm0, %v19050_v12  ;;  %17777 = vmatprep.mubr.msk.f32.mxu1 %vm19049_vm0, %v19050_v12 }
 0x516   :  { %18748 = vmatprep.subr.bf16.mxu0 %v19048_v4  ;;  %18751 = vmatprep.subr.bf16.mxu1 %v19048_v4 }
 0x517   :  { %v6991_v56 = vpop.f32.mrb[76].mxu0  ;;  %v7067_v57 = vpop.f32.mrb[76].mxu1 }
 0x518   :  { %v7239_v60 = vmax.f32 %v6991_v56, 0.0  ;;  %v7240_v61 = vmax.f32 %v7067_v57, 0.0  ;;  %v17626_v62 = vpop.f32.mrb[77].mxu0  ;;  %v17635_v63 = vpop.f32.mrb[77].mxu1  ;;  %v8781_v56 = vld [vmem:[%s21844_s10 + $0x90] sm:$0xff]  ;;  %v8782_v57 = vld [vmem:[%s21844_s10 + $0x98] sm:$0xff] }
 0x51a   :  { %17771 = vmatmul.mubr.msk.f32.vlgmr.msra.gmra.mrb[96].mxu0 %vm1913_vm2, %v7239_v60  ;;  %17778 = vmatmul.mubr.msk.f32.vlgmr.msra.gmra.mrb[96].mxu1 %vm1913_vm2, %v7240_v61  ;;  %v18779_v60 = vpack.c.bf16 %v8780_v55, %v8779_v54  ;;  %v18782_v61 = vpack.c.bf16 %v8782_v57, %v8781_v56  ;;  %v8799_v56 = vld [vmem:[%s21844_s10 + $0x120] sm:$0xff]  ;;  %v8800_v57 = vld [vmem:[%s21844_s10 + $0x128] sm:$0xff] }
 0x51b   :  { %18750 = vmatpush3.bf16.msra.mxu0 %v18749_v58  ;;  %18753 = vmatpush3.bf16.msra.mxu1 %v18752_v59 }
 0x51c   :  { %17784 = vmatprep.mubr.msk.f32.mxu0 %vm19049_vm0, %v19050_v12  ;;  %17791 = vmatprep.mubr.msk.f32.mxu1 %vm19049_vm0, %v19050_v12 }
 0x51d   :  { %18754 = vmatprep.subr.bf16.mxu0 %v19048_v4  ;;  %18757 = vmatprep.subr.bf16.mxu1 %v19048_v4 }
 0x51e   :  { %v7143_v2 = vpop.f32.mrb[78].mxu0  ;;  %v7219_v5 = vpop.f32.mrb[78].mxu1 }
 0x51f   :  { %v7241_v48 = vmax.f32 %v7143_v2, 0.0  ;;  %v7242_v7 = vmax.f32 %v7219_v5, 0.0  ;;  %v17644_v8 = vpop.f32.mrb[79].mxu0  ;;  %v17653_v9 = vpop.f32.mrb[79].mxu1  ;;  %v8783_v2 = vld [vmem:[%s21844_s10 + $0xa0] sm:$0xff]  ;;  %v8784_v5 = vld [vmem:[%s21844_s10 + $0xa8] sm:$0xff] }
 0x520   :  { %v18785_v9 = vpack.c.bf16 %v8784_v5, %v8783_v2 }
 0x521   :  { %17785 = vmatmul.mubr.msk.f32.vlgmr.msra.gmra.mrb[98].mxu0 %vm1913_vm2, %v7241_v48  ;;  %17792 = vmatmul.mubr.msk.f32.vlgmr.msra.gmra.mrb[98].mxu1 %vm1913_vm2, %v7242_v7  ;;  %v8786_v48 = vld [vmem:[%s21844_s10 + $0xb8] sm:$0xff] }
 0x522   :  { %18756 = vmatpush3.bf16.msra.mxu0 %v18755_v6  ;;  %17798 = vmatprep.mubr.msk.f32.mxu0 %vm19049_vm0, %v19050_v12  ;;  %v8785_v6 = vld [vmem:[%s21844_s10 + $0xb0] sm:$0xff] }
 0x523   :  { %17805 = vmatprep.mubr.msk.f32.mxu1 %vm19049_vm0, %v19050_v12  ;;  %18760 = vmatprep.subr.bf16.mxu0 %v19048_v4  ;;  %v18788_v10 = vpack.c.bf16 %v8786_v48, %v8785_v6 }
 0x524   :  { %18759 = vmatpush3.bf16.msra.mxu1 %v18758_v13 }
 0x525   :  { %18763 = vmatprep.subr.bf16.mxu1 %v19048_v4 }
 0x5b6   :  { %v7352_v19 = vpop.f32.mrb[80].mxu0  ;;  %v7425_v21 = vpop.f32.mrb[80].mxu1 }
 0x5b7   :  { %v8743_v26 = vmax.f32 %v7352_v19, 0.0  ;;  %v8744_v27 = vmax.f32 %v7425_v21, 0.0  ;;  %v17660_v29 = vpop.f32.mrb[81].mxu0  ;;  %v17667_v30 = vpop.f32.mrb[81].mxu1  ;;  %v8789_v19 = vld [vmem:[%s21844_s10 + $0xd0] sm:$0xff]  ;;  %v8790_v21 = vld [vmem:[%s21844_s10 + $0xd8] sm:$0xff] }
 0x5b9   :  { %17799 = vmatmul.mubr.msk.f32.vlgmr.msra.gmra.mrb[100].mxu0 %vm1913_vm2, %v8743_v26  ;;  %17806 = vmatmul.mubr.msk.f32.vlgmr.msra.gmra.mrb[100].mxu1 %vm1913_vm2, %v8744_v27  ;;  %v18791_v26 = vpack.c.bf16 %v8788_v18, %v8787_v17  ;;  %v18794_v27 = vpack.c.bf16 %v8790_v21, %v8789_v19 }
 0x5ba   :  { %18762 = vmatpush3.bf16.msra.mxu0 %v18761_v23  ;;  %18765 = vmatpush3.bf16.msra.mxu1 %v18764_v24 }
 0x5bb   :  { %17812 = vmatprep.mubr.msk.f32.mxu0 %vm19049_vm0, %v19050_v12  ;;  %17819 = vmatprep.mubr.msk.f32.mxu1 %vm19049_vm0, %v19050_v12 }
 0x5bc   :  { %v7498_v28 = vpop.f32.mrb[82].mxu0  ;;  %v7571_v15 = vpop.f32.mrb[82].mxu1  ;;  %18766 = vmatprep.subr.bf16.mxu0 %v19048_v4  ;;  %18769 = vmatprep.subr.bf16.mxu1 %v19048_v4 }
 0x5bd   :  { %v8745_v36 = vmax.f32 %v7498_v28, 0.0  ;;  %v8746_v37 = vmax.f32 %v7571_v15, 0.0  ;;  %v17674_v38 = vpop.f32.mrb[83].mxu0  ;;  %v17681_v39 = vpop.f32.mrb[83].mxu1  ;;  %v8793_v28 = vld [vmem:[%s21844_s10 + $0xf0] sm:$0xff]  ;;  %v8794_v15 = vld [vmem:[%s21844_s10 + $0xf8] sm:$0xff] }
 0x5bf   :  { %17813 = vmatmul.mubr.msk.f32.vlgmr.msra.gmra.mrb[102].mxu0 %vm1913_vm2, %v8745_v36  ;;  %17820 = vmatmul.mubr.msk.f32.vlgmr.msra.gmra.mrb[102].mxu1 %vm1913_vm2, %v8746_v37  ;;  %v18797_v36 = vpack.c.bf16 %v8792_v3, %v8791_v33  ;;  %v18800_v37 = vpack.c.bf16 %v8794_v15, %v8793_v28 }
 0x5c0   :  { %18768 = vmatpush3.bf16.msra.mxu0 %v18767_v34  ;;  %18771 = vmatpush3.bf16.msra.mxu1 %v18770_v35 }
 0x5c1   :  { %17826 = vmatprep.mubr.msk.f32.mxu0 %vm19049_vm0, %v19050_v12  ;;  %17833 = vmatprep.mubr.msk.f32.mxu1 %vm19049_vm0, %v19050_v12 }
 0x5c2   :  { %18772 = vmatprep.subr.bf16.mxu0 %v19048_v4  ;;  %18775 = vmatprep.subr.bf16.mxu1 %v19048_v4 }
 0x5c3   :  { %v7644_v44 = vpop.f32.mrb[84].mxu0  ;;  %v7717_v45 = vpop.f32.mrb[84].mxu1 }
 0x5c4   :  { %v8747_v50 = vmax.f32 %v7644_v44, 0.0  ;;  %v8748_v51 = vmax.f32 %v7717_v45, 0.0  ;;  %v17688_v52 = vpop.f32.mrb[85].mxu0  ;;  %v17695_v53 = vpop.f32.mrb[85].mxu1  ;;  %v8797_v44 = vld [vmem:[%s21844_s10 + $0x110] sm:$0xff]  ;;  %v8798_v45 = vld [vmem:[%s21844_s10 + $0x118] sm:$0xff] }
 0x5c6   :  { %17827 = vmatmul.mubr.msk.f32.vlgmr.msra.gmra.mrb[104].mxu0 %vm1913_vm2, %v8747_v50  ;;  %17834 = vmatmul.mubr.msk.f32.vlgmr.msra.gmra.mrb[104].mxu1 %vm1913_vm2, %v8748_v51  ;;  %v18803_v50 = vpack.c.bf16 %v8796_v43, %v8795_v42  ;;  %v18806_v51 = vpack.c.bf16 %v8798_v45, %v8797_v44 }
 0x5c7   :  { %18774 = vmatpush3.bf16.msra.mxu0 %v18773_v46  ;;  %18777 = vmatpush3.bf16.msra.mxu1 %v18776_v49 }
 0x5c8   :  { %17840 = vmatprep.mubr.msk.f32.mxu0 %vm19049_vm0, %v19050_v12  ;;  %17847 = vmatprep.mubr.msk.f32.mxu1 %vm19049_vm0, %v19050_v12 }
 0x5c9   :  { %18778 = vmatprep.subr.bf16.mxu0 %v19048_v4  ;;  %18781 = vmatprep.subr.bf16.mxu1 %v19048_v4 }
 0x5ca   :  { %v7790_v58 = vpop.f32.mrb[86].mxu0  ;;  %v7863_v59 = vpop.f32.mrb[86].mxu1 }
 0x5cb   :  { %v8749_v62 = vmax.f32 %v7790_v58, 0.0  ;;  %v8750_v63 = vmax.f32 %v7863_v59, 0.0  ;;  %v17702_v0 = vpop.f32.mrb[87].mxu0  ;;  %v17709_v1 = vpop.f32.mrb[87].mxu1  ;;  %v8801_v58 = vld [vmem:[%s21844_s10 + $0x130] sm:$0xff]  ;;  %v8802_v59 = vld [vmem:[%s21844_s10 + $0x138] sm:$0xff] }
 0x5cd   :  { %17841 = vmatmul.mubr.msk.f32.vlgmr.msra.gmra.mrb[106].mxu0 %vm1913_vm2, %v8749_v62  ;;  %17848 = vmatmul.mubr.msk.f32.vlgmr.msra.gmra.mrb[106].mxu1 %vm1913_vm2, %v8750_v63  ;;  %v18809_v62 = vpack.c.bf16 %v8800_v57, %v8799_v56  ;;  %v18812_v63 = vpack.c.bf16 %v8802_v59, %v8801_v58 }
 0x5ce   :  { %18780 = vmatpush3.bf16.msra.mxu0 %v18779_v60  ;;  %18783 = vmatpush3.bf16.msra.mxu1 %v18782_v61 }
 0x5cf   :  { %17854 = vmatprep.mubr.msk.f32.mxu0 %vm19049_vm0, %v19050_v12  ;;  %17861 = vmatprep.mubr.msk.f32.mxu1 %vm19049_vm0, %v19050_v12 }
 0x5d0   :  { %18784 = vmatprep.subr.bf16.mxu0 %v19048_v4  ;;  %18787 = vmatprep.subr.bf16.mxu1 %v19048_v4 }
 0x5d1   :  { %v7936_v7 = vpop.f32.mrb[88].mxu0  ;;  %v8009_v8 = vpop.f32.mrb[88].mxu1 }
 0x5d2   :  { %v8751_v11 = vmax.f32 %v7936_v7, 0.0  ;;  %v8752_v13 = vmax.f32 %v8009_v8, 0.0  ;;  %v17716_v14 = vpop.f32.mrb[89].mxu0  ;;  %v17723_v16 = vpop.f32.mrb[89].mxu1 }
 0x5d4   :  { %17855 = vmatmul.mubr.msk.f32.vlgmr.msra.gmra.mrb[108].mxu0 %vm1913_vm2, %v8751_v11  ;;  %17862 = vmatmul.mubr.msk.f32.vlgmr.msra.gmra.mrb[108].mxu1 %vm1913_vm2, %v8752_v13  ;;  %v10283_v11 = vld [vmem:[%s21845_s11] sm:$0xff] }
 0x5d5   :  { %18786 = vmatpush3.bf16.msra.mxu0 %v18785_v9  ;;  %18789 = vmatpush3.bf16.msra.mxu1 %v18788_v10  ;;  %v10296_v13 = vrot.slane %v10283_v11, %v19193_v20 }
 0x5d6   :  { %17868 = vmatprep.mubr.msk.f32.mxu0 %vm19049_vm0, %v19050_v12  ;;  %17875 = vmatprep.mubr.msk.f32.mxu1 %vm19049_vm0, %v19050_v12 }
 0x5d7   :  { %18790 = vmatprep.subr.bf16.mxu0 %v19048_v4  ;;  %18793 = vmatprep.subr.bf16.mxu1 %v19048_v4  ;;  %v10304_v14 = vcombine.high %v10296_v13, %v10296_v13  ;;  %v10312_v16 = vrot.slane %v10296_v13, %v19193_v20 }
 0x5d8   :  { %v8082_v23 = vpop.f32.mrb[90].mxu0  ;;  %v8155_v24 = vpop.f32.mrb[90].mxu1 }
 0x5d9   :  { %v8753_v29 = vmax.f32 %v8082_v23, 0.0  ;;  %v8754_v30 = vmax.f32 %v8155_v24, 0.0  ;;  %v17730_v31 = vpop.f32.mrb[91].mxu0  ;;  %v17737_v32 = vpop.f32.mrb[91].mxu1  ;;  %v10326_v17 = vrot.slane %v10304_v14, %v19193_v20  ;;  %v10414_v18 = vrot.slane %v10312_v16, %v19198_v22 }
 0x5da   :  { %v10289_v23 = vcombine.high %v10283_v11, %v10283_v11  ;;  %v10334_v31 = vcombine.high %v10312_v16, %v10312_v16 }
 0x5db   :  { %17869 = vmatmul.mubr.msk.f32.vlgmr.msra.gmra.mrb[110].mxu0 %vm1913_vm2, %v8753_v29  ;;  %17876 = vmatmul.mubr.msk.f32.vlgmr.msra.gmra.mrb[110].mxu1 %vm1913_vm2, %v8754_v30  ;;  %v10418_v30 = vrot.slane %v10326_v17, %v19198_v22  ;;  %v10336_v33 = vcombine.high %v10326_v17, %v10326_v17 }
 0x5dc   :  { %18792 = vmatpush3.bf16.msra.mxu0 %v18791_v26  ;;  %18795 = vmatpush3.bf16.msra.mxu1 %v18794_v27  ;;  %v10303_v3 = vrot.slane %v10289_v23, %v19193_v20 }
 0x5dd   :  { %17882 = vmatprep.mubr.msk.f32.mxu0 %vm19049_vm0, %v19050_v12  ;;  %17889 = vmatprep.mubr.msk.f32.mxu1 %vm19049_vm0, %v19050_v12 }
 0x5de   :  { %18796 = vmatprep.subr.bf16.mxu0 %v19048_v4  ;;  %18799 = vmatprep.subr.bf16.mxu1 %v19048_v4  ;;  %v10319_v45 = vrot.slane %v10303_v3, %v19193_v20 }
 0x5df   :  { %v8228_v34 = vpop.f32.mrb[92].mxu0  ;;  %v8301_v35 = vpop.f32.mrb[92].mxu1 }
 0x5e0   :  { %v8755_v38 = vmax.f32 %v8228_v34, 0.0  ;;  %v8756_v39 = vmax.f32 %v8301_v35, 0.0  ;;  %v17744_v40 = vpop.f32.mrb[93].mxu0  ;;  %v17751_v41 = vpop.f32.mrb[93].mxu1  ;;  %v10422_v34 = vrot.slane %v10334_v31, %v19198_v22 }
 0x5e1   :  { %v10426_v40 = vrot.slane %v10336_v33, %v19198_v22  ;;  %v10305_v41 = vcombine.high %v10303_v3, %v10303_v3 }
 0x5e2   :  { %17883 = vmatmul.mubr.msk.f32.vlgmr.msra.gmra.mrb[112].mxu0 %vm1913_vm2, %v8755_v38  ;;  %17890 = vmatmul.mubr.msk.f32.vlgmr.msra.gmra.mrb[112].mxu1 %vm1913_vm2, %v8756_v39 }
 0x5e3   :  { %18798 = vmatpush3.bf16.msra.mxu0 %v18797_v36  ;;  %18801 = vmatpush3.bf16.msra.mxu1 %v18800_v37 }
 0x5e4   :  { %17896 = vmatprep.mubr.msk.f32.mxu0 %vm19049_vm0, %v19050_v12  ;;  %17903 = vmatprep.mubr.msk.f32.mxu1 %vm19049_vm0, %v19050_v12 }
 0x5e5   :  { %18802 = vmatprep.subr.bf16.mxu0 %v19048_v4  ;;  %18805 = vmatprep.subr.bf16.mxu1 %v19048_v4 }
 0x5e6   :  { %v8374_v46 = vpop.f32.mrb[94].mxu0  ;;  %v8447_v49 = vpop.f32.mrb[94].mxu1 }
 0x5e7   :  { %v8757_v52 = vmax.f32 %v8374_v46, 0.0  ;;  %v8758_v53 = vmax.f32 %v8447_v49, 0.0  ;;  %v17758_v54 = vpop.f32.mrb[95].mxu0  ;;  %v17765_v55 = vpop.f32.mrb[95].mxu1  ;;  %v10333_v46 = vrot.slane %v10305_v41, %v19193_v20 }
 0x5e9   :  { %17897 = vmatmul.mubr.msk.f32.vlgmr.msra.gmra.mrb[114].mxu0 %vm1913_vm2, %v8757_v52  ;;  %17904 = vmatmul.mubr.msk.f32.vlgmr.msra.gmra.mrb[114].mxu1 %vm1913_vm2, %v8758_v53  ;;  %v10430_v53 = vrot.slane %v10319_v45, %v19198_v22  ;;  %v10434_v57 = vrot.slane %v10333_v46, %v19198_v22 }
 0x5ea   :  { %18804 = vmatpush3.bf16.msra.mxu0 %v18803_v50  ;;  %18807 = vmatpush3.bf16.msra.mxu1 %v18806_v51 }
 0x5eb   :  { %17910 = vmatprep.mubr.msk.f32.mxu0 %vm19049_vm0, %v19050_v12  ;;  %17917 = vmatprep.mubr.msk.f32.mxu1 %vm19049_vm0, %v19050_v12 }
 0x5ec   :  { %18808 = vmatprep.subr.bf16.mxu0 %v19048_v4  ;;  %18811 = vmatprep.subr.bf16.mxu1 %v19048_v4 }
 0x5ed   :  { %v8520_v60 = vpop.f32.mrb[96].mxu0  ;;  %v8593_v61 = vpop.f32.mrb[96].mxu1 }
 0x5ee   :  { %v8759_v0 = vmax.f32 %v8520_v60, 0.0  ;;  %v8760_v1 = vmax.f32 %v8593_v61, 0.0  ;;  %v17772_v2 = vpop.f32.mrb[97].mxu0  ;;  %v17779_v5 = vpop.f32.mrb[97].mxu1  ;;  %v10335_v61 = vcombine.high %v10319_v45, %v10319_v45 }
 0x5f0   :  { %17911 = vmatmul.mubr.msk.f32.vlgmr.msra.gmra.mrb[116].mxu0 %vm1913_vm2, %v8759_v0  ;;  %17918 = vmatmul.mubr.msk.f32.vlgmr.msra.gmra.mrb[116].mxu1 %vm1913_vm2, %v8760_v1  ;;  %v10337_v1 = vcombine.high %v10333_v46, %v10333_v46 }
 0x5f1   :  { %18810 = vmatpush3.bf16.msra.mxu0 %v18809_v62  ;;  %18813 = vmatpush3.bf16.msra.mxu1 %v18812_v63  ;;  %v10284_v62 = vld [vmem:[%s21845_s11 + $0x8] sm:$0xff] }
 0x5f2   :  { %17924 = vmatprep.mubr.msk.f32.mxu0 %vm19049_vm0, %v19050_v12  ;;  %17931 = vmatprep.mubr.msk.f32.mxu1 %vm19049_vm0, %v19050_v12  ;;  %v10345_v2 = vrot.slane %v10284_v62, %v19193_v20  ;;  %v10338_v31 = vcombine.high %v10284_v62, %v10284_v62 }
 0x5f3   :  { %18814 = vmatprep.subr.bf16.mxu0 %v19048_v4  ;;  %18817 = vmatprep.subr.bf16.mxu1 %v19048_v4 }
 0x5f4   :  { %v8666_v6 = vpop.f32.mrb[98].mxu0  ;;  %v8739_v48 = vpop.f32.mrb[98].mxu1  ;;  %v10353_v11 = vcombine.high %v10345_v2, %v10345_v2  ;;  %v10361_v17 = vrot.slane %v10345_v2, %v19193_v20 }
 0x5f5   :  { %v8761_v7 = vmax.f32 %v8666_v6, 0.0  ;;  %v8762_v8 = vmax.f32 %v8739_v48, 0.0  ;;  %v17786_v9 = vpop.f32.mrb[99].mxu0  ;;  %v17793_v10 = vpop.f32.mrb[99].mxu1 }
 0x5f6   :  { %v10438_v9 = vrot.slane %v10335_v61, %v19198_v22  ;;  %v10442_v10 = vrot.slane %v10337_v1, %v19198_v22 }
 0x5f7   :  { %17925 = vmatmul.mubr.msk.f32.vlgmr.msra.gmra.mrb[118].mxu0 %vm1913_vm2, %v8761_v7  ;;  %17932 = vmatmul.mubr.msk.f32.vlgmr.msra.gmra.mrb[118].mxu1 %vm1913_vm2, %v8762_v8 }
 0x5f8   :  { %17940 = vmatprep.mubr.msk.f32.mxu0 %vm19049_vm0, %v19050_v12  ;;  %17949 = vmatprep.mubr.msk.f32.mxu1 %vm19049_vm0, %v19050_v12 }
 0x68c   :  { %v8872_v19 = vpop.f32.mrb[100].mxu0  ;;  %v8945_v21 = vpop.f32.mrb[100].mxu1 }
 0x68d   :  { %v10263_v24 = vmax.f32 %v8872_v19, 0.0  ;;  %v10264_v26 = vmax.f32 %v8945_v21, 0.0  ;;  %v17800_v27 = vpop.f32.mrb[101].mxu0  ;;  %v17807_v29 = vpop.f32.mrb[101].mxu1 }
 0x68f   :  { %v10511_v32 = vmul.f32 %v10414_v18, %v10263_v24  ;;  %v10512_v15 = vmul.f32 %v10418_v30, %v10264_v26  ;;  %v10375_v24 = vrot.slane %v10353_v11, %v19193_v20  ;;  %v10446_v30 = vrot.slane %v10361_v17, %v19198_v22 }
 0x691   :  { %v10531_v28 = vsel %vm5162_vm3, %v10511_v32, 0.0  ;;  %v10534_v43 = vsel %vm5162_vm3, %v10512_v15, 0.0  ;;  %v10450_v32 = vrot.slane %v10375_v24, %v19198_v22  ;;  %v10383_v15 = vcombine.high %v10361_v17, %v10361_v17 }
 0x692   :  { %v9018_v35 = vpop.f32.mrb[102].mxu0  ;;  %v9091_v36 = vpop.f32.mrb[102].mxu1  ;;  %10532 = vadd.xlane.f32.xlu1 %v10531_v28 }
 0x693   :  { %v10265_v37 = vmax.f32 %v9018_v35, 0.0  ;;  %v17821_v38 = vpop.f32.mrb[103].mxu1  ;;  %v17814_v39 = vpop.f32.mrb[103].mxu0  ;;  %v10266_v42 = vmax.f32 %v9091_v36, 0.0 }
 0x694   :  { %v10352_v38 = vrot.slane %v10338_v31, %v19193_v20  ;;  %v10385_v39 = vcombine.high %v10375_v24, %v10375_v24 }
 0x695   :  { %v10513_v44 = vmul.f32 %v10422_v34, %v10265_v37  ;;  %v10514_v52 = vmul.f32 %v10426_v40, %v10266_v42 }
 0x696   :  { %10535 = vadd.xlane.f32.xlu1 %v10534_v43  ;;  %v10454_v43 = vrot.slane %v10383_v15, %v19198_v22  ;;  %v10354_v45 = vcombine.high %v10352_v38, %v10352_v38 }
 0x697   :  { %v10537_v51 = vsel %vm5162_vm3, %v10513_v44, 0.0  ;;  %v10540_v59 = vsel %vm5162_vm3, %v10514_v52, 0.0  ;;  %v10458_v44 = vrot.slane %v10385_v39, %v19198_v22 }
 0x699   :  { %v9164_v49 = vpop.f32.mrb[104].mxu0  ;;  %v9237_v50 = vpop.f32.mrb[104].mxu1 }
 0x69a   :  { %v10267_v54 = vmax.f32 %v9164_v49, 0.0  ;;  %v17828_v55 = vpop.f32.mrb[105].mxu0  ;;  %v17835_v56 = vpop.f32.mrb[105].mxu1  ;;  %10538 = vadd.xlane.f32.xlu1 %v10537_v51  ;;  %v10268_v58 = vmax.f32 %v9237_v50, 0.0 }
 0x69c   :  { %v10515_v60 = vmul.f32 %v10430_v53, %v10267_v54  ;;  %v10516_v8 = vmul.f32 %v10434_v57, %v10268_v58  ;;  %v10368_v53 = vrot.slane %v10352_v38, %v19193_v20  ;;  %v10382_v57 = vrot.slane %v10354_v45, %v19193_v20 }
 0x69e   :  { %10541 = vadd.xlane.f32.xlu1 %v10540_v59  ;;  %v10543_v7 = vsel %vm5162_vm3, %v10515_v60, 0.0  ;;  %v10546_v14 = vsel %vm5162_vm3, %v10516_v8, 0.0  ;;  %v10384_v56 = vcombine.high %v10368_v53, %v10368_v53  ;;  %v10462_v61 = vrot.slane %v10368_v53, %v19198_v22 }
 0x69f   :  { %v10466_v1 = vrot.slane %v10382_v57, %v19198_v22  ;;  %v10386_v2 = vcombine.high %v10382_v57, %v10382_v57 }
 0x6a0   :  { %v9310_v63 = vpop.f32.mrb[106].mxu0  ;;  %v9383_v0 = vpop.f32.mrb[106].mxu1  ;;  %v10470_v62 = vrot.slane %v10384_v56, %v19198_v22 }
 0x6a1   :  { %v10269_v5 = vmax.f32 %v9310_v63, 0.0  ;;  %v17849_v6 = vpop.f32.mrb[107].mxu1  ;;  %v17842_v48 = vpop.f32.mrb[107].mxu0  ;;  %v10270_v13 = vmax.f32 %v9383_v0, 0.0 }
 0x6a2   :  { %10544 = vadd.xlane.f32.xlu1 %v10543_v7 }
 0x6a3   :  { %v10517_v16 = vmul.f32 %v10438_v9, %v10269_v5  ;;  %v10518_v29 = vmul.f32 %v10442_v10, %v10270_v13  ;;  %v16269_v5 = vld.sshfl [vmem:[%s21845_s11 + $0x10] sm:$0x33 pattern:$0x75316420]  ;;  %v10474_v13 = vrot.slane %v10386_v2, %v19198_v22 }
 0x6a5   :  { %v10549_v27 = vsel %vm5162_vm3, %v10517_v16, 0.0  ;;  %v10552_v3 = vsel %vm5162_vm3, %v10518_v29, 0.0  ;;  %v10394_v16 = vcombine.high %v16269_v5, %v16269_v5 }
 0x6a6   :  { %10547 = vadd.xlane.f32.xlu1 %v10546_v14  ;;  %v10401_v14 = vrot.slane %v16269_v5, %v19193_v20 }
 0x6a7   :  { %v9456_v18 = vpop.f32.mrb[108].mxu0  ;;  %v9529_v19 = vpop.f32.mrb[108].mxu1  ;;  %v10408_v29 = vrot.slane %v10394_v16, %v19193_v20 }
 0x6a8   :  { %v17856_v21 = vpop.f32.mrb[109].mxu0  ;;  %v17863_v23 = vpop.f32.mrb[109].mxu1  ;;  %v10271_v26 = vmax.f32 %v9456_v18, 0.0  ;;  %v10272_v33 = vmax.f32 %v9529_v19, 0.0 }
 0x6aa   :  { %10550 = vadd.xlane.f32.xlu1 %v10549_v27  ;;  %v10519_v28 = vmul.f32 %v10446_v30, %v10271_v26  ;;  %v10520_v42 = vmul.f32 %v10450_v32, %v10272_v33  ;;  %v10478_v33 = vrot.slane %v10401_v14, %v19198_v22 }
 0x6ac   :  { %v10555_v41 = vsel %vm5162_vm3, %v10519_v28, 0.0  ;;  %v10558_v51 = vsel %vm5162_vm3, %v10520_v42, 0.0 }
 0x6ae   :  { %v9602_v34 = vpop.f32.mrb[110].mxu0  ;;  %v9675_v35 = vpop.f32.mrb[110].mxu1  ;;  %10553 = vadd.xlane.f32.xlu1 %v10552_v3  ;;  %v10482_v3 = vrot.slane %v10408_v29, %v19198_v22 }
 0x6af   :  { %v17877_v36 = vpop.f32.mrb[111].mxu1  ;;  %v17870_v37 = vpop.f32.mrb[111].mxu0  ;;  %v10273_v40 = vmax.f32 %v9602_v34, 0.0  ;;  %v10274_v46 = vmax.f32 %v9675_v35, 0.0  ;;  %v10409_v35 = vcombine.high %v10401_v14, %v10401_v14 }
 0x6b1   :  { %v10521_v52 = vmul.f32 %v10454_v43, %v10273_v40  ;;  %v10522_v60 = vmul.f32 %v10458_v44, %v10274_v46  ;;  %v10410_v40 = vcombine.high %v10408_v29, %v10408_v29  ;;  %v10486_v44 = vrot.slane %v10409_v35, %v19198_v22 }
 0x6b2   :  { %10556 = vadd.xlane.f32.xlu1 %v10555_v41 }
 0x6b3   :  { %v10561_v59 = vsel %vm5162_vm3, %v10521_v52, 0.0  ;;  %v10564_v9 = vsel %vm5162_vm3, %v10522_v60, 0.0 }
 0x6b5   :  { %v9748_v49 = vpop.f32.mrb[112].mxu0  ;;  %v9821_v50 = vpop.f32.mrb[112].mxu1 }
 0x6b6   :  { %v17884_v54 = vpop.f32.mrb[113].mxu0  ;;  %v17891_v55 = vpop.f32.mrb[113].mxu1  ;;  %10559 = vadd.xlane.f32.xlu1 %v10558_v51  ;;  %v10275_v58 = vmax.f32 %v9748_v49, 0.0  ;;  %v10276_v6 = vmax.f32 %v9821_v50, 0.0  ;;  %v10490_v50 = vrot.slane %v10410_v40, %v19198_v22 }
 0x6b8   :  { %v10523_v10 = vmul.f32 %v10462_v61, %v10275_v58  ;;  %v10524_v21 = vmul.f32 %v10466_v1, %v10276_v6 }
 0x6ba   :  { %10562 = vadd.xlane.f32.xlu1 %v10561_v59  ;;  %v10567_v19 = vsel %vm5162_vm3, %v10523_v10, 0.0  ;;  %v10570_v31 = vsel %vm5162_vm3, %v10524_v21, 0.0 }
 0x6bc   :  { %v9894_v63 = vpop.f32.mrb[114].mxu0  ;;  %v9967_v0 = vpop.f32.mrb[114].mxu1 }
 0x6bd   :  { %v10277_v48 = vmax.f32 %v9894_v63, 0.0  ;;  %v17905_v7 = vpop.f32.mrb[115].mxu1  ;;  %v17898_v8 = vpop.f32.mrb[115].mxu0  ;;  %v10278_v17 = vmax.f32 %v9967_v0, 0.0 }
 0x6be   :  { %10565 = vadd.xlane.f32.xlu1 %v10564_v9 }
 0x6bf   :  { %v10525_v11 = vmul.f32 %v10470_v62, %v10277_v48  ;;  %v10526_v32 = vmul.f32 %v10474_v13, %v10278_v17 }
 0x6c1   :  { %v10573_v18 = vsel %vm5162_vm3, %v10525_v11, 0.0  ;;  %v10576_v15 = vsel %vm5162_vm3, %v10526_v32, 0.0 }
 0x6c2   :  { %10574 = vadd.xlane.f32.xlu0 %v10573_v18  ;;  %10568 = vadd.xlane.f32.xlu1 %v10567_v19 }
 0x6c3   :  { %v10113_v23 = vpop.f32.mrb[116].mxu1  ;;  %v10040_v24 = vpop.f32.mrb[116].mxu0 }
 0x6c4   :  { %v17912_v26 = vpop.f32.mrb[117].mxu0  ;;  %v17919_v27 = vpop.f32.mrb[117].mxu1  ;;  %v10279_v30 = vmax.f32 %v10040_v24, 0.0  ;;  %v10280_v28 = vmax.f32 %v10113_v23, 0.0 }
 0x6c6   :  { %10571 = vadd.xlane.f32.xlu1 %v10570_v31  ;;  %v10527_v34 = vmul.f32 %v10478_v33, %v10279_v30  ;;  %v10528_v43 = vmul.f32 %v10482_v3, %v10280_v28 }
 0x6c8   :  { %v10579_v42 = vsel %vm5162_vm3, %v10527_v34, 0.0  ;;  %v10582_v46 = vsel %vm5162_vm3, %v10528_v43, 0.0 }
 0x6ca   :  { %v10186_v36 = vpop.f32.mrb[118].mxu0  ;;  %v10259_v37 = vpop.f32.mrb[118].mxu1  ;;  %10577 = vadd.xlane.f32.xlu1 %v10576_v15 }
 0x6cb   :  { %v17933_v38 = vpop.f32.mrb[119].mxu1  ;;  %v17926_v39 = vpop.f32.mrb[119].mxu0  ;;  %v10281_v41 = vmax.f32 %v10186_v36, 0.0  ;;  %v10282_v45 = vmax.f32 %v10259_v37, 0.0 }
 0x6cd   :  { %v10529_v49 = vmul.f32 %v10486_v44, %v10281_v41  ;;  %v10530_v52 = vmul.f32 %v10490_v50, %v10282_v45 }
 0x6ce   :  { %10580 = vadd.xlane.f32.xlu1 %v10579_v42 }
 0x6cf   :  { %v10585_v51 = vsel %vm5162_vm3, %v10529_v49, 0.0  ;;  %v10588_v53 = vsel %vm5162_vm3, %v10530_v52, 0.0 }
 0x6d2   :  { %10583 = vadd.xlane.f32.xlu1 %v10582_v46 }
 0x6d6   :  { %10586 = vadd.xlane.f32.xlu1 %v10585_v51 }
 0x6da   :  { %10589 = vadd.xlane.f32.xlu1 %v10588_v53  ;;  %v11000_v53 = vld [vmem:[%s21848_s14] sm:$0xff] }
 0x71f   :  { %v10533_v54 = vpop.xlane.xlu1 %10532 }
 0x720   :  { %v10614_v62 = vrot.slane %v10533_v54, %v20047_v25  ;;  %v11001_v54 = vld [vmem:[%s21848_s14 + $0x8] sm:$0xff] }
 0x723   :  { %v10536_v55 = vpop.xlane.xlu1 %10535 }
 0x724   :  { %v10618_v60 = vrot.slane %v10536_v55, %v20047_v25  ;;  %v11003_v55 = vld [vmem:[%s21848_s14 + $0x18] sm:$0xff] }
 0x726   :  { %v10691_v2 = vsel %vm5325_vm4, %v10618_v60, %v10614_v62  ;;  %v11005_v60 = vld [vmem:[%s21848_s14 + $0x28] sm:$0xf] }
 0x727   :  { %v10539_v56 = vpop.xlane.xlu1 %10538 }
 0x728   :  { %v10622_v61 = vrot.slane %v10539_v56, %v20047_v25  ;;  %v18815_v56 = vpack.c.bf16 %v11001_v54, %v11000_v53 }
 0x72a   :  { %v10692_v6 = vsel %vm5327_vm5, %v10622_v61, %v10691_v2  ;;  %18816 = vmatpush3.bf16.msra.mxu0 %v18815_v56 }
 0x72b   :  { %v10542_v57 = vpop.xlane.xlu1 %10541  ;;  %17938 = vmatprep.subr.mxu0 %v19050_v12 }
 0x72c   :  { %v10626_v63 = vrot.slane %v10542_v57, %v20047_v25  ;;  %v11004_v57 = vld [vmem:[%s21848_s14 + $0x20] sm:$0xff] }
 0x72e   :  { %v10693_v7 = vsel %vm5329_vm6, %v10626_v63, %v10692_v6 }
 0x72f   :  { %v10545_v58 = vpop.xlane.xlu1 %10544 }
 0x730   :  { %v10630_v0 = vrot.slane %v10545_v58, %v20047_v25  ;;  %v18818_v58 = vpack.c.bf16 %v11004_v57, %v11003_v55 }
 0x732   :  { %v10694_v8 = vsel %vm5331_vm7, %v10630_v0, %v10693_v7  ;;  %18819 = vmatpush3.bf16.msra.mxu1 %v18818_v58  ;;  %v10749_v7 = vld [vmem:[%s21846_s12] sm:$0xf] }
 0x733   :  { %v10548_v59 = vpop.xlane.xlu1 %10547  ;;  %17947 = vmatprep.subr.mxu1 %v19050_v12 }
 0x734   :  { %v10634_v5 = vrot.slane %v10548_v59, %v20047_v25  ;;  %v11002_v59 = vld [vmem:[%s21848_s14 + $0x10] sm:$0xf] }
 0x735   :  { %17939 = vmatpush3.msk.msra.mxu0 %vm5705_vm11, %v11002_v59 }
 0x736   :  { %v10695_v11 = vsel %vm5333_vm8, %v10634_v5, %v10694_v8  ;;  %17948 = vmatpush3.msk.msra.mxu1 %vm5705_vm11, %v11005_v60  ;;  %18820 = vmatprep.subr.bf16.mxu0 %v19048_v4  ;;  %v11006_v8 = vld [vmem:[%s21848_s14 + $0x30] sm:$0xff] }
 0x737   :  { %v10551_v1 = vpop.xlane.xlu1 %10550  ;;  %18823 = vmatprep.subr.bf16.mxu1 %v19048_v4 }
 0x738   :  { %v10638_v48 = vrot.slane %v10551_v1, %v20047_v25  ;;  %v10752_v1 = vld [vmem:[%s21847_s13] sm:$0xff] }
 0x739   :  { %v10765_v2 = vrot.slane %v10752_v1, %v19193_v20 }
 0x73a   :  { %v10696_v13 = vsel %vm5335_vm9, %v10638_v48, %v10695_v11 }
 0x73b   :  { %v10554_v9 = vpop.xlane.xlu1 %10553  ;;  %v10773_v5 = vcombine.high %v10765_v2, %v10765_v2  ;;  %v10781_v6 = vrot.slane %v10765_v2, %v19193_v20 }
 0x73c   :  { %v10642_v10 = vrot.slane %v10554_v9, %v20047_v25  ;;  %v10758_v9 = vcombine.high %v10752_v1, %v10752_v1  ;;  %v11028_v1 = vld [vmem:[%s21848_s14 + $0xe0] sm:$0xff] }
 0x73d   :  { %v10795_v48 = vrot.slane %v10773_v5, %v19193_v20  ;;  %v11020_v5 = vld [vmem:[%s21848_s14 + $0xa0] sm:$0xf] }
 0x73e   :  { %v10697_v14 = vsel %vm5337_vm10, %v10642_v10, %v10696_v13  ;;  %v10883_v10 = vrot.slane %v10781_v6, %v19198_v22  ;;  %v11007_v13 = vld [vmem:[%s21848_s14 + $0x38] sm:$0xff] }
 0x73f   :  { %v10557_v16 = vpop.xlane.xlu1 %10556  ;;  %10711 = vxpose.xlu1.b32.start [1/3] (short) (narrow) %v10697_v14, 8  ;;  %v10887_v11 = vrot.slane %v10795_v48, %v19198_v22  ;;  %v11009_v14 = vld [vmem:[%s21848_s14 + $0x48] sm:$0xff] }
 0x740   :  { %v10646_v26 = vrot.slane %v10557_v16, %v20047_v25  ;;  %v11010_v16 = vld [vmem:[%s21848_s14 + $0x50] sm:$0xff] }
 0x743   :  { %v10560_v17 = vpop.xlane.xlu1 %10559 }
 0x744   :  { %v10650_v21 = vrot.slane %v10560_v17, %v20047_v25 }
 0x746   :  { %v10698_v30 = vsel %vm5325_vm4, %v10650_v21, %v10646_v26  ;;  %v10772_v26 = vrot.slane %v10758_v9, %v19193_v20 }
 0x747   :  { %v10563_v18 = vpop.xlane.xlu1 %10562 }
 0x748   :  { %v10654_v23 = vrot.slane %v10563_v18, %v20047_v25  ;;  %v10803_v18 = vcombine.high %v10781_v6, %v10781_v6  ;;  %v11023_v6 = vld [vmem:[%s21848_s14 + $0xb8] sm:$0xf] }
 0x74a   :  { %v10699_v31 = vsel %vm5327_vm5, %v10654_v23, %v10698_v30  ;;  %v18821_v23 = vpack.c.bf16 %v11007_v13, %v11006_v8  ;;  %v10891_v30 = vrot.slane %v10803_v18, %v19198_v22  ;;  %v11031_v18 = vld [vmem:[%s21848_s14 + $0xf8] sm:$0xff] }
 0x74b   :  { %v10566_v19 = vpop.xlane.xlu1 %10565 }
 0x74c   :  { %v10658_v27 = vrot.slane %v10566_v19, %v20047_v25  ;;  %v10805_v19 = vcombine.high %v10795_v48, %v10795_v48 }
 0x74e   :  { %v10700_v3 = vsel %vm5329_vm6, %v10658_v27, %v10699_v31  ;;  %v10895_v31 = vrot.slane %v10805_v19, %v19198_v22  ;;  %v11033_v19 = vld [vmem:[%s21848_s14 + $0x108] sm:$0xff] }
 0x74f   :  { %v10569_v24 = vpop.xlane.xlu1 %10568  ;;  %v10575_v33 = vpop.xlane.xlu0 %10574 }
 0x750   :  { %v10662_v29 = vrot.slane %v10569_v24, %v20047_v25  ;;  %v10670_v35 = vrot.slane %v10575_v33, %v20047_v25  ;;  %v18824_v24 = vpack.c.bf16 %v11010_v16, %v11009_v14  ;;  %v11013_v33 = vld [vmem:[%s21848_s14 + $0x68] sm:$0xff] }
 0x752   :  { %v10701_v15 = vsel %vm5331_vm7, %v10662_v29, %v10700_v3  ;;  %v11015_v3 = vld [vmem:[%s21848_s14 + $0x78] sm:$0xff] }
 0x753   :  { %v10572_v32 = vpop.xlane.xlu1 %10571 }
 0x754   :  { %v10666_v28 = vrot.slane %v10572_v32, %v20047_v25  ;;  %v11012_v32 = vld [vmem:[%s21848_s14 + $0x60] sm:$0xff] }
 0x756   :  { %v10702_v34 = vsel %vm5333_vm8, %v10666_v28, %v10701_v15  ;;  %v11016_v28 = vld [vmem:[%s21848_s14 + $0x80] sm:$0xff]  ;;  %v10774_v15 = vcombine.high %v10772_v26, %v10772_v26 }
 0x757   :  { %v10578_v36 = vpop.xlane.xlu1 %10577  ;;  %v10703_v38 = vsel %vm5335_vm9, %v10670_v35, %v10702_v34  ;;  %v11008_v34 = vld [vmem:[%s21848_s14 + $0x40] sm:$0xf]  ;;  %v11011_v35 = vld [vmem:[%s21848_s14 + $0x58] sm:$0xf] }
 0x758   :  { %v10674_v37 = vrot.slane %v10578_v36, %v20047_v25 }
 0x75a   :  { %v10704_v39 = vsel %vm5337_vm10, %v10674_v37, %v10703_v38  ;;  %v18827_v38 = vpack.c.bf16 %v11013_v33, %v11012_v32 }
 0x75b   :  { %v10581_v40 = vpop.xlane.xlu1 %10580  ;;  %10712 = vxpose.xlu1.b32.cont [2/3] (short) (narrow) %v10704_v39, 8  ;;  %v18830_v39 = vpack.c.bf16 %v11016_v28, %v11015_v3 }
 0x75c   :  { %v10678_v45 = vrot.slane %v10581_v40, %v20047_v25  ;;  %v10788_v40 = vrot.slane %v10772_v26, %v19193_v20  ;;  %v11029_v26 = vld [vmem:[%s21848_s14 + $0xe8] sm:$0xf] }
 0x75e   :  { %v10804_v53 = vcombine.high %v10788_v40, %v10788_v40 }
 0x75f   :  { %v10584_v41 = vpop.xlane.xlu1 %10583 }
 0x760   :  { %v10682_v43 = vrot.slane %v10584_v41, %v20047_v25  ;;  %v10802_v41 = vrot.slane %v10774_v15, %v19193_v20  ;;  %v10907_v60 = vrot.slane %v10804_v53, %v19198_v22  ;;  %v11045_v53 = vld [vmem:[%s21848_s14 + $0x168] sm:$0xff] }
 0x762   :  { %v10705_v49 = vsel %vm5325_vm4, %v10682_v43, %v10678_v45  ;;  %v10903_v43 = vrot.slane %v10802_v41, %v19198_v22  ;;  %v11019_v45 = vld [vmem:[%s21848_s14 + $0x98] sm:$0xff]  ;;  %v10806_v54 = vcombine.high %v10802_v41, %v10802_v41 }
 0x763   :  { %v10587_v42 = vpop.xlane.xlu1 %10586 }
 0x764   :  { %v10686_v44 = vrot.slane %v10587_v42, %v20047_v25  ;;  %v10899_v42 = vrot.slane %v10788_v40, %v19198_v22  ;;  %v11035_v40 = vld [vmem:[%s21848_s14 + $0x118] sm:$0xf] }
 0x766   :  { %v10706_v51 = vsel %vm5327_vm5, %v10686_v44, %v10705_v49  ;;  %v11018_v44 = vld [vmem:[%s21848_s14 + $0x90] sm:$0xff] }
 0x767   :  { %v10590_v46 = vpop.xlane.xlu1 %10589  ;;  %v11022_v49 = vld [vmem:[%s21848_s14 + $0xb0] sm:$0xff]  ;;  %v18833_v58 = vpack.c.bf16 %v11019_v45, %v11018_v44 }
 0x768   :  { %v10690_v50 = vrot.slane %v10590_v46, %v20047_v25  ;;  %v11021_v46 = vld [vmem:[%s21848_s14 + $0xa8] sm:$0xff] }
 0x769   :  { %v18836_v59 = vpack.c.bf16 %v11022_v49, %v11021_v46 }
 0x76a   :  { %v10707_v52 = vsel %vm5329_vm6, %v10690_v50, %v10706_v51  ;;  %v11014_v50 = vld [vmem:[%s21848_s14 + $0x70] sm:$0xf]  ;;  %v11017_v51 = vld [vmem:[%s21848_s14 + $0x88] sm:$0xf] }
 0x76b   :  { %10713 = vxpose.xlu1.b32.end [3/3] (short) (narrow) %v10707_v52, 8  ;;  %v10753_v52 = vld [vmem:[%s21847_s13 + $0x8] sm:$0xff] }
 0x76c   :  { %v10814_v55 = vrot.slane %v10753_v52, %v19193_v20  ;;  %v10807_v13 = vcombine.high %v10753_v52, %v10753_v52  ;;  %v11043_v52 = vld [vmem:[%s21848_s14 + $0x158] sm:$0xff] }
 0x76e   :  { %v10822_v2 = vcombine.high %v10814_v55, %v10814_v55 }
 0x7e3   :  { %v10727_v61 = vpop.trf.xlu1 }
 0x7e4   :  { %v16270_v62 = vmul.f32 -1.442695, %v10727_v61  ;;  %v10911_v61 = vrot.slane %v10806_v54, %v19198_v22  ;;  %v11046_v54 = vld [vmem:[%s21848_s14 + $0x170] sm:$0xff] }
 0x7e6   :  { %19016 = vpow2.f32 %v16270_v62  ;;  %v11024_v62 = vld [vmem:[%s21848_s14 + $0xc0] sm:$0xff] }
 0x7f0   :  { %v19017_v63 = vpop.eup %19016 }
 0x7f1   :  { %v10746_v0 = vadd.f32 1.0, %v19017_v63  ;;  %v11025_v63 = vld [vmem:[%s21848_s14 + $0xc8] sm:$0xff] }
 0x7f2   :  { %v18839_v8 = vpack.c.bf16 %v11025_v63, %v11024_v62  ;;  %v18860_v62 = vpack.c.bf16 %v11046_v54, %v11045_v53  ;;  %v16271_v63 = vld.sshfl [vmem:[%s21847_s13 + $0x10] sm:$0x33 pattern:$0x75316420] }
 0x7f3   :  { %19018 = vrcp.f32 %v10746_v0  ;;  %v11027_v0 = vld [vmem:[%s21848_s14 + $0xd8] sm:$0xff] }
 0x7f4   :  { %v18842_v9 = vpack.c.bf16 %v11028_v1, %v11027_v0 }
 0x7fd   :  { %v19019_v17 = vpop.eup %19018 }
 0x7fe   :  { %vm10750_vm14 = vcmp.ge.f32.partialorder %v19019_v17, %v10749_v7  ;;  %v11030_v17 = vld [vmem:[%s21848_s14 + $0xf0] sm:$0xff] }
 0x7ff   :  { %v21003_v21 = vsel %vm10750_vm14, 1.0, %v19052_v47  ;;  %v18845_v33 = vpack.c.bf16 %v11031_v18, %v11030_v17 }
 0x800   :  { %v10980_v27 = vmul.f32 %v10883_v10, %v21003_v21  ;;  %v10981_v29 = vmul.f32 %v10887_v11, %v21003_v21  ;;  %v10982_v36 = vmul.f32 %v10891_v30, %v21003_v21  ;;  %v10983_v37 = vmul.f32 %v10895_v31, %v21003_v21 }
 0x801   :  { %v10984_v56 = vmul.f32 %v10899_v42, %v21003_v21  ;;  %v10985_v57 = vmul.f32 %v10903_v43, %v21003_v21  ;;  %v10986_v48 = vmul.f32 %v10907_v60, %v21003_v21  ;;  %v10987_v7 = vmul.f32 %v10911_v61, %v21003_v21 }
 0x802   :  { %17941 = vmatmul.mubr.msk.f32.vlgmr.msra.gmra.mrb[120].mxu0 %vm5701_vm13, %v10980_v27  ;;  %17950 = vmatmul.mubr.msk.f32.vlgmr.msra.gmra.mrb[120].mxu1 %vm5701_vm13, %v10981_v29  ;;  %v10830_v10 = vrot.slane %v10814_v55, %v19193_v20  ;;  %v10844_v11 = vrot.slane %v10822_v2, %v19193_v20  ;;  %v10821_v30 = vrot.slane %v10807_v13, %v19193_v20  ;;  %v11038_v55 = vld [vmem:[%s21848_s14 + $0x130] sm:$0xf]  ;;  %v11048_v2 = vld [vmem:[%s21848_s14 + $0x180] sm:$0xff] }
 0x803   :  { %18822 = vmatpush3.bf16.msra.mxu0 %v18821_v23  ;;  %18825 = vmatpush3.bf16.msra.mxu1 %v18824_v24  ;;  %v11034_v23 = vld [vmem:[%s21848_s14 + $0x110] sm:$0xff] }
 0x804   :  { %17956 = vmatprep.subr.mxu0 %v19050_v12  ;;  %17965 = vmatprep.subr.mxu1 %v19050_v12  ;;  %v10915_v14 = vrot.slane %v10830_v10, %v19198_v22  ;;  %v10919_v16 = vrot.slane %v10844_v11, %v19198_v22  ;;  %v11026_v24 = vld [vmem:[%s21848_s14 + $0xd0] sm:$0xf]  ;;  %v10852_v27 = vcombine.high %v10830_v10, %v10830_v10 }
 0x805   :  { %17958 = vmatprep.mubr.msk.f32.mxu0 %vm19049_vm0, %v19050_v12  ;;  %17967 = vmatprep.mubr.msk.f32.mxu1 %vm19049_vm0, %v19050_v12  ;;  %v10854_v29 = vcombine.high %v10844_v11, %v10844_v11  ;;  %v18848_v3 = vpack.c.bf16 %v11034_v23, %v11033_v19  ;;  %v10837_v45 = vrot.slane %v10821_v30, %v19193_v20  ;;  %v11054_v23 = vld [vmem:[%s21848_s14 + $0x1b0] sm:$0xff] }
 0x806   :  { %v10988_v31 = vmul.f32 %v10915_v14, %v21003_v21  ;;  %v10989_v32 = vmul.f32 %v10919_v16, %v21003_v21  ;;  %v10923_v28 = vrot.slane %v10852_v27, %v19198_v22  ;;  %v10870_v16 = vrot.slane %v16271_v63, %v19193_v20  ;;  %v11058_v27 = vld [vmem:[%s21848_s14 + $0x1d0] sm:$0xff] }
 0x807   :  { %17957 = vmatpush3.msk.msra.mxu0 %vm5705_vm11, %v11008_v34  ;;  %17966 = vmatpush3.msk.msra.mxu1 %vm5705_vm11, %v11011_v35  ;;  %v10927_v15 = vrot.slane %v10854_v29, %v19198_v22  ;;  %v11036_v34 = vld [vmem:[%s21848_s14 + $0x120] sm:$0xff]  ;;  %v11037_v35 = vld [vmem:[%s21848_s14 + $0x128] sm:$0xff]  ;;  %v10931_v49 = vrot.slane %v10837_v45, %v19198_v22  ;;  %v11050_v29 = vld [vmem:[%s21848_s14 + $0x190] sm:$0xf] }
 0x808   :  { %17959 = vmatmul.mubr.msk.f32.vlgmr.msra.gmra.mrb[122].mxu0 %vm5701_vm13, %v10982_v36  ;;  %17968 = vmatmul.mubr.msk.f32.vlgmr.msra.gmra.mrb[122].mxu1 %vm5701_vm13, %v10983_v37  ;;  %v11039_v36 = vld [vmem:[%s21848_s14 + $0x138] sm:$0xff]  ;;  %v11040_v37 = vld [vmem:[%s21848_s14 + $0x140] sm:$0xff]  ;;  %v10990_v41 = vmul.f32 %v10923_v28, %v21003_v21  ;;  %v18851_v43 = vpack.c.bf16 %v11037_v35, %v11036_v34  ;;  %v10947_v18 = vrot.slane %v10870_v16, %v19198_v22 }
 0x809   :  { %18826 = vmatprep.subr.bf16.mxu0 %v19048_v4  ;;  %18829 = vmatprep.subr.bf16.mxu1 %v19048_v4  ;;  %v10991_v42 = vmul.f32 %v10927_v15, %v21003_v21  ;;  %v18854_v44 = vpack.c.bf16 %v11040_v37, %v11039_v36  ;;  %v12600_v36 = vld [vmem:[%s21849_s15] sm:$0xff]  ;;  %v12601_v37 = vld [vmem:[%s21849_s15 + $0x8] sm:$0xff] }
 0x80a   :  { %18828 = vmatpush3.bf16.msra.mxu0 %v18827_v38  ;;  %18831 = vmatpush3.bf16.msra.mxu1 %v18830_v39  ;;  %v10823_v38 = vcombine.high %v10821_v30, %v10821_v30  ;;  %v11032_v39 = vld [vmem:[%s21848_s14 + $0x100] sm:$0xf]  ;;  %v11053_v30 = vld [vmem:[%s21848_s14 + $0x1a8] sm:$0xf] }
 0x80b   :  { %17974 = vmatprep.subr.mxu0 %v19050_v12  ;;  %17983 = vmatprep.subr.mxu1 %v19050_v12 }
 0x80c   :  { %17976 = vmatprep.mubr.msk.f32.mxu0 %vm19049_vm0, %v19050_v12  ;;  %17985 = vmatprep.mubr.msk.f32.mxu1 %vm19049_vm0, %v19050_v12  ;;  %v10851_v46 = vrot.slane %v10823_v38, %v19193_v20  ;;  %v11056_v38 = vld [vmem:[%s21848_s14 + $0x1c0] sm:$0xf] }
 0x80e   :  { %17975 = vmatpush3.msk.msra.mxu0 %vm5705_vm11, %v11014_v50  ;;  %17984 = vmatpush3.msk.msra.mxu1 %vm5705_vm11, %v11017_v51  ;;  %v10935_v50 = vrot.slane %v10851_v46, %v19198_v22  ;;  %v11042_v51 = vld [vmem:[%s21848_s14 + $0x150] sm:$0xff] }
 0x80f   :  { %17977 = vmatmul.mubr.msk.f32.vlgmr.msra.gmra.mrb[124].mxu0 %vm5701_vm13, %v10984_v56  ;;  %17986 = vmatmul.mubr.msk.f32.vlgmr.msra.gmra.mrb[124].mxu1 %vm5701_vm13, %v10985_v57  ;;  %v11041_v56 = vld [vmem:[%s21848_s14 + $0x148] sm:$0xf]  ;;  %v10853_v57 = vcombine.high %v10837_v45, %v10837_v45  ;;  %v18857_v61 = vpack.c.bf16 %v11043_v52, %v11042_v51  ;;  %v12604_v45 = vld [vmem:[%s21849_s15 + $0x20] sm:$0xff] }
 0x810   :  { %18832 = vmatprep.subr.bf16.mxu0 %v19048_v4  ;;  %18835 = vmatprep.subr.bf16.mxu1 %v19048_v4  ;;  %v10993_v60 = vmul.f32 %v10935_v50, %v21003_v21  ;;  %v12607_v50 = vld [vmem:[%s21849_s15 + $0x38] sm:$0xff] }
 0x811   :  { %18834 = vmatpush3.bf16.msra.mxu0 %v18833_v58  ;;  %18837 = vmatpush3.bf16.msra.mxu1 %v18836_v59  ;;  %v10855_v58 = vcombine.high %v10851_v46, %v10851_v46  ;;  %v10992_v59 = vmul.f32 %v10931_v49, %v21003_v21  ;;  %v10939_v0 = vrot.slane %v10853_v57, %v19198_v22  ;;  %v12605_v46 = vld [vmem:[%s21849_s15 + $0x28] sm:$0xff]  ;;  %v12606_v49 = vld [vmem:[%s21849_s15 + $0x30] sm:$0xff] }
 0x812   :  { %17992 = vmatprep.subr.mxu0 %v19050_v12  ;;  %18001 = vmatprep.subr.mxu1 %v19050_v12  ;;  %v18881_v53 = vpack.c.bf16 %v12605_v46, %v12604_v45  ;;  %v18884_v54 = vpack.c.bf16 %v12607_v50, %v12606_v49  ;;  %v12624_v49 = vld [vmem:[%s21849_s15 + $0xc0] sm:$0xff]  ;;  %v12625_v50 = vld [vmem:[%s21849_s15 + $0xc8] sm:$0xff] }
 0x813   :  { %17994 = vmatprep.mubr.msk.f32.mxu0 %vm19049_vm0, %v19050_v12  ;;  %18003 = vmatprep.mubr.msk.f32.mxu1 %vm19049_vm0, %v19050_v12  ;;  %v10943_v1 = vrot.slane %v10855_v58, %v19198_v22  ;;  %v10994_v10 = vmul.f32 %v10939_v0, %v21003_v21 }
 0x815   :  { %17993 = vmatpush3.msk.msra.mxu0 %vm5705_vm11, %v11020_v5  ;;  %18002 = vmatpush3.msk.msra.mxu1 %vm5705_vm11, %v11023_v6  ;;  %v11049_v5 = vld [vmem:[%s21848_s14 + $0x188] sm:$0xff]  ;;  %v11051_v6 = vld [vmem:[%s21848_s14 + $0x198] sm:$0xff]  ;;  %v10995_v11 = vmul.f32 %v10943_v1, %v21003_v21 }
 0x816   :  { %17995 = vmatmul.mubr.msk.f32.vlgmr.msra.gmra.mrb[126].mxu0 %vm5701_vm13, %v10986_v48  ;;  %18004 = vmatmul.mubr.msk.f32.vlgmr.msra.gmra.mrb[126].mxu1 %vm5701_vm13, %v10987_v7  ;;  %v11052_v48 = vld [vmem:[%s21848_s14 + $0x1a0] sm:$0xff]  ;;  %v10863_v7 = vcombine.high %v16271_v63, %v16271_v63  ;;  %v18863_v13 = vpack.c.bf16 %v11049_v5, %v11048_v2 }
 0x817   :  { %18838 = vmatprep.subr.bf16.mxu0 %v19048_v4  ;;  %18841 = vmatprep.subr.bf16.mxu1 %v19048_v4  ;;  %v18866_v14 = vpack.c.bf16 %v11052_v48, %v11051_v6 }
 0x818   :  { %18840 = vmatpush3.bf16.msra.mxu0 %v18839_v8  ;;  %18843 = vmatpush3.bf16.msra.mxu1 %v18842_v9  ;;  %v11044_v8 = vld [vmem:[%s21848_s14 + $0x160] sm:$0xf]  ;;  %v11047_v9 = vld [vmem:[%s21848_s14 + $0x178] sm:$0xf]  ;;  %v10877_v17 = vrot.slane %v10863_v7, %v19193_v20 }
 0x819   :  { %18010 = vmatprep.subr.mxu0 %v19050_v12  ;;  %18019 = vmatprep.subr.mxu1 %v19050_v12 }
 0x81a   :  { %18012 = vmatprep.mubr.msk.f32.mxu0 %vm19049_vm0, %v19050_v12  ;;  %18021 = vmatprep.mubr.msk.f32.mxu1 %vm19049_vm0, %v19050_v12  ;;  %v10951_v19 = vrot.slane %v10877_v17, %v19198_v22 }
 0x81c   :  { %18011 = vmatpush3.msk.msra.mxu0 %vm5705_vm11, %v11026_v24  ;;  %18020 = vmatpush3.msk.msra.mxu1 %vm5705_vm11, %v11029_v26  ;;  %v11055_v24 = vld [vmem:[%s21848_s14 + $0x1b8] sm:$0xff]  ;;  %v11057_v26 = vld [vmem:[%s21848_s14 + $0x1c8] sm:$0xff] }
 0x81d   :  { %18013 = vmatmul.mubr.msk.f32.vlgmr.msra.gmra.mrb[128].mxu0 %vm5701_vm13, %v10988_v31  ;;  %18022 = vmatmul.mubr.msk.f32.vlgmr.msra.gmra.mrb[128].mxu1 %vm5701_vm13, %v10989_v32  ;;  %v10878_v31 = vcombine.high %v10870_v16, %v10870_v16  ;;  %v10879_v32 = vcombine.high %v10877_v17, %v10877_v17  ;;  %v18869_v28 = vpack.c.bf16 %v11055_v24, %v11054_v23 }
 0x81e   :  { %18844 = vmatprep.subr.bf16.mxu0 %v19048_v4  ;;  %18847 = vmatprep.subr.bf16.mxu1 %v19048_v4  ;;  %v18872_v15 = vpack.c.bf16 %v11058_v27, %v11057_v26  ;;  %v12616_v26 = vld [vmem:[%s21849_s15 + $0x80] sm:$0xff]  ;;  %v12617_v27 = vld [vmem:[%s21849_s15 + $0x88] sm:$0xff] }
 0x81f   :  { %18846 = vmatpush3.bf16.msra.mxu0 %v18845_v33  ;;  %18849 = vmatpush3.bf16.msra.mxu1 %v18848_v3  ;;  %v10996_v33 = vmul.f32 %v10947_v18, %v21003_v21  ;;  %v10997_v3 = vmul.f32 %v10951_v19, %v21003_v21  ;;  %v10955_v34 = vrot.slane %v10878_v31, %v19198_v22 }
 0x820   :  { %18028 = vmatprep.subr.mxu0 %v19050_v12  ;;  %18037 = vmatprep.subr.mxu1 %v19050_v12  ;;  %v10959_v35 = vrot.slane %v10879_v32, %v19198_v22 }
 0x821   :  { %18030 = vmatprep.mubr.msk.f32.mxu0 %vm19049_vm0, %v19050_v12  ;;  %18039 = vmatprep.mubr.msk.f32.mxu1 %vm19049_vm0, %v19050_v12 }
 0x823   :  { %18029 = vmatpush3.msk.msra.mxu0 %vm5705_vm11, %v11032_v39  ;;  %18038 = vmatpush3.msk.msra.mxu1 %vm5705_vm11, %v11035_v40  ;;  %v11059_v39 = vld [vmem:[%s21848_s14 + $0x1d8] sm:$0xf]  ;;  %v10998_v40 = vmul.f32 %v10955_v34, %v21003_v21 }
 0x824   :  { %18031 = vmatmul.mubr.msk.f32.vlgmr.msra.gmra.mrb[130].mxu0 %vm5701_vm13, %v10990_v41  ;;  %18040 = vmatmul.mubr.msk.f32.vlgmr.msra.gmra.mrb[130].mxu1 %vm5701_vm13, %v10991_v42  ;;  %v10999_v41 = vmul.f32 %v10959_v35, %v21003_v21  ;;  %v18875_v42 = vpack.c.bf16 %v12601_v37, %v12600_v36  ;;  %v12602_v21 = vld [vmem:[%s21849_s15 + $0x10] sm:$0xff]  ;;  %v12620_v36 = vld [vmem:[%s21849_s15 + $0xa0] sm:$0xff]  ;;  %v12621_v37 = vld [vmem:[%s21849_s15 + $0xa8] sm:$0xff] }
 0x825   :  { %18850 = vmatprep.subr.bf16.mxu0 %v19048_v4  ;;  %18853 = vmatprep.subr.bf16.mxu1 %v19048_v4 }
 0x826   :  { %18852 = vmatpush3.bf16.msra.mxu0 %v18851_v43  ;;  %18855 = vmatpush3.bf16.msra.mxu1 %v18854_v44  ;;  %v12603_v43 = vld [vmem:[%s21849_s15 + $0x18] sm:$0xff] }
 0x827   :  { %18046 = vmatprep.subr.mxu0 %v19050_v12  ;;  %18055 = vmatprep.subr.mxu1 %v19050_v12  ;;  %v18878_v44 = vpack.c.bf16 %v12603_v43, %v12602_v21 }
 0x828   :  { %18048 = vmatprep.mubr.msk.f32.mxu0 %vm19049_vm0, %v19050_v12  ;;  %18057 = vmatprep.mubr.msk.f32.mxu1 %vm19049_vm0, %v19050_v12 }
 0x82a   :  { %18047 = vmatpush3.msk.msra.mxu0 %vm5705_vm11, %v11038_v55  ;;  %18056 = vmatpush3.msk.msra.mxu1 %vm5705_vm11, %v11041_v56 }
 0x82b   :  { %18049 = vmatmul.mubr.msk.f32.vlgmr.msra.gmra.mrb[132].mxu0 %vm5701_vm13, %v10992_v59  ;;  %18058 = vmatmul.mubr.msk.f32.vlgmr.msra.gmra.mrb[132].mxu1 %vm5701_vm13, %v10993_v60  ;;  %v12608_v59 = vld [vmem:[%s21849_s15 + $0x40] sm:$0xff]  ;;  %v12609_v60 = vld [vmem:[%s21849_s15 + $0x48] sm:$0xff] }
 0x82c   :  { %18856 = vmatprep.subr.bf16.mxu0 %v19048_v4  ;;  %18859 = vmatprep.subr.bf16.mxu1 %v19048_v4  ;;  %v18887_v1 = vpack.c.bf16 %v12609_v60, %v12608_v59 }
 0x82d   :  { %18858 = vmatpush3.bf16.msra.mxu0 %v18857_v61  ;;  %18861 = vmatpush3.bf16.msra.mxu1 %v18860_v62  ;;  %v12610_v61 = vld [vmem:[%s21849_s15 + $0x50] sm:$0xff]  ;;  %v12611_v62 = vld [vmem:[%s21849_s15 + $0x58] sm:$0xff] }
 0x82e   :  { %18064 = vmatprep.subr.mxu0 %v19050_v12  ;;  %18073 = vmatprep.subr.mxu1 %v19050_v12  ;;  %v18890_v2 = vpack.c.bf16 %v12611_v62, %v12610_v61  ;;  %v12628_v61 = vld [vmem:[%s21849_s15 + $0xe0] sm:$0xff]  ;;  %v12629_v62 = vld [vmem:[%s21849_s15 + $0xe8] sm:$0xff] }
 0x82f   :  { %18066 = vmatprep.mubr.msk.f32.mxu0 %vm19049_vm0, %v19050_v12  ;;  %18075 = vmatprep.mubr.msk.f32.mxu1 %vm19049_vm0, %v19050_v12 }
 0x831   :  { %18065 = vmatpush3.msk.msra.mxu0 %vm5705_vm11, %v11044_v8  ;;  %18074 = vmatpush3.msk.msra.mxu1 %vm5705_vm11, %v11047_v9  ;;  %v12612_v8 = vld [vmem:[%s21849_s15 + $0x60] sm:$0xff]  ;;  %v12613_v9 = vld [vmem:[%s21849_s15 + $0x68] sm:$0xff] }
 0x832   :  { %18067 = vmatmul.mubr.msk.f32.vlgmr.msra.gmra.mrb[134].mxu0 %vm5701_vm13, %v10994_v10  ;;  %18076 = vmatmul.mubr.msk.f32.vlgmr.msra.gmra.mrb[134].mxu1 %vm5701_vm13, %v10995_v11  ;;  %v12614_v10 = vld [vmem:[%s21849_s15 + $0x70] sm:$0xff]  ;;  %v12615_v11 = vld [vmem:[%s21849_s15 + $0x78] sm:$0xff]  ;;  %v18893_v16 = vpack.c.bf16 %v12613_v9, %v12612_v8 }
 0x833   :  { %18862 = vmatprep.subr.bf16.mxu0 %v19048_v4  ;;  %18865 = vmatprep.subr.bf16.mxu1 %v19048_v4  ;;  %v18896_v17 = vpack.c.bf16 %v12615_v11, %v12614_v10  ;;  %v12632_v10 = vld [vmem:[%s21849_s15 + $0x100] sm:$0xff]  ;;  %v12633_v11 = vld [vmem:[%s21849_s15 + $0x108] sm:$0xff] }
 0x834   :  { %18864 = vmatpush3.bf16.msra.mxu0 %v18863_v13  ;;  %18867 = vmatpush3.bf16.msra.mxu1 %v18866_v14 }
 0x835   :  { %18082 = vmatprep.subr.mxu0 %v19050_v12  ;;  %18091 = vmatprep.subr.mxu1 %v19050_v12 }
 0x836   :  { %18084 = vmatprep.mubr.msk.f32.mxu0 %vm19049_vm0, %v19050_v12  ;;  %18093 = vmatprep.mubr.msk.f32.mxu1 %vm19049_vm0, %v19050_v12 }
 0x838   :  { %18083 = vmatpush3.msk.msra.mxu0 %vm5705_vm11, %v11050_v29  ;;  %18092 = vmatpush3.msk.msra.mxu1 %vm5705_vm11, %v11053_v30  ;;  %v12618_v29 = vld [vmem:[%s21849_s15 + $0x90] sm:$0xff]  ;;  %v12619_v30 = vld [vmem:[%s21849_s15 + $0x98] sm:$0xff] }
 0x839   :  { %18085 = vmatmul.mubr.msk.f32.vlgmr.msra.gmra.mrb[136].mxu0 %vm5701_vm13, %v10996_v33  ;;  %18094 = vmatmul.mubr.msk.f32.vlgmr.msra.gmra.mrb[136].mxu1 %vm5701_vm13, %v10997_v3  ;;  %v18899_v33 = vpack.c.bf16 %v12617_v27, %v12616_v26  ;;  %v18902_v3 = vpack.c.bf16 %v12619_v30, %v12618_v29  ;;  %v12636_v29 = vld [vmem:[%s21849_s15 + $0x120] sm:$0xff]  ;;  %v12637_v30 = vld [vmem:[%s21849_s15 + $0x128] sm:$0xff] }
 0x83a   :  { %18868 = vmatprep.subr.bf16.mxu0 %v19048_v4  ;;  %18871 = vmatprep.subr.bf16.mxu1 %v19048_v4 }
 0x83b   :  { %18870 = vmatpush3.bf16.msra.mxu0 %v18869_v28  ;;  %18873 = vmatpush3.bf16.msra.mxu1 %v18872_v15 }
 0x83c   :  { %18100 = vmatprep.subr.mxu0 %v19050_v12  ;;  %18109 = vmatprep.subr.mxu1 %v19050_v12 }
 0x83d   :  { %18102 = vmatprep.mubr.msk.f32.mxu0 %vm19049_vm0, %v19050_v12  ;;  %18111 = vmatprep.mubr.msk.f32.mxu1 %vm19049_vm0, %v19050_v12 }
 0x83f   :  { %18101 = vmatpush3.msk.msra.mxu0 %vm5705_vm11, %v11056_v38  ;;  %18110 = vmatpush3.msk.msra.mxu1 %vm5705_vm11, %v11059_v39  ;;  %v12622_v38 = vld [vmem:[%s21849_s15 + $0xb0] sm:$0xff]  ;;  %v12623_v39 = vld [vmem:[%s21849_s15 + $0xb8] sm:$0xff] }
 0x840   :  { %18103 = vmatmul.mubr.msk.f32.vlgmr.msra.gmra.mrb[138].mxu0 %vm5701_vm13, %v10998_v40  ;;  %18112 = vmatmul.mubr.msk.f32.vlgmr.msra.gmra.mrb[138].mxu1 %vm5701_vm13, %v10999_v41  ;;  %v18908_v21 = vpack.c.bf16 %v12623_v39, %v12622_v38  ;;  %v14120_v38 = vld [vmem:[%s21850_s16] sm:$0xff]  ;;  %v14121_v39 = vld [vmem:[%s21850_s16 + $0x8] sm:$0xff] }
 0x841   :  { %18874 = vmatprep.subr.bf16.mxu0 %v19048_v4  ;;  %18877 = vmatprep.subr.bf16.mxu1 %v19048_v4 }
 0x842   :  { %18876 = vmatpush3.bf16.msra.mxu0 %v18875_v42  ;;  %18118 = vmatprep.mubr.msk.f32.mxu0 %vm19049_vm0, %v19050_v12  ;;  %v18905_v42 = vpack.c.bf16 %v12621_v37, %v12620_v36 }
 0x843   :  { %18125 = vmatprep.mubr.msk.f32.mxu1 %vm19049_vm0, %v19050_v12  ;;  %18880 = vmatprep.subr.bf16.mxu0 %v19048_v4 }
 0x844   :  { %18879 = vmatpush3.bf16.msra.mxu1 %v18878_v44 }
 0x845   :  { %18883 = vmatprep.subr.bf16.mxu1 %v19048_v4 }
 0x8d5   :  { %v11132_v51 = vpop.f32.mrb[120].mxu0  ;;  %v11208_v52 = vpop.f32.mrb[120].mxu1 }
 0x8d6   :  { %v12580_v55 = vmax.f32 %v11132_v51, 0.0  ;;  %v12581_v56 = vmax.f32 %v11208_v52, 0.0  ;;  %v17942_v57 = vpop.f32.mrb[121].mxu0  ;;  %v17951_v58 = vpop.f32.mrb[121].mxu1  ;;  %v12626_v51 = vld [vmem:[%s21849_s15 + $0xd0] sm:$0xff]  ;;  %v12627_v52 = vld [vmem:[%s21849_s15 + $0xd8] sm:$0xff] }
 0x8d8   :  { %18119 = vmatmul.mubr.msk.f32.vlgmr.msra.gmra.mrb[140].mxu0 %vm1913_vm2, %v12580_v55  ;;  %18126 = vmatmul.mubr.msk.f32.vlgmr.msra.gmra.mrb[140].mxu1 %vm1913_vm2, %v12581_v56  ;;  %v18911_v55 = vpack.c.bf16 %v12625_v50, %v12624_v49  ;;  %v18914_v56 = vpack.c.bf16 %v12627_v52, %v12626_v51  ;;  %v14123_v49 = vld [vmem:[%s21850_s16 + $0x18] sm:$0xff]  ;;  %v14124_v51 = vld [vmem:[%s21850_s16 + $0x20] sm:$0xff]  ;;  %v14125_v52 = vld [vmem:[%s21850_s16 + $0x28] sm:$0xff] }
 0x8d9   :  { %18882 = vmatpush3.bf16.msra.mxu0 %v18881_v53  ;;  %18885 = vmatpush3.bf16.msra.mxu1 %v18884_v54 }
 0x8da   :  { %18132 = vmatprep.mubr.msk.f32.mxu0 %vm19049_vm0, %v19050_v12  ;;  %18139 = vmatprep.mubr.msk.f32.mxu1 %vm19049_vm0, %v19050_v12 }
 0x8db   :  { %v11284_v63 = vpop.f32.mrb[122].mxu0  ;;  %v11360_v0 = vpop.f32.mrb[122].mxu1  ;;  %18886 = vmatprep.subr.bf16.mxu0 %v19048_v4  ;;  %18889 = vmatprep.subr.bf16.mxu1 %v19048_v4 }
 0x8dc   :  { %v12582_v5 = vmax.f32 %v11284_v63, 0.0  ;;  %v12583_v6 = vmax.f32 %v11360_v0, 0.0  ;;  %v17960_v48 = vpop.f32.mrb[123].mxu0  ;;  %v17969_v7 = vpop.f32.mrb[123].mxu1  ;;  %v12630_v63 = vld [vmem:[%s21849_s15 + $0xf0] sm:$0xff]  ;;  %v12631_v0 = vld [vmem:[%s21849_s15 + $0xf8] sm:$0xff] }
 0x8de   :  { %18133 = vmatmul.mubr.msk.f32.vlgmr.msra.gmra.mrb[142].mxu0 %vm1913_vm2, %v12582_v5  ;;  %18140 = vmatmul.mubr.msk.f32.vlgmr.msra.gmra.mrb[142].mxu1 %vm1913_vm2, %v12583_v6  ;;  %v18917_v5 = vpack.c.bf16 %v12629_v62, %v12628_v61  ;;  %v18920_v6 = vpack.c.bf16 %v12631_v0, %v12630_v63  ;;  %v14128_v63 = vld [vmem:[%s21850_s16 + $0x40] sm:$0xff]  ;;  %v14129_v0 = vld [vmem:[%s21850_s16 + $0x48] sm:$0xff] }
 0x8df   :  { %18888 = vmatpush3.bf16.msra.mxu0 %v18887_v1  ;;  %18891 = vmatpush3.bf16.msra.mxu1 %v18890_v2 }
 0x8e0   :  { %18146 = vmatprep.mubr.msk.f32.mxu0 %vm19049_vm0, %v19050_v12  ;;  %18153 = vmatprep.mubr.msk.f32.mxu1 %vm19049_vm0, %v19050_v12 }
 0x8e1   :  { %18892 = vmatprep.subr.bf16.mxu0 %v19048_v4  ;;  %18895 = vmatprep.subr.bf16.mxu1 %v19048_v4 }
 0x8e2   :  { %v11436_v13 = vpop.f32.mrb[124].mxu0  ;;  %v11512_v14 = vpop.f32.mrb[124].mxu1 }
 0x8e3   :  { %v12584_v18 = vmax.f32 %v11436_v13, 0.0  ;;  %v12585_v19 = vmax.f32 %v11512_v14, 0.0  ;;  %v17978_v23 = vpop.f32.mrb[125].mxu0  ;;  %v17987_v24 = vpop.f32.mrb[125].mxu1  ;;  %v12634_v13 = vld [vmem:[%s21849_s15 + $0x110] sm:$0xff]  ;;  %v12635_v14 = vld [vmem:[%s21849_s15 + $0x118] sm:$0xff] }
 0x8e5   :  { %18147 = vmatmul.mubr.msk.f32.vlgmr.msra.gmra.mrb[144].mxu0 %vm1913_vm2, %v12584_v18  ;;  %18154 = vmatmul.mubr.msk.f32.vlgmr.msra.gmra.mrb[144].mxu1 %vm1913_vm2, %v12585_v19  ;;  %v18923_v18 = vpack.c.bf16 %v12633_v11, %v12632_v10  ;;  %v18926_v19 = vpack.c.bf16 %v12635_v14, %v12634_v13  ;;  %v14132_v13 = vld [vmem:[%s21850_s16 + $0x60] sm:$0xff]  ;;  %v14133_v14 = vld [vmem:[%s21850_s16 + $0x68] sm:$0xff] }
 0x8e6   :  { %18894 = vmatpush3.bf16.msra.mxu0 %v18893_v16  ;;  %18897 = vmatpush3.bf16.msra.mxu1 %v18896_v17 }
 0x8e7   :  { %18160 = vmatprep.mubr.msk.f32.mxu0 %vm19049_vm0, %v19050_v12  ;;  %18167 = vmatprep.mubr.msk.f32.mxu1 %vm19049_vm0, %v19050_v12 }
 0x8e8   :  { %18898 = vmatprep.subr.bf16.mxu0 %v19048_v4  ;;  %18901 = vmatprep.subr.bf16.mxu1 %v19048_v4 }
 0x8e9   :  { %v11588_v31 = vpop.f32.mrb[126].mxu0  ;;  %v11664_v32 = vpop.f32.mrb[126].mxu1 }
 0x8ea   :  { %v12586_v28 = vmax.f32 %v11588_v31, 0.0  ;;  %v12587_v15 = vmax.f32 %v11664_v32, 0.0  ;;  %v17996_v34 = vpop.f32.mrb[127].mxu0  ;;  %v18005_v35 = vpop.f32.mrb[127].mxu1  ;;  %v12638_v31 = vld [vmem:[%s21849_s15 + $0x130] sm:$0xff]  ;;  %v12639_v32 = vld [vmem:[%s21849_s15 + $0x138] sm:$0xff] }
 0x8ec   :  { %18161 = vmatmul.mubr.msk.f32.vlgmr.msra.gmra.mrb[146].mxu0 %vm1913_vm2, %v12586_v28  ;;  %18168 = vmatmul.mubr.msk.f32.vlgmr.msra.gmra.mrb[146].mxu1 %vm1913_vm2, %v12587_v15  ;;  %v18929_v28 = vpack.c.bf16 %v12637_v30, %v12636_v29  ;;  %v18932_v15 = vpack.c.bf16 %v12639_v32, %v12638_v31  ;;  %v14136_v31 = vld [vmem:[%s21850_s16 + $0x80] sm:$0xff]  ;;  %v14137_v32 = vld [vmem:[%s21850_s16 + $0x88] sm:$0xff] }
 0x8ed   :  { %18900 = vmatpush3.bf16.msra.mxu0 %v18899_v33  ;;  %18903 = vmatpush3.bf16.msra.mxu1 %v18902_v3 }
 0x8ee   :  { %18174 = vmatprep.mubr.msk.f32.mxu0 %vm19049_vm0, %v19050_v12  ;;  %18181 = vmatprep.mubr.msk.f32.mxu1 %vm19049_vm0, %v19050_v12 }
 0x8ef   :  { %18904 = vmatprep.subr.bf16.mxu0 %v19048_v4  ;;  %18907 = vmatprep.subr.bf16.mxu1 %v19048_v4 }
 0x8f0   :  { %v11740_v40 = vpop.f32.mrb[128].mxu0  ;;  %v11816_v41 = vpop.f32.mrb[128].mxu1 }
 0x8f1   :  { %v12588_v43 = vmax.f32 %v11740_v40, 0.0  ;;  %v12589_v44 = vmax.f32 %v11816_v41, 0.0  ;;  %v18014_v45 = vpop.f32.mrb[129].mxu0  ;;  %v18023_v46 = vpop.f32.mrb[129].mxu1 }
 0x8f2   :  { %v14122_v46 = vld [vmem:[%s21850_s16 + $0x10] sm:$0xff] }
 0x8f3   :  { %18175 = vmatmul.mubr.msk.f32.vlgmr.msra.gmra.mrb[148].mxu0 %vm1913_vm2, %v12588_v43  ;;  %18182 = vmatmul.mubr.msk.f32.vlgmr.msra.gmra.mrb[148].mxu1 %vm1913_vm2, %v12589_v44  ;;  %v18938_v50 = vpack.c.bf16 %v14123_v49, %v14122_v46 }
 0x8f4   :  { %18906 = vmatpush3.bf16.msra.mxu0 %v18905_v42  ;;  %18909 = vmatpush3.bf16.msra.mxu1 %v18908_v21  ;;  %v18935_v42 = vpack.c.bf16 %v14121_v39, %v14120_v38 }
 0x8f5   :  { %18188 = vmatprep.mubr.msk.f32.mxu0 %vm19049_vm0, %v19050_v12  ;;  %18195 = vmatprep.mubr.msk.f32.mxu1 %vm19049_vm0, %v19050_v12 }
 0x8f6   :  { %18910 = vmatprep.subr.bf16.mxu0 %v19048_v4  ;;  %18913 = vmatprep.subr.bf16.mxu1 %v19048_v4 }
 0x8f7   :  { %v11892_v53 = vpop.f32.mrb[130].mxu0  ;;  %v11968_v54 = vpop.f32.mrb[130].mxu1 }
 0x8f8   :  { %v12590_v57 = vmax.f32 %v11892_v53, 0.0  ;;  %v12591_v58 = vmax.f32 %v11968_v54, 0.0  ;;  %v18032_v59 = vpop.f32.mrb[131].mxu0  ;;  %v18041_v60 = vpop.f32.mrb[131].mxu1  ;;  %v14126_v53 = vld [vmem:[%s21850_s16 + $0x30] sm:$0xff]  ;;  %v14127_v54 = vld [vmem:[%s21850_s16 + $0x38] sm:$0xff] }
 0x8fa   :  { %18189 = vmatmul.mubr.msk.f32.vlgmr.msra.gmra.mrb[150].mxu0 %vm1913_vm2, %v12590_v57  ;;  %18196 = vmatmul.mubr.msk.f32.vlgmr.msra.gmra.mrb[150].mxu1 %vm1913_vm2, %v12591_v58  ;;  %v18941_v57 = vpack.c.bf16 %v14125_v52, %v14124_v51  ;;  %v18944_v58 = vpack.c.bf16 %v14127_v54, %v14126_v53  ;;  %v14144_v53 = vld [vmem:[%s21850_s16 + $0xc0] sm:$0xff]  ;;  %v14145_v54 = vld [vmem:[%s21850_s16 + $0xc8] sm:$0xff] }
 0x8fb   :  { %18912 = vmatpush3.bf16.msra.mxu0 %v18911_v55  ;;  %18915 = vmatpush3.bf16.msra.mxu1 %v18914_v56 }
 0x8fc   :  { %18202 = vmatprep.mubr.msk.f32.mxu0 %vm19049_vm0, %v19050_v12  ;;  %18209 = vmatprep.mubr.msk.f32.mxu1 %vm19049_vm0, %v19050_v12 }
 0x8fd   :  { %18916 = vmatprep.subr.bf16.mxu0 %v19048_v4  ;;  %18919 = vmatprep.subr.bf16.mxu1 %v19048_v4 }
 0x8fe   :  { %v12044_v1 = vpop.f32.mrb[132].mxu0  ;;  %v12120_v2 = vpop.f32.mrb[132].mxu1 }
 0x8ff   :  { %v12592_v48 = vmax.f32 %v12044_v1, 0.0  ;;  %v12593_v7 = vmax.f32 %v12120_v2, 0.0  ;;  %v18050_v8 = vpop.f32.mrb[133].mxu0  ;;  %v18059_v9 = vpop.f32.mrb[133].mxu1  ;;  %v14130_v1 = vld [vmem:[%s21850_s16 + $0x50] sm:$0xff]  ;;  %v14131_v2 = vld [vmem:[%s21850_s16 + $0x58] sm:$0xff] }
 0x901   :  { %18203 = vmatmul.mubr.msk.f32.vlgmr.msra.gmra.mrb[152].mxu0 %vm1913_vm2, %v12592_v48  ;;  %18210 = vmatmul.mubr.msk.f32.vlgmr.msra.gmra.mrb[152].mxu1 %vm1913_vm2, %v12593_v7  ;;  %v18947_v48 = vpack.c.bf16 %v14129_v0, %v14128_v63  ;;  %v18950_v7 = vpack.c.bf16 %v14131_v2, %v14130_v1  ;;  %v14148_v1 = vld [vmem:[%s21850_s16 + $0xe0] sm:$0xff]  ;;  %v14149_v2 = vld [vmem:[%s21850_s16 + $0xe8] sm:$0xff] }
 0x902   :  { %18918 = vmatpush3.bf16.msra.mxu0 %v18917_v5  ;;  %18921 = vmatpush3.bf16.msra.mxu1 %v18920_v6 }
 0x903   :  { %18216 = vmatprep.mubr.msk.f32.mxu0 %vm19049_vm0, %v19050_v12  ;;  %18223 = vmatprep.mubr.msk.f32.mxu1 %vm19049_vm0, %v19050_v12 }
 0x904   :  { %18922 = vmatprep.subr.bf16.mxu0 %v19048_v4  ;;  %18925 = vmatprep.subr.bf16.mxu1 %v19048_v4 }
 0x905   :  { %v12196_v16 = vpop.f32.mrb[134].mxu0  ;;  %v12272_v17 = vpop.f32.mrb[134].mxu1 }
 0x906   :  { %v12594_v23 = vmax.f32 %v12196_v16, 0.0  ;;  %v12595_v24 = vmax.f32 %v12272_v17, 0.0  ;;  %v18068_v26 = vpop.f32.mrb[135].mxu0  ;;  %v18077_v27 = vpop.f32.mrb[135].mxu1  ;;  %v14134_v16 = vld [vmem:[%s21850_s16 + $0x70] sm:$0xff]  ;;  %v14135_v17 = vld [vmem:[%s21850_s16 + $0x78] sm:$0xff] }
 0x908   :  { %18217 = vmatmul.mubr.msk.f32.vlgmr.msra.gmra.mrb[154].mxu0 %vm1913_vm2, %v12594_v23  ;;  %18224 = vmatmul.mubr.msk.f32.vlgmr.msra.gmra.mrb[154].mxu1 %vm1913_vm2, %v12595_v24  ;;  %v18953_v23 = vpack.c.bf16 %v14133_v14, %v14132_v13  ;;  %v18956_v24 = vpack.c.bf16 %v14135_v17, %v14134_v16  ;;  %v14152_v16 = vld [vmem:[%s21850_s16 + $0x100] sm:$0xff]  ;;  %v14153_v17 = vld [vmem:[%s21850_s16 + $0x108] sm:$0xff] }
 0x909   :  { %18924 = vmatpush3.bf16.msra.mxu0 %v18923_v18  ;;  %18927 = vmatpush3.bf16.msra.mxu1 %v18926_v19 }
 0x90a   :  { %18230 = vmatprep.mubr.msk.f32.mxu0 %vm19049_vm0, %v19050_v12  ;;  %18237 = vmatprep.mubr.msk.f32.mxu1 %vm19049_vm0, %v19050_v12 }
 0x90b   :  { %18928 = vmatprep.subr.bf16.mxu0 %v19048_v4  ;;  %18931 = vmatprep.subr.bf16.mxu1 %v19048_v4 }
 0x90c   :  { %v12348_v33 = vpop.f32.mrb[136].mxu0  ;;  %v12424_v3 = vpop.f32.mrb[136].mxu1 }
 0x90d   :  { %v12596_v34 = vmax.f32 %v12348_v33, 0.0  ;;  %v12597_v35 = vmax.f32 %v12424_v3, 0.0  ;;  %v18086_v36 = vpop.f32.mrb[137].mxu0  ;;  %v18095_v37 = vpop.f32.mrb[137].mxu1  ;;  %v14138_v33 = vld [vmem:[%s21850_s16 + $0x90] sm:$0xff]  ;;  %v14139_v3 = vld [vmem:[%s21850_s16 + $0x98] sm:$0xff] }
 0x90f   :  { %18231 = vmatmul.mubr.msk.f32.vlgmr.msra.gmra.mrb[156].mxu0 %vm1913_vm2, %v12596_v34  ;;  %18238 = vmatmul.mubr.msk.f32.vlgmr.msra.gmra.mrb[156].mxu1 %vm1913_vm2, %v12597_v35  ;;  %v18959_v34 = vpack.c.bf16 %v14137_v32, %v14136_v31  ;;  %v18962_v35 = vpack.c.bf16 %v14139_v3, %v14138_v33  ;;  %v14156_v33 = vld [vmem:[%s21850_s16 + $0x120] sm:$0xff]  ;;  %v14157_v3 = vld [vmem:[%s21850_s16 + $0x128] sm:$0xff] }
 0x910   :  { %18930 = vmatpush3.bf16.msra.mxu0 %v18929_v28  ;;  %18933 = vmatpush3.bf16.msra.mxu1 %v18932_v15 }
 0x911   :  { %18244 = vmatprep.mubr.msk.f32.mxu0 %vm19049_vm0, %v19050_v12  ;;  %18251 = vmatprep.mubr.msk.f32.mxu1 %vm19049_vm0, %v19050_v12 }
 0x912   :  { %18934 = vmatprep.subr.bf16.mxu0 %v19048_v4  ;;  %18937 = vmatprep.subr.bf16.mxu1 %v19048_v4 }
 0x913   :  { %v12500_v40 = vpop.f32.mrb[138].mxu0  ;;  %v12576_v41 = vpop.f32.mrb[138].mxu1 }
 0x914   :  { %v12598_v21 = vmax.f32 %v12500_v40, 0.0  ;;  %v12599_v43 = vmax.f32 %v12576_v41, 0.0  ;;  %v18104_v44 = vpop.f32.mrb[139].mxu0  ;;  %v18113_v45 = vpop.f32.mrb[139].mxu1  ;;  %v14140_v40 = vld [vmem:[%s21850_s16 + $0xa0] sm:$0xff]  ;;  %v14141_v41 = vld [vmem:[%s21850_s16 + $0xa8] sm:$0xff] }
 0x915   :  { %v18965_v45 = vpack.c.bf16 %v14141_v41, %v14140_v40 }
 0x916   :  { %18245 = vmatmul.mubr.msk.f32.vlgmr.msra.gmra.mrb[158].mxu0 %vm1913_vm2, %v12598_v21  ;;  %18252 = vmatmul.mubr.msk.f32.vlgmr.msra.gmra.mrb[158].mxu1 %vm1913_vm2, %v12599_v43  ;;  %v14143_v21 = vld [vmem:[%s21850_s16 + $0xb8] sm:$0xff] }
 0x917   :  { %18936 = vmatpush3.bf16.msra.mxu0 %v18935_v42  ;;  %18258 = vmatprep.mubr.msk.f32.mxu0 %vm19049_vm0, %v19050_v12  ;;  %v14142_v42 = vld [vmem:[%s21850_s16 + $0xb0] sm:$0xff] }
 0x918   :  { %18265 = vmatprep.mubr.msk.f32.mxu1 %vm19049_vm0, %v19050_v12  ;;  %18940 = vmatprep.subr.bf16.mxu0 %v19048_v4  ;;  %v18968_v46 = vpack.c.bf16 %v14143_v21, %v14142_v42 }
 0x919   :  { %18939 = vmatpush3.bf16.msra.mxu1 %v18938_v50 }
 0x91a   :  { %18943 = vmatprep.subr.bf16.mxu1 %v19048_v4 }
 0x9ab   :  { %v12709_v55 = vpop.f32.mrb[140].mxu0  ;;  %v12782_v56 = vpop.f32.mrb[140].mxu1 }
 0x9ac   :  { %v14100_v59 = vmax.f32 %v12709_v55, 0.0  ;;  %v14101_v60 = vmax.f32 %v12782_v56, 0.0  ;;  %v18120_v61 = vpop.f32.mrb[141].mxu0  ;;  %v18127_v62 = vpop.f32.mrb[141].mxu1  ;;  %v14146_v55 = vld [vmem:[%s21850_s16 + $0xd0] sm:$0xff]  ;;  %v14147_v56 = vld [vmem:[%s21850_s16 + $0xd8] sm:$0xff] }
 0x9ae   :  { %18259 = vmatmul.mubr.msk.f32.vlgmr.msra.gmra.mrb[160].mxu0 %vm1913_vm2, %v14100_v59  ;;  %18266 = vmatmul.mubr.msk.f32.vlgmr.msra.gmra.mrb[160].mxu1 %vm1913_vm2, %v14101_v60  ;;  %v18971_v59 = vpack.c.bf16 %v14145_v54, %v14144_v53  ;;  %v18974_v60 = vpack.c.bf16 %v14147_v56, %v14146_v55 }
 0x9af   :  { %18942 = vmatpush3.bf16.msra.mxu0 %v18941_v57  ;;  %18945 = vmatpush3.bf16.msra.mxu1 %v18944_v58 }
 0x9b0   :  { %18272 = vmatprep.mubr.msk.f32.mxu0 %vm19049_vm0, %v19050_v12  ;;  %18279 = vmatprep.mubr.msk.f32.mxu1 %vm19049_vm0, %v19050_v12 }
 0x9b1   :  { %v12855_v5 = vpop.f32.mrb[142].mxu0  ;;  %v12928_v6 = vpop.f32.mrb[142].mxu1  ;;  %18946 = vmatprep.subr.bf16.mxu0 %v19048_v4  ;;  %18949 = vmatprep.subr.bf16.mxu1 %v19048_v4 }
 0x9b2   :  { %v14102_v8 = vmax.f32 %v12855_v5, 0.0  ;;  %v14103_v9 = vmax.f32 %v12928_v6, 0.0  ;;  %v18134_v10 = vpop.f32.mrb[143].mxu0  ;;  %v18141_v11 = vpop.f32.mrb[143].mxu1  ;;  %v14150_v5 = vld [vmem:[%s21850_s16 + $0xf0] sm:$0xff]  ;;  %v14151_v6 = vld [vmem:[%s21850_s16 + $0xf8] sm:$0xff] }
 0x9b4   :  { %18273 = vmatmul.mubr.msk.f32.vlgmr.msra.gmra.mrb[162].mxu0 %vm1913_vm2, %v14102_v8  ;;  %18280 = vmatmul.mubr.msk.f32.vlgmr.msra.gmra.mrb[162].mxu1 %vm1913_vm2, %v14103_v9  ;;  %v18977_v8 = vpack.c.bf16 %v14149_v2, %v14148_v1  ;;  %v18980_v9 = vpack.c.bf16 %v14151_v6, %v14150_v5 }
 0x9b5   :  { %18948 = vmatpush3.bf16.msra.mxu0 %v18947_v48  ;;  %18951 = vmatpush3.bf16.msra.mxu1 %v18950_v7 }
 0x9b6   :  { %18286 = vmatprep.mubr.msk.f32.mxu0 %vm19049_vm0, %v19050_v12  ;;  %18293 = vmatprep.mubr.msk.f32.mxu1 %vm19049_vm0, %v19050_v12 }
 0x9b7   :  { %18952 = vmatprep.subr.bf16.mxu0 %v19048_v4  ;;  %18955 = vmatprep.subr.bf16.mxu1 %v19048_v4 }
 0x9b8   :  { %v13001_v18 = vpop.f32.mrb[144].mxu0  ;;  %v13074_v19 = vpop.f32.mrb[144].mxu1 }
 0x9b9   :  { %v14104_v26 = vmax.f32 %v13001_v18, 0.0  ;;  %v14105_v27 = vmax.f32 %v13074_v19, 0.0  ;;  %v18148_v29 = vpop.f32.mrb[145].mxu0  ;;  %v18155_v30 = vpop.f32.mrb[145].mxu1  ;;  %v14154_v18 = vld [vmem:[%s21850_s16 + $0x110] sm:$0xff]  ;;  %v14155_v19 = vld [vmem:[%s21850_s16 + $0x118] sm:$0xff] }
 0x9bb   :  { %18287 = vmatmul.mubr.msk.f32.vlgmr.msra.gmra.mrb[164].mxu0 %vm1913_vm2, %v14104_v26  ;;  %18294 = vmatmul.mubr.msk.f32.vlgmr.msra.gmra.mrb[164].mxu1 %vm1913_vm2, %v14105_v27  ;;  %v18983_v26 = vpack.c.bf16 %v14153_v17, %v14152_v16  ;;  %v18986_v27 = vpack.c.bf16 %v14155_v19, %v14154_v18 }
 0x9bc   :  { %18954 = vmatpush3.bf16.msra.mxu0 %v18953_v23  ;;  %18957 = vmatpush3.bf16.msra.mxu1 %v18956_v24 }
 0x9bd   :  { %18300 = vmatprep.mubr.msk.f32.mxu0 %vm19049_vm0, %v19050_v12  ;;  %18307 = vmatprep.mubr.msk.f32.mxu1 %vm19049_vm0, %v19050_v12 }
 0x9be   :  { %18958 = vmatprep.subr.bf16.mxu0 %v19048_v4  ;;  %18961 = vmatprep.subr.bf16.mxu1 %v19048_v4 }
 0x9bf   :  { %v13147_v28 = vpop.f32.mrb[146].mxu0  ;;  %v13220_v15 = vpop.f32.mrb[146].mxu1 }
 0x9c0   :  { %v14106_v36 = vmax.f32 %v13147_v28, 0.0  ;;  %v14107_v37 = vmax.f32 %v13220_v15, 0.0  ;;  %v18162_v38 = vpop.f32.mrb[147].mxu0  ;;  %v18169_v39 = vpop.f32.mrb[147].mxu1  ;;  %v14158_v28 = vld [vmem:[%s21850_s16 + $0x130] sm:$0xff]  ;;  %v14159_v15 = vld [vmem:[%s21850_s16 + $0x138] sm:$0xff] }
 0x9c2   :  { %18301 = vmatmul.mubr.msk.f32.vlgmr.msra.gmra.mrb[166].mxu0 %vm1913_vm2, %v14106_v36  ;;  %18308 = vmatmul.mubr.msk.f32.vlgmr.msra.gmra.mrb[166].mxu1 %vm1913_vm2, %v14107_v37  ;;  %v18989_v36 = vpack.c.bf16 %v14157_v3, %v14156_v33  ;;  %v18992_v37 = vpack.c.bf16 %v14159_v15, %v14158_v28 }
 0x9c3   :  { %18960 = vmatpush3.bf16.msra.mxu0 %v18959_v34  ;;  %18963 = vmatpush3.bf16.msra.mxu1 %v18962_v35 }
 0x9c4   :  { %18314 = vmatprep.mubr.msk.f32.mxu0 %vm19049_vm0, %v19050_v12  ;;  %18321 = vmatprep.mubr.msk.f32.mxu1 %vm19049_vm0, %v19050_v12 }
 0x9c5   :  { %18964 = vmatprep.subr.bf16.mxu0 %v19048_v4  ;;  %18967 = vmatprep.subr.bf16.mxu1 %v19048_v4 }
 0x9c6   :  { %v13293_v43 = vpop.f32.mrb[148].mxu0  ;;  %v13366_v44 = vpop.f32.mrb[148].mxu1 }
 0x9c7   :  { %v14108_v49 = vmax.f32 %v13293_v43, 0.0  ;;  %v14109_v50 = vmax.f32 %v13366_v44, 0.0  ;;  %v18176_v51 = vpop.f32.mrb[149].mxu0  ;;  %v18183_v52 = vpop.f32.mrb[149].mxu1 }
 0x9c9   :  { %18315 = vmatmul.mubr.msk.f32.vlgmr.msra.gmra.mrb[168].mxu0 %vm1913_vm2, %v14108_v49  ;;  %18322 = vmatmul.mubr.msk.f32.vlgmr.msra.gmra.mrb[168].mxu1 %vm1913_vm2, %v14109_v50 }
 0x9ca   :  { %18966 = vmatpush3.bf16.msra.mxu0 %v18965_v45  ;;  %18969 = vmatpush3.bf16.msra.mxu1 %v18968_v46  ;;  %v15640_v46 = vld [vmem:[%s21851_s17] sm:$0xff] }
 0x9cb   :  { %18328 = vmatprep.mubr.msk.f32.mxu0 %vm19049_vm0, %v19050_v12  ;;  %18335 = vmatprep.mubr.msk.f32.mxu1 %vm19049_vm0, %v19050_v12  ;;  %v15653_v49 = vrot.slane %v15640_v46, %v19193_v20  ;;  %v15646_v55 = vcombine.high %v15640_v46, %v15640_v46 }
 0x9cc   :  { %18970 = vmatprep.subr.bf16.mxu0 %v19048_v4  ;;  %18973 = vmatprep.subr.bf16.mxu1 %v19048_v4 }
 0x9cd   :  { %v13439_v57 = vpop.f32.mrb[150].mxu0  ;;  %v13512_v58 = vpop.f32.mrb[150].mxu1  ;;  %v15661_v50 = vcombine.high %v15653_v49, %v15653_v49  ;;  %v15669_v51 = vrot.slane %v15653_v49, %v19193_v20 }
 0x9ce   :  { %v14110_v61 = vmax.f32 %v13439_v57, 0.0  ;;  %v14111_v62 = vmax.f32 %v13512_v58, 0.0  ;;  %v18190_v63 = vpop.f32.mrb[151].mxu0  ;;  %v18197_v0 = vpop.f32.mrb[151].mxu1 }
 0x9cf   :  { %v15771_v52 = vrot.slane %v15669_v51, %v19198_v22  ;;  %v15660_v0 = vrot.slane %v15646_v55, %v19193_v20 }
 0x9d0   :  { %18329 = vmatmul.mubr.msk.f32.vlgmr.msra.gmra.mrb[170].mxu0 %vm1913_vm2, %v14110_v61  ;;  %18336 = vmatmul.mubr.msk.f32.vlgmr.msra.gmra.mrb[170].mxu1 %vm1913_vm2, %v14111_v62  ;;  %v15691_v61 = vcombine.high %v15669_v51, %v15669_v51 }
 0x9d1   :  { %18972 = vmatpush3.bf16.msra.mxu0 %v18971_v59  ;;  %18975 = vmatpush3.bf16.msra.mxu1 %v18974_v60  ;;  %v15676_v17 = vrot.slane %v15660_v0, %v19193_v20 }
 0x9d2   :  { %18342 = vmatprep.mubr.msk.f32.mxu0 %vm19049_vm0, %v19050_v12  ;;  %18349 = vmatprep.mubr.msk.f32.mxu1 %vm19049_vm0, %v19050_v12  ;;  %v15779_v5 = vrot.slane %v15691_v61, %v19198_v22 }
 0x9d3   :  { %18976 = vmatprep.subr.bf16.mxu0 %v19048_v4  ;;  %18979 = vmatprep.subr.bf16.mxu1 %v19048_v4  ;;  %v15692_v33 = vcombine.high %v15676_v17, %v15676_v17 }
 0x9d4   :  { %v13585_v48 = vpop.f32.mrb[152].mxu0  ;;  %v13658_v7 = vpop.f32.mrb[152].mxu1 }
 0x9d5   :  { %v14112_v10 = vmax.f32 %v13585_v48, 0.0  ;;  %v14113_v11 = vmax.f32 %v13658_v7, 0.0  ;;  %v18204_v13 = vpop.f32.mrb[153].mxu0  ;;  %v18211_v14 = vpop.f32.mrb[153].mxu1 }
 0x9d7   :  { %18343 = vmatmul.mubr.msk.f32.vlgmr.msra.gmra.mrb[172].mxu0 %vm1913_vm2, %v14112_v10  ;;  %18350 = vmatmul.mubr.msk.f32.vlgmr.msra.gmra.mrb[172].mxu1 %vm1913_vm2, %v14113_v11  ;;  %v15662_v11 = vcombine.high %v15660_v0, %v15660_v0 }
 0x9d8   :  { %18978 = vmatpush3.bf16.msra.mxu0 %v18977_v8  ;;  %18981 = vmatpush3.bf16.msra.mxu1 %v18980_v9 }
 0x9d9   :  { %18356 = vmatprep.mubr.msk.f32.mxu0 %vm19049_vm0, %v19050_v12  ;;  %18363 = vmatprep.mubr.msk.f32.mxu1 %vm19049_vm0, %v19050_v12 }
 0x9da   :  { %18982 = vmatprep.subr.bf16.mxu0 %v19048_v4  ;;  %18985 = vmatprep.subr.bf16.mxu1 %v19048_v4 }
 0x9db   :  { %v13731_v23 = vpop.f32.mrb[154].mxu0  ;;  %v13804_v24 = vpop.f32.mrb[154].mxu1 }
 0x9dc   :  { %v14114_v29 = vmax.f32 %v13731_v23, 0.0  ;;  %v14115_v30 = vmax.f32 %v13804_v24, 0.0  ;;  %v18218_v31 = vpop.f32.mrb[155].mxu0  ;;  %v18225_v32 = vpop.f32.mrb[155].mxu1 }
 0x9de   :  { %18357 = vmatmul.mubr.msk.f32.vlgmr.msra.gmra.mrb[174].mxu0 %vm1913_vm2, %v14114_v29  ;;  %18364 = vmatmul.mubr.msk.f32.vlgmr.msra.gmra.mrb[174].mxu1 %vm1913_vm2, %v14115_v30  ;;  %v15641_v29 = vld [vmem:[%s21851_s17 + $0x8] sm:$0xff] }
 0x9df   :  { %18984 = vmatpush3.bf16.msra.mxu0 %v18983_v26  ;;  %18987 = vmatpush3.bf16.msra.mxu1 %v18986_v27  ;;  %v15787_v26 = vrot.slane %v15676_v17, %v19198_v22  ;;  %v15690_v27 = vrot.slane %v15662_v11, %v19193_v20  ;;  %v15702_v28 = vrot.slane %v15641_v29, %v19193_v20 }
 0x9e0   :  { %18370 = vmatprep.mubr.msk.f32.mxu0 %vm19049_vm0, %v19050_v12  ;;  %18377 = vmatprep.mubr.msk.f32.mxu1 %vm19049_vm0, %v19050_v12 }
 0x9e1   :  { %18988 = vmatprep.subr.bf16.mxu0 %v19048_v4  ;;  %18991 = vmatprep.subr.bf16.mxu1 %v19048_v4  ;;  %v15694_v3 = vcombine.high %v15690_v27, %v15690_v27  ;;  %v15718_v46 = vrot.slane %v15702_v28, %v19193_v20 }
 0x9e2   :  { %v13877_v34 = vpop.f32.mrb[156].mxu0  ;;  %v13950_v35 = vpop.f32.mrb[156].mxu1 }
 0x9e3   :  { %v14116_v38 = vmax.f32 %v13877_v34, 0.0  ;;  %v14117_v39 = vmax.f32 %v13950_v35, 0.0  ;;  %v18232_v40 = vpop.f32.mrb[157].mxu0  ;;  %v18239_v41 = vpop.f32.mrb[157].mxu1 }
 0x9e4   :  { %v15799_v40 = vrot.slane %v15694_v3, %v19198_v22  ;;  %v15710_v41 = vcombine.high %v15702_v28, %v15702_v28 }
 0x9e5   :  { %18371 = vmatmul.mubr.msk.f32.vlgmr.msra.gmra.mrb[176].mxu0 %vm1913_vm2, %v14116_v38  ;;  %18378 = vmatmul.mubr.msk.f32.vlgmr.msra.gmra.mrb[176].mxu1 %vm1913_vm2, %v14117_v39 }
 0x9e6   :  { %18990 = vmatpush3.bf16.msra.mxu0 %v18989_v36  ;;  %18993 = vmatpush3.bf16.msra.mxu1 %v18992_v37  ;;  %v15791_v36 = vrot.slane %v15690_v27, %v19198_v22  ;;  %v15795_v37 = vrot.slane %v15692_v33, %v19198_v22 }
 0x9e7   :  { %18384 = vmatprep.mubr.msk.f32.mxu0 %vm19049_vm0, %v19050_v12  ;;  %18391 = vmatprep.mubr.msk.f32.mxu1 %vm19049_vm0, %v19050_v12  ;;  %v15683_v12 = vrot.slane %v15661_v50, %v19193_v20 }
 0x9e9   :  { %v14023_v4 = vpop.f32.mrb[158].mxu0  ;;  %v14096_v42 = vpop.f32.mrb[158].mxu1  ;;  %v15775_v60 = vrot.slane %v15683_v12, %v19198_v22  ;;  %v15693_v63 = vcombine.high %v15683_v12, %v15683_v12 }
 0x9ea   :  { %v14118_v21 = vmax.f32 %v14023_v4, 0.0  ;;  %v14119_v43 = vmax.f32 %v14096_v42, 0.0  ;;  %v18246_v44 = vpop.f32.mrb[159].mxu0  ;;  %v18253_v45 = vpop.f32.mrb[159].mxu1 }
 0x9eb   :  { %v15783_v10 = vrot.slane %v15693_v63, %v19198_v22  ;;  %v15740_v63 = vcombine.high %v15718_v46, %v15718_v46 }
 0x9ec   :  { %18385 = vmatmul.mubr.msk.f32.vlgmr.msra.gmra.mrb[178].mxu0 %vm1913_vm2, %v14118_v21  ;;  %18392 = vmatmul.mubr.msk.f32.vlgmr.msra.gmra.mrb[178].mxu1 %vm1913_vm2, %v14119_v43 }
 0xa81   :  { %v14229_v53 = vpop.f32.mrb[160].mxu0  ;;  %v14302_v54 = vpop.f32.mrb[160].mxu1 }
 0xa82   :  { %v15620_v56 = vmax.f32 %v14229_v53, 0.0  ;;  %v15621_v57 = vmax.f32 %v14302_v54, 0.0  ;;  %v18260_v58 = vpop.f32.mrb[161].mxu0  ;;  %v18267_v59 = vpop.f32.mrb[161].mxu1  ;;  %v15803_v53 = vrot.slane %v15718_v46, %v19198_v22 }
 0xa83   :  { %v15695_v59 = vcombine.high %v15641_v29, %v15641_v29 }
 0xa84   :  { %v15868_v62 = vmul.f32 %v15771_v52, %v15620_v56  ;;  %v15869_v2 = vmul.f32 %v15775_v60, %v15621_v57  ;;  %v15732_v52 = vrot.slane %v15710_v41, %v19193_v20 }
 0xa86   :  { %v15888_v1 = vsel %vm5162_vm3, %v15868_v62, 0.0  ;;  %v15891_v14 = vsel %vm5162_vm3, %v15869_v2, 0.0  ;;  %v15807_v62 = vrot.slane %v15732_v52, %v19198_v22  ;;  %v15709_v2 = vrot.slane %v15695_v59, %v19193_v20 }
 0xa87   :  { %v14375_v6 = vpop.f32.mrb[162].mxu0  ;;  %v14448_v48 = vpop.f32.mrb[162].mxu1  ;;  %15889 = vadd.xlane.f32.xlu0 %v15888_v1  ;;  %v15742_v1 = vcombine.high %v15732_v52, %v15732_v52 }
 0xa88   :  { %v15622_v7 = vmax.f32 %v14375_v6, 0.0  ;;  %v18281_v8 = vpop.f32.mrb[163].mxu1  ;;  %v18274_v9 = vpop.f32.mrb[163].mxu0  ;;  %v15623_v13 = vmax.f32 %v14448_v48, 0.0  ;;  %v15811_v48 = vrot.slane %v15740_v63, %v19198_v22 }
 0xa8a   :  { %v15870_v16 = vmul.f32 %v15779_v5, %v15622_v7  ;;  %v15871_v24 = vmul.f32 %v15783_v10, %v15623_v13  ;;  %v15815_v13 = vrot.slane %v15742_v1, %v19198_v22 }
 0xa8b   :  { %15892 = vadd.xlane.f32.xlu0 %v15891_v14  ;;  %v15711_v14 = vcombine.high %v15709_v2, %v15709_v2 }
 0xa8c   :  { %v15894_v23 = vsel %vm5162_vm3, %v15870_v16, 0.0  ;;  %v15897_v34 = vsel %vm5162_vm3, %v15871_v24, 0.0 }
 0xa8e   :  { %v14521_v18 = vpop.f32.mrb[164].mxu0  ;;  %v14594_v19 = vpop.f32.mrb[164].mxu1 }
 0xa8f   :  { %v15624_v30 = vmax.f32 %v14521_v18, 0.0  ;;  %v18288_v31 = vpop.f32.mrb[165].mxu0  ;;  %v18295_v32 = vpop.f32.mrb[165].mxu1  ;;  %15895 = vadd.xlane.f32.xlu0 %v15894_v23  ;;  %v15625_v15 = vmax.f32 %v14594_v19, 0.0  ;;  %v15725_v19 = vrot.slane %v15709_v2, %v19193_v20  ;;  %v15739_v23 = vrot.slane %v15711_v14, %v19193_v20 }
 0xa91   :  { %v15872_v35 = vmul.f32 %v15787_v26, %v15624_v30  ;;  %v15873_v45 = vmul.f32 %v15791_v36, %v15625_v15  ;;  %v15819_v30 = vrot.slane %v15725_v19, %v19198_v22  ;;  %v15823_v3 = vrot.slane %v15739_v23, %v19198_v22 }
 0xa93   :  { %15898 = vadd.xlane.f32.xlu0 %v15897_v34  ;;  %v15900_v44 = vsel %vm5162_vm3, %v15872_v35, 0.0  ;;  %v15903_v51 = vsel %vm5162_vm3, %v15873_v45, 0.0  ;;  %v15741_v35 = vcombine.high %v15725_v19, %v15725_v19 }
 0xa95   :  { %v14667_v38 = vpop.f32.mrb[166].mxu0  ;;  %v14740_v39 = vpop.f32.mrb[166].mxu1 }
 0xa96   :  { %v15626_v4 = vmax.f32 %v14667_v38, 0.0  ;;  %v15627_v42 = vmax.f32 %v14740_v39, 0.0  ;;  %v18309_v21 = vpop.f32.mrb[167].mxu1  ;;  %v18302_v43 = vpop.f32.mrb[167].mxu0  ;;  %v15743_v38 = vcombine.high %v15739_v23, %v15739_v23 }
 0xa97   :  { %15901 = vadd.xlane.f32.xlu0 %v15900_v44  ;;  %v16352_v39 = vld.sshfl [vmem:[%s21851_s17 + $0x10] sm:$0x33 pattern:$0x75316420]  ;;  %v15827_v43 = vrot.slane %v15741_v35, %v19198_v22 }
 0xa98   :  { %v15874_v49 = vmul.f32 %v15795_v37, %v15626_v4  ;;  %v15875_v12 = vmul.f32 %v15799_v40, %v15627_v42  ;;  %v15831_v44 = vrot.slane %v15743_v38, %v19198_v22  ;;  %v15751_v45 = vcombine.high %v16352_v39, %v16352_v39 }
 0xa9a   :  { %v15906_v50 = vsel %vm5162_vm3, %v15874_v49, 0.0  ;;  %v15909_v61 = vsel %vm5162_vm3, %v15875_v12, 0.0 }
 0xa9b   :  { %15907 = vadd.xlane.f32.xlu1 %v15906_v50  ;;  %15904 = vadd.xlane.f32.xlu0 %v15903_v51  ;;  %v15758_v51 = vrot.slane %v16352_v39, %v19193_v20 }
 0xa9c   :  { %v14886_v54 = vpop.f32.mrb[168].mxu1  ;;  %v14813_v55 = vpop.f32.mrb[168].mxu0 }
 0xa9d   :  { %v15628_v56 = vmax.f32 %v14813_v55, 0.0  ;;  %v18316_v57 = vpop.f32.mrb[169].mxu0  ;;  %v18323_v58 = vpop.f32.mrb[169].mxu1  ;;  %v15629_v60 = vmax.f32 %v14886_v54, 0.0  ;;  %v15765_v55 = vrot.slane %v15751_v45, %v19193_v20  ;;  %v15835_v59 = vrot.slane %v15758_v51, %v19198_v22 }
 0xa9f   :  { %15910 = vadd.xlane.f32.xlu0 %v15909_v61  ;;  %v15876_v0 = vmul.f32 %v15803_v53, %v15628_v56  ;;  %v15877_v6 = vmul.f32 %v15807_v62, %v15629_v60  ;;  %v15839_v60 = vrot.slane %v15765_v55, %v19198_v22  ;;  %v15767_v20 = vcombine.high %v15765_v55, %v15765_v55 }
 0xaa1   :  { %v15912_v5 = vsel %vm5162_vm3, %v15876_v0, 0.0  ;;  %v15915_v17 = vsel %vm5162_vm3, %v15877_v6, 0.0  ;;  %v15766_v0 = vcombine.high %v15758_v51, %v15758_v51  ;;  %v15847_v14 = vrot.slane %v15767_v20, %v19198_v22 }
 0xaa3   :  { %v14959_v7 = vpop.f32.mrb[170].mxu0  ;;  %v15032_v8 = vpop.f32.mrb[170].mxu1  ;;  %15913 = vadd.xlane.f32.xlu0 %v15912_v5 }
 0xaa4   :  { %v15630_v9 = vmax.f32 %v14959_v7, 0.0  ;;  %v18337_v10 = vpop.f32.mrb[171].mxu1  ;;  %v18330_v11 = vpop.f32.mrb[171].mxu0  ;;  %v15631_v16 = vmax.f32 %v15032_v8, 0.0 }
 0xaa6   :  { %v15878_v18 = vmul.f32 %v15811_v48, %v15630_v9  ;;  %v15879_v29 = vmul.f32 %v15815_v13, %v15631_v16  ;;  %v15843_v9 = vrot.slane %v15766_v0, %v19198_v22 }
 0xaa7   :  { %15916 = vadd.xlane.f32.xlu0 %v15915_v17 }
 0xaa8   :  { %v15918_v27 = vsel %vm5162_vm3, %v15878_v18, 0.0  ;;  %v15921_v15 = vsel %vm5162_vm3, %v15879_v29, 0.0 }
 0xaaa   :  { %v15105_v24 = vpop.f32.mrb[172].mxu0  ;;  %v15178_v26 = vpop.f32.mrb[172].mxu1 }
 0xaab   :  { %v15632_v31 = vmax.f32 %v15105_v24, 0.0  ;;  %v18344_v32 = vpop.f32.mrb[173].mxu0  ;;  %v18351_v33 = vpop.f32.mrb[173].mxu1  ;;  %15919 = vadd.xlane.f32.xlu0 %v15918_v27  ;;  %v15633_v28 = vmax.f32 %v15178_v26, 0.0 }
 0xaad   :  { %v15880_v34 = vmul.f32 %v15819_v30, %v15632_v31  ;;  %v15881_v21 = vmul.f32 %v15823_v3, %v15633_v28 }
 0xaaf   :  { %15922 = vadd.xlane.f32.xlu0 %v15921_v15  ;;  %v15924_v42 = vsel %vm5162_vm3, %v15880_v34, 0.0  ;;  %v15927_v49 = vsel %vm5162_vm3, %v15881_v21, 0.0 }
 0xab1   :  { %v15251_v36 = vpop.f32.mrb[174].mxu0  ;;  %v15324_v37 = vpop.f32.mrb[174].mxu1 }
 0xab2   :  { %v15634_v40 = vmax.f32 %v15251_v36, 0.0  ;;  %v18365_v41 = vpop.f32.mrb[175].mxu1  ;;  %v18358_v4 = vpop.f32.mrb[175].mxu0  ;;  %v15635_v46 = vmax.f32 %v15324_v37, 0.0 }
 0xab3   :  { %15925 = vadd.xlane.f32.xlu0 %v15924_v42 }
 0xab4   :  { %v15882_v50 = vmul.f32 %v15827_v43, %v15634_v40  ;;  %v15883_v58 = vmul.f32 %v15831_v44, %v15635_v46 }
 0xab6   :  { %v15930_v57 = vsel %vm5162_vm3, %v15882_v50, 0.0  ;;  %v15933_v62 = vsel %vm5162_vm3, %v15883_v58, 0.0 }
 0xab7   :  { %15928 = vadd.xlane.f32.xlu0 %v15927_v49 }
 0xab8   :  { %v15397_v12 = vpop.f32.mrb[176].mxu0  ;;  %v15470_v52 = vpop.f32.mrb[176].mxu1 }
 0xab9   :  { %v18372_v53 = vpop.f32.mrb[177].mxu0  ;;  %v18379_v54 = vpop.f32.mrb[177].mxu1  ;;  %v15636_v56 = vmax.f32 %v15397_v12, 0.0  ;;  %v15637_v61 = vmax.f32 %v15470_v52, 0.0 }
 0xabb   :  { %15931 = vadd.xlane.f32.xlu0 %v15930_v57  ;;  %v15884_v63 = vmul.f32 %v15835_v59, %v15636_v56  ;;  %v15885_v8 = vmul.f32 %v15839_v60, %v15637_v61 }
 0xabd   :  { %v15936_v7 = vsel %vm5162_vm3, %v15884_v63, 0.0  ;;  %v15939_v11 = vsel %vm5162_vm3, %v15885_v8, 0.0 }
 0xabf   :  { %v15543_v1 = vpop.f32.mrb[178].mxu0  ;;  %v15616_v2 = vpop.f32.mrb[178].mxu1  ;;  %15934 = vadd.xlane.f32.xlu0 %v15933_v62 }
 0xac0   :  { %v18393_v5 = vpop.f32.mrb[179].mxu1  ;;  %v18386_v6 = vpop.f32.mrb[179].mxu0  ;;  %v15638_v48 = vmax.f32 %v15543_v1, 0.0  ;;  %v15639_v10 = vmax.f32 %v15616_v2, 0.0 }
 0xac2   :  { %v15886_v13 = vmul.f32 %v15843_v9, %v15638_v48  ;;  %v15887_v17 = vmul.f32 %v15847_v14, %v15639_v10 }
 0xac3   :  { %15937 = vadd.xlane.f32.xlu0 %v15936_v7 }
 0xac4   :  { %v15942_v16 = vsel %vm5162_vm3, %v15886_v13, 0.0  ;;  %v15945_v18 = vsel %vm5162_vm3, %v15887_v17, 0.0 }
 0xac7   :  { %15940 = vadd.xlane.f32.xlu0 %v15939_v11 }
 0xacb   :  { %15943 = vadd.xlane.f32.xlu0 %v15942_v16 }
 0xacf   :  { %15946 = vadd.xlane.f32.xlu0 %v15945_v18  ;;  %v16106_v18 = vld [vmem:[%s21852_s18] sm:$0xf] }
 0xb14   :  { %v15890_v19 = vpop.xlane.xlu0 %15889 }
 0xb15   :  { %v15971_v31 = vrot.slane %v15890_v19, %v20047_v25 }
 0xb18   :  { %v15893_v23 = vpop.xlane.xlu0 %15892 }
 0xb19   :  { %v15975_v27 = vrot.slane %v15893_v23, %v20047_v25 }
 0xb1b   :  { %v16048_v33 = vsel %vm5325_vm4, %v15975_v27, %v15971_v31 }
 0xb1c   :  { %v15896_v24 = vpop.xlane.xlu0 %15895 }
 0xb1d   :  { %v15979_v29 = vrot.slane %v15896_v24, %v20047_v25 }
 0xb1f   :  { %v16049_v3 = vsel %vm5327_vm5, %v15979_v29, %v16048_v33 }
 0xb20   :  { %v15899_v26 = vpop.xlane.xlu0 %15898 }
 0xb21   :  { %v15983_v22 = vrot.slane %v15899_v26, %v20047_v25 }
 0xb23   :  { %v16050_v15 = vsel %vm5329_vm6, %v15983_v22, %v16049_v3 }
 0xb24   :  { %v15902_v30 = vpop.xlane.xlu0 %15901 }
 0xb25   :  { %v15987_v32 = vrot.slane %v15902_v30, %v20047_v25 }
 0xb27   :  { %v16051_v36 = vsel %vm5331_vm7, %v15987_v32, %v16050_v15 }
 0xb28   :  { %v15905_v28 = vpop.xlane.xlu0 %15904  ;;  %v15908_v34 = vpop.xlane.xlu1 %15907 }
 0xb29   :  { %v15991_v35 = vrot.slane %v15905_v28, %v20047_v25  ;;  %v15995_v38 = vrot.slane %v15908_v34, %v20047_v25 }
 0xb2b   :  { %v16052_v37 = vsel %vm5333_vm8, %v15991_v35, %v16051_v36 }
 0xb2c   :  { %v15911_v39 = vpop.xlane.xlu0 %15910  ;;  %v16053_v41 = vsel %vm5335_vm9, %v15995_v38, %v16052_v37 }
 0xb2d   :  { %v15999_v40 = vrot.slane %v15911_v39, %v20047_v25 }
 0xb2f   :  { %v16054_v4 = vsel %vm5337_vm10, %v15999_v40, %v16053_v41 }
 0xb30   :  { %v15914_v42 = vpop.xlane.xlu0 %15913  ;;  %16068 = vxpose.xlu0.b32.start [1/3] (short) (narrow) %v16054_v4, 8 }
 0xb31   :  { %v16003_v51 = vrot.slane %v15914_v42, %v20047_v25 }
 0xb34   :  { %v15917_v21 = vpop.xlane.xlu0 %15916 }
 0xb35   :  { %v16007_v49 = vrot.slane %v15917_v21, %v20047_v25 }
 0xb37   :  { %v16055_v54 = vsel %vm5325_vm4, %v16007_v49, %v16003_v51 }
 0xb38   :  { %v15920_v43 = vpop.xlane.xlu0 %15919 }
 0xb39   :  { %v16011_v50 = vrot.slane %v15920_v43, %v20047_v25 }
 0xb3b   :  { %v16056_v56 = vsel %vm5327_vm5, %v16011_v50, %v16055_v54 }
 0xb3c   :  { %v15923_v44 = vpop.xlane.xlu0 %15922 }
 0xb3d   :  { %v16015_v12 = vrot.slane %v15923_v44, %v20047_v25 }
 0xb3f   :  { %v16057_v58 = vsel %vm5329_vm6, %v16015_v12, %v16056_v56 }
 0xb40   :  { %v15926_v45 = vpop.xlane.xlu0 %15925 }
 0xb41   :  { %v16019_v52 = vrot.slane %v15926_v45, %v20047_v25 }
 0xb43   :  { %v16058_v59 = vsel %vm5331_vm7, %v16019_v52, %v16057_v58 }
 0xb44   :  { %v15929_v46 = vpop.xlane.xlu0 %15928 }
 0xb45   :  { %v16023_v55 = vrot.slane %v15929_v46, %v20047_v25 }
 0xb47   :  { %v16059_v61 = vsel %vm5333_vm8, %v16023_v55, %v16058_v59 }
 0xb48   :  { %v15932_v53 = vpop.xlane.xlu0 %15931 }
 0xb49   :  { %v16027_v57 = vrot.slane %v15932_v53, %v20047_v25 }
 0xb4b   :  { %v16060_v63 = vsel %vm5335_vm9, %v16027_v57, %v16059_v61 }
 0xb4c   :  { %v15935_v60 = vpop.xlane.xlu0 %15934 }
 0xb4d   :  { %v16031_v62 = vrot.slane %v15935_v60, %v20047_v25 }
 0xb4f   :  { %v16061_v0 = vsel %vm5337_vm10, %v16031_v62, %v16060_v63 }
 0xb50   :  { %v15938_v1 = vpop.xlane.xlu0 %15937  ;;  %16069 = vxpose.xlu0.b32.cont [2/3] (short) (narrow) %v16061_v0, 8 }
 0xb51   :  { %v16035_v48 = vrot.slane %v15938_v1, %v20047_v25 }
 0xb54   :  { %v15941_v2 = vpop.xlane.xlu0 %15940 }
 0xb55   :  { %v16039_v6 = vrot.slane %v15941_v2, %v20047_v25 }
 0xb57   :  { %v16062_v8 = vsel %vm5325_vm4, %v16039_v6, %v16035_v48 }
 0xb58   :  { %v15944_v5 = vpop.xlane.xlu0 %15943 }
 0xb59   :  { %v16043_v20 = vrot.slane %v15944_v5, %v20047_v25 }
 0xb5b   :  { %v16063_v10 = vsel %vm5327_vm5, %v16043_v20, %v16062_v8 }
 0xb5c   :  { %v15947_v7 = vpop.xlane.xlu0 %15946 }
 0xb5d   :  { %v16047_v9 = vrot.slane %v15947_v7, %v20047_v25 }
 0xb5f   :  { %v16064_v11 = vsel %vm5329_vm6, %v16047_v9, %v16063_v10 }
 0xb60   :  { %16070 = vxpose.xlu0.b32.end [3/3] (short) (narrow) %v16064_v11, 8 }
 0xbd8   :  { %v16084_v13 = vpop.trf.xlu0 }
 0xbd9   :  { %v16353_v14 = vmul.f32 -1.442695, %v16084_v13 }
 0xbdb   :  { %19020 = vpow2.f32 %v16353_v14 }
 0xbe5   :  { %v19021_v16 = vpop.eup %19020 }
 0xbe6   :  { %v16103_v17 = vadd.f32 1.0, %v19021_v16 }
 0xbe8   :  { %19022 = vrcp.f32 %v16103_v17 }
 0xbf2   :  { %v19023_v19 = vpop.eup %19022 }
 0xbf3   :  { %vm16107_vm0 = vcmp.ge.f32.partialorder %v19023_v19, %v16106_v18 }
 0xbf4   :  { %v16108_v25 = vsel %vm16107_vm0, 1.0, %v19052_v47 }
 0xbf5   :  { %16110 = vst.msk [vmem:[#allocation2] sm:$0xf] %vm16109_vm15, %v16108_v25 }
 0xbf6   :  { %19035 = shalt.err (!%p19032_p4)
}
 0xbf7   :  { %s19036_s18 = scalar_lea.hbm %s21853_s19, 64 }
 0xbf8   :  { %p19037_p5 = scmp.ne.s32.totalorder %s21853_s19, %s19036_s18  ;;  %p19040_p6 = scmp.lt.u32.totalorder %s19036_s18, %s21853_s19 }
 0xbfa   :  { %p19042_p7 = pnand %p19040_p6, %p19037_p5 }
 0xbfc   :  { %19045 = shalt.err (!%p19042_p7)
}
 0xbfd   :  { %16120 = dma.vmem_to_hbm [thread:$0]  %s16118_s3, 64, %s21853_s19, [#allocation3]  }
 0xbfe   :  { %19046 = dma.done.wait [#allocation3], 64  }
 0xbff   :  { %19047 = vsyncadd [#allocation3], 4294967232 }
 0xc00   :  { %16124 = vsyncpa [#allocation3], 1 }

</bundles_post_ra>
